<compile_context>
chip_gen: v5e
topology: v5e:2x2
jax: 0.10.0
libtpu: 0.0.40
codegen_flags: <defaults>
</compile_context>

<pallas_src>
import functools
import math

import jax
import jax.numpy as jnp
from jax.experimental import pallas as pl
from jax.experimental.pallas import tpu as pltpu

F32 = jnp.float32
BF16 = jnp.bfloat16


# -----------------------------------------------------------------------------
# In-kernel helpers
# -----------------------------------------------------------------------------
def _mm(a, b):
    """MXU matmul: bf16 operands, f32 accumulate."""
    return jax.lax.dot_general(
        a.astype(BF16), b.astype(BF16),
        dimension_numbers=(((1,), (0,)), ((), ())),
        preferred_element_type=F32)


def _mm_nt(a, b):
    """MXU matmul contracting the last dim of both operands (a @ b.T)."""
    return jax.lax.dot_general(
        a.astype(BF16), b.astype(BF16),
        dimension_numbers=(((1,), (1,)), ((), ())),
        preferred_element_type=F32)


def _ln(x, gamma, beta, eps=1e-5):
    mu = jnp.mean(x, axis=-1, keepdims=True)
    xc = x - mu
    var = jnp.mean(xc * xc, axis=-1, keepdims=True)
    return xc * jax.lax.rsqrt(var + eps) * gamma + beta


def _softmax_rows(s):
    m = jnp.max(s, axis=-1, keepdims=True)
    p = jnp.exp(s - m)
    return p * pl.reciprocal(jnp.sum(p, axis=-1, keepdims=True), approx=True)


# -----------------------------------------------------------------------------
# Fused bidirectional GNN (+ BN + ReLU + concat + LeakyReLU), grid over batch
# -----------------------------------------------------------------------------
def _gdn_gnn_kernel(x_ref, w_ref, atti_ref, attj_ref, embi_ref, embj_ref,
                    adj_ref, bias_ref, bn_ref, o_ref):
    # x_ref    (1, N, 2T)   per-batch block: [x_f | flipped x_b] along time
    # w_ref    (2T, 2D)     block-diagonal [W_f 0; 0 W_b]  (bf16)
    # atti/attj (2, 2D)     per-direction attention vectors, lane-padded
    # embi (2, N, 1), embj (2, 1, N)  pre-folded  emb @ att_em  (constant)
    # adj  (2, N, N)        adj[d, i, j] = 1 iff edge j -> i
    # bias (1, 2D); bn (4, 2D) = [gamma, beta, run_mean, run_var] (dir-concat)
    # o    (1, N, 2D)       lane-dense fusion output for this batch
    n = x_ref.shape[1]
    two_d = w_ref.shape[1]
    d_out = two_d // 2

    x = x_ref[0]                                             # (N, 2T)
    g = _mm(x, w_ref[...])                                   # (N, 2D) = [g_f | g_b]
    atti = atti_ref[...]
    attj = attj_ref[...]
    embi = embi_ref[...]
    embj = embj_ref[...]
    adj = adj_ref[...]

    dir_out = []
    for d in range(2):                                       # 2 directions, static unroll
        # target score (VPU mul + lane reduce), source score via a 1-row matmul
        si = jnp.sum(g * atti[d:d + 1, :], axis=-1, keepdims=True) + embi[d]   # (N, 1)
        sj = _mm_nt(attj[d:d + 1, :], g) + embj[d]                              # (1, N)
        sc = si + sj                                                            # (N, N)
        sc = jnp.where(sc > 0, sc, 0.2 * sc)                 # GAT leaky_relu(0.2)
        logits = jnp.where(adj[d] > 0.5, sc, -1e9)
        alpha = _softmax_rows(logits)                        # softmax over in-neighbours
        dir_out.append(_mm(alpha, g))                        # (N, 2D); dir-d lanes valid

    col = jax.lax.broadcasted_iota(jnp.int32, (n, two_d), 1)
    agg = jnp.where(col < d_out, dir_out[0], dir_out[1]) + bias_ref[...]
    # BatchNorm1d (eval, running stats), per-direction params lane-concatenated
    agg = (agg - bn_ref[2:3, :]) * bn_ref[0:1, :] * jax.lax.rsqrt(bn_ref[3:4, :] + 1e-5) \
        + bn_ref[1:2, :]
    agg = jnp.maximum(agg, 0.0)                              # GNNLayer ReLU
    o_ref[0] = jnp.where(agg > 0, agg, 0.01 * agg)           # GDN LeakyReLU(0.01)


def gnn_fused(x_cat, gp, adj):
    bsz, n, twot = x_cat.shape
    two_d = gp['w'].shape[1]
    bmap = lambda b: (b, 0, 0)
    c2 = lambda b: (0, 0)
    c3 = lambda b: (0, 0, 0)

    flops = bsz * (2 * n * twot * two_d + 2 * (2 * two_d * n + 2 * n * n * two_d))
    trans = bsz * 2 * n * n
    args = (x_cat, gp['w'], gp['atti'], gp['attj'], gp['embi'], gp['embj'],
            adj, gp['bias'], gp['bn'])
    nbytes = sum(int(a.size) * a.dtype.itemsize for a in args) + bsz * n * two_d * 4

    return pl.pallas_call(
        _gdn_gnn_kernel,
        out_shape=jax.ShapeDtypeStruct((bsz, n, two_d), F32),
        grid=(bsz,),
        in_specs=[pl.BlockSpec((1, n, twot), bmap),
                  pl.BlockSpec(gp['w'].shape, c2),
                  pl.BlockSpec(gp['atti'].shape, c2),
                  pl.BlockSpec(gp['attj'].shape, c2),
                  pl.BlockSpec(gp['embi'].shape, c3),
                  pl.BlockSpec(gp['embj'].shape, c3),
                  pl.BlockSpec(adj.shape, c3),
                  pl.BlockSpec(gp['bias'].shape, c2),
                  pl.BlockSpec(gp['bn'].shape, c2)],
        out_specs=pl.BlockSpec((1, n, two_d), bmap),
        compiler_params=pltpu.CompilerParams(
            dimension_semantics=("parallel",),
            vmem_limit_bytes=32 * 1024 * 1024),
        cost_estimate=pl.CostEstimate(flops=int(flops), transcendentals=int(trans),
                                      bytes_accessed=int(nbytes)),
    )(*args)


# -----------------------------------------------------------------------------
# SAITS encoder: embedding_1 + positional enc + all (layer x inner) applications
# in ONE pallas_call.  grid = (batch, layer, inner); h lives in the resident
# output block across (layer, inner); per-layer weights selected by grid axis 1.
# -----------------------------------------------------------------------------
def _encoder_kernel(xcat_ref, embw_ref, embb_ref, pos_ref, mask_ref,
                    ln1_ref, wqkv_ref, bqkv_ref, wo_ref, bo_ref,
                    ln2_ref, w1_ref, b1_ref, w2_ref, b2_ref,
                    o_ref, *, n_heads, dh, dh_pad):
    l = pl.program_id(1)
    i = pl.program_id(2)

    @pl.when(jnp.logical_and(l == 0, i == 0))
    def _():
        # embedding_1 + positional encoding (Dropout = identity in eval mode)
        h0 = _mm(xcat_ref[0], embw_ref[...])                 # (T, d_model)
        o_ref[0] = h0 + embb_ref[...] + pos_ref[...]

    h = o_ref[0]                                             # (T, d_model) carried state
    ln1 = ln1_ref[0]
    hn = _ln(h, ln1[0:1, :], ln1[1:2, :])

    # fused, head-padded QKV projection: (T, D) @ (D, 3*H*dh_pad)
    qkv = _mm(hn, wqkv_ref[0]) + bqkv_ref[0]
    hp = n_heads * dh_pad
    scale = 1.0 / math.sqrt(dh)
    mask = mask_ref[...]

    heads = []
    for hd in range(n_heads):                                # 2 heads, static unroll
        c0 = hd * dh_pad                                     # 128-lane aligned slices
        q = qkv[:, c0:c0 + dh_pad]
        k = qkv[:, hp + c0:hp + c0 + dh_pad]
        v = qkv[:, 2 * hp + c0:2 * hp + c0 + dh_pad]
        s = _mm_nt(q, k) * scale + mask                      # diagonal attention mask
        p = _softmax_rows(s)
        heads.append(_mm(p, v))                              # (T, dh_pad)
    ctx = jnp.concatenate(heads, axis=-1)                    # (T, H*dh_pad)

    h1 = h + _mm(ctx, wo_ref[0]) + bo_ref[0]                 # attention out-proj + residual
    ln2 = ln2_ref[0]
    hn2 = _ln(h1, ln2[0:1, :], ln2[1:2, :])
    ff = jnp.maximum(_mm(hn2, w1_ref[0]) + b1_ref[0], 0.0)   # position-wise FFN
    ff = _mm(ff, w2_ref[0]) + b2_ref[0]
    o_ref[0] = h1 + ff


def saits_encoder(x_cat, p, mask, *, n_inner, n_heads, dh, dh_pad):
    bsz, t, f = x_cat.shape
    d_model = p['emb_w'].shape[1]
    n_layers = p['ln1'].shape[0]

    batch_map = lambda b, l, i: (b, 0, 0)
    layer_map = lambda b, l, i: (l, 0, 0)
    const2 = lambda b, l, i: (0, 0)
    full2 = lambda a: pl.BlockSpec(a.shape, const2)
    lay = lambda a: pl.BlockSpec((1,) + a.shape[1:], layer_map)

    hp = n_heads * dh_pad
    d_inner = p['w1'].shape[-1]
    per_step = (2 * t * d_model * 3 * hp + n_heads * 4 * t * t * dh_pad
                + 2 * t * hp * d_model + 4 * t * d_model * d_inner)
    flops = bsz * n_layers * n_inner * per_step + bsz * 2 * t * f * d_model
    trans = bsz * n_layers * n_inner * n_heads * t * t
    args = (x_cat, p['emb_w'], p['emb_b'], p['pos'], mask,
            p['ln1'], p['wqkv'], p['bqkv'], p['wo'], p['bo'],
            p['ln2'], p['w1'], p['b1'], p['w2'], p['b2'])
    nbytes = sum(int(a.size) * a.dtype.itemsize for a in args) + bsz * t * d_model * 4

    kernel = functools.partial(_encoder_kernel, n_heads=n_heads, dh=dh, dh_pad=dh_pad)
    return pl.pallas_call(
        kernel,
        out_shape=jax.ShapeDtypeStruct((bsz, t, d_model), F32),
        grid=(bsz, n_layers, n_inner),
        in_specs=[pl.BlockSpec((1, t, f), batch_map),
                  full2(p['emb_w']), full2(p['emb_b']), full2(p['pos']), full2(mask),
                  lay(p['ln1']), lay(p['wqkv']), lay(p['bqkv']), lay(p['wo']), lay(p['bo']),
                  lay(p['ln2']), lay(p['w1']), lay(p['b1']), lay(p['w2']), lay(p['b2'])],
        out_specs=pl.BlockSpec((1, t, d_model), batch_map),
        compiler_params=pltpu.CompilerParams(
            dimension_semantics=("parallel", "arbitrary", "arbitrary"),
            vmem_limit_bytes=32 * 1024 * 1024),
        cost_estimate=pl.CostEstimate(flops=int(flops), transcendentals=int(trans),
                                      bytes_accessed=int(nbytes)),
    )(*args)


# -----------------------------------------------------------------------------
# Fused TemporalClassifier: cross-attention + mean over nodes + Linear (padded)
# -----------------------------------------------------------------------------
def _classifier_kernel(fus_ref, enc_ref, wq_ref, bq_ref, wkv_ref, bkv_ref,
                       wo_ref, bo_ref, wc_ref, bc_ref, o_ref, *, n_heads, dh, dh_pad):
    # fus (1, N, D2) node features (query); enc (1, T, D2) encoder output (key/value)
    q_in = fus_ref[0]                                        # (N, D2)
    kv_in = enc_ref[0]                                       # (T, D2)
    hp = n_heads * dh_pad
    q = _mm(q_in, wq_ref[...]) + bq_ref[...]                 # (N, H*dh_pad)
    kv = _mm(kv_in, wkv_ref[...]) + bkv_ref[...]             # (T, 2*H*dh_pad)
    scale = 1.0 / math.sqrt(dh)

    heads = []
    for hd in range(n_heads):                                # 4 heads, static unroll
        c0 = hd * dh_pad
        qh = q[:, c0:c0 + dh_pad]
        kh = kv[:, c0:c0 + dh_pad]
        vh = kv[:, hp + c0:hp + c0 + dh_pad]
        s = _mm_nt(qh, kh) * scale                           # (N, T)
        p = _softmax_rows(s)
        heads.append(_mm(p, vh))                             # (N, dh_pad)
    ctx = jnp.concatenate(heads, axis=-1)                    # (N, H*dh_pad)
    merged = _mm(ctx, wo_ref[...]) + bo_ref[...]             # (N, D2)
    pooled = jnp.mean(merged, axis=0, keepdims=True)         # mean over nodes -> (1, D2)
    # classifier weight padded to 128 output lanes -> one unmasked lane-dense store
    o_ref[0] = _mm(pooled, wc_ref[...]) + bc_ref[...]


def classifier(fusion, enc, p, *, n_heads, dh, dh_pad):
    bsz, n, dm = fusion.shape
    _, t, de = enc.shape
    n_pad = p['wc'].shape[1]
    hp = n_heads * dh_pad
    bmap = lambda b: (b, 0, 0)
    c2 = lambda b: (0, 0)

    flops = bsz * (2 * n * dm * hp + 2 * t * de * 2 * hp
                   + n_heads * 4 * n * t * dh_pad + 2 * n * hp * dm + 2 * dm * n_pad)
    trans = bsz * n_heads * n * t
    args = (fusion, enc, p['wq'], p['bq'], p['wkv'], p['bkv'],
            p['wo'], p['bo'], p['wc'], p['bc'])
    nbytes = sum(int(a.size) * a.dtype.itemsize for a in args) + bsz * n_pad * 4

    kernel = functools.partial(_classifier_kernel, n_heads=n_heads, dh=dh, dh_pad=dh_pad)
    return pl.pallas_call(
        kernel,
        out_shape=jax.ShapeDtypeStruct((bsz, 1, n_pad), F32),
        grid=(bsz,),
        in_specs=[pl.BlockSpec((1, n, dm), bmap),
                  pl.BlockSpec((1, t, de), bmap),
                  pl.BlockSpec(p['wq'].shape, c2), pl.BlockSpec(p['bq'].shape, c2),
                  pl.BlockSpec(p['wkv'].shape, c2), pl.BlockSpec(p['bkv'].shape, c2),
                  pl.BlockSpec(p['wo'].shape, c2), pl.BlockSpec(p['bo'].shape, c2),
                  pl.BlockSpec(p['wc'].shape, c2), pl.BlockSpec(p['bc'].shape, c2)],
        out_specs=pl.BlockSpec((1, 1, n_pad), bmap),
        compiler_params=pltpu.CompilerParams(
            dimension_semantics=("parallel",),
            vmem_limit_bytes=32 * 1024 * 1024),
        cost_estimate=pl.CostEstimate(flops=int(flops), transcendentals=int(trans),
                                      bytes_accessed=int(nbytes)),
    )(*args)


# -----------------------------------------------------------------------------
# Plain-JAX glue (graph construction, positional encoding, parameter setup)
# -----------------------------------------------------------------------------
def topk_adjacency(emb, k):
    # TODO(synk): compute_edge_index is not defined in the reference source; the
    # GDN-style cosine-similarity top-k neighbour selection is used here.
    n = emb.shape[0]
    norms = jnp.sqrt(jnp.sum(emb * emb, axis=-1, keepdims=True))
    cos = (emb @ emb.T) / (norms * norms.T + 1e-12)
    _, idx = jax.lax.top_k(cos, k)                           # sources per target
    adj = jnp.zeros((n, n), F32).at[jnp.arange(n)[:, None], idx].set(1.0)
    return jnp.maximum(adj, jnp.eye(n, dtype=F32))           # add self loops


def sinusoidal_position_table(n_position, d_model):
    pos = jnp.arange(n_position, dtype=F32)[:, None]
    i = jnp.arange(d_model, dtype=F32)[None, :]
    angle = pos / jnp.power(10000.0, 2.0 * jnp.floor(i / 2.0) / d_model)
    even = (jnp.mod(jnp.arange(d_model), 2) == 0)
    return jnp.where(even, jnp.sin(angle), jnp.cos(angle)).astype(F32)


def gdn_forward(params, data, *, topk, num_classes=7, n_group_inner_layers=3):
    b, n, t = data.shape
    # ---- bidirectional GNN branch -------------------------------------------
    x_cat_gnn = jnp.concatenate([data, jnp.flip(data, axis=-1)], axis=-1)    # (B, N, 2T)
    adj = jnp.stack([topk_adjacency(params['embedding'], topk),
                     topk_adjacency(params['embedding_b'], topk)])           # (2, N, N)
    fusion = gnn_fused(x_cat_gnn, params['gnn'], adj)                        # (B, N, 2*dim)

    # ---- SAITS encoder branch ------------------------------------------------
    x_enc = jnp.transpose(data, (0, 2, 1))                                   # (B, T, N)
    x_cat_enc = jnp.concatenate([x_enc, jnp.ones_like(x_enc)], axis=-1)      # input_with_mask
    diag_mask = (-1e9) * jnp.eye(t, dtype=F32)                               # diagonal mask
    enc_out = saits_encoder(x_cat_enc, params['enc'], diag_mask,
                            n_inner=n_group_inner_layers, n_heads=2, dh=64, dh_pad=128)
    # NOTE: attn_weights post-processing in the reference does not affect `scores`.

    # ---- TemporalClassifier --------------------------------------------------
    scores_pad = classifier(fusion, enc_out, params['cls'], n_heads=4,
                            dh=fusion.shape[-1] // 4, dh_pad=128)
    return scores_pad[:, 0, :num_classes]


def _uniform(key, shape, fan_in):
    bound = 1.0 / math.sqrt(fan_in)
    return jax.random.uniform(key, shape, F32, -bound, bound)


def _pad_head_cols(w, n_heads, dh, dh_pad):
    """(fi, n_heads*dh) -> (fi, n_heads*dh_pad), zero-padded per head (lane-aligned)."""
    fi = w.shape[0]
    w3 = w.reshape(fi, n_heads, dh)
    out = jnp.zeros((fi, n_heads, dh_pad), w.dtype).at[:, :, :dh].set(w3)
    return out.reshape(fi, n_heads * dh_pad)


def _pad_head_rows(w, n_heads, dh, dh_pad):
    """(n_heads*dh, fo) -> (n_heads*dh_pad, fo), zero-padded per head."""
    fo = w.shape[1]
    w3 = w.reshape(n_heads, dh, fo)
    out = jnp.zeros((n_heads, dh_pad, fo), w.dtype).at[:, :dh, :].set(w3)
    return out.reshape(n_heads * dh_pad, fo)


def init_params(key, *, node_num, input_dim, dim, d_model, d_inner,
                n_saits_layers=3, num_classes=7, cls_pad=128,
                enc_heads=2, enc_dk=64, cls_heads=4, head_pad=128):
    keys = iter(jax.random.split(key, 64))
    nxt = lambda: next(keys)

    def lin_w(fi, fo):
        return _uniform(nxt(), (fi, fo), fi)

    hidden = 2 * dim                                         # classifier hidden == d_model
    actual_d_feature = 2 * node_num                          # input_with_mask=True

    # --- GNN: both directions folded into lane-concatenated / block-diag params ---
    w_f, w_b = lin_w(input_dim, dim), lin_w(input_dim, dim)
    w_blk = jnp.zeros((2 * input_dim, 2 * dim), F32)
    w_blk = w_blk.at[:input_dim, :dim].set(w_f).at[input_dim:, dim:].set(w_b)

    attx = jnp.stack([_uniform(nxt(), (2, dim), dim), _uniform(nxt(), (2, dim), dim)])
    attem = jnp.stack([_uniform(nxt(), (2, dim), dim), _uniform(nxt(), (2, dim), dim)])
    atti = jnp.zeros((2, 2 * dim), F32).at[0, :dim].set(attx[0, 0]).at[1, dim:].set(attx[1, 0])
    attj = jnp.zeros((2, 2 * dim), F32).at[0, :dim].set(attx[0, 1]).at[1, dim:].set(attx[1, 1])

    embedding = _uniform(nxt(), (node_num, dim), dim)        # kaiming_uniform(a=sqrt(5))
    embedding_b = _uniform(nxt(), (node_num, dim), dim)
    embi = jnp.stack([(embedding @ attem[0, 0])[:, None],
                      (embedding_b @ attem[1, 0])[:, None]])                 # (2, N, 1)
    embj = jnp.stack([(embedding @ attem[0, 1])[None, :],
                      (embedding_b @ attem[1, 1])[None, :]])                 # (2, 1, N)

    gnn = {'w': w_blk.astype(BF16),
           'atti': atti, 'attj': attj, 'embi': embi, 'embj': embj,
           'bias': jnp.zeros((1, 2 * dim), F32),
           'bn': jnp.stack([jnp.ones(2 * dim), jnp.zeros(2 * dim),
                            jnp.zeros(2 * dim), jnp.ones(2 * dim)]).astype(F32)}

    # --- SAITS encoder: per-layer params stacked on a leading layer axis ---------
    hp = enc_heads * head_pad

    def enc_layer():
        wq = _pad_head_cols(lin_w(d_model, d_model), enc_heads, enc_dk, head_pad)
        wk = _pad_head_cols(lin_w(d_model, d_model), enc_heads, enc_dk, head_pad)
        wv = _pad_head_cols(lin_w(d_model, d_model), enc_heads, enc_dk, head_pad)
        wo = _pad_head_rows(lin_w(d_model, d_model), enc_heads, enc_dk, head_pad)
        return dict(
            ln1=jnp.stack([jnp.ones(d_model), jnp.zeros(d_model)]).astype(F32),
            wqkv=jnp.concatenate([wq, wk, wv], axis=1),      # (D, 3*H*dh_pad)
            bqkv=jnp.zeros((1, 3 * hp), F32),
            wo=wo, bo=jnp.zeros((1, d_model), F32),
            ln2=jnp.stack([jnp.ones(d_model), jnp.zeros(d_model)]).astype(F32),
            w1=lin_w(d_model, d_inner), b1=jnp.zeros((1, d_inner), F32),
            w2=lin_w(d_inner, d_model), b2=jnp.zeros((1, d_model), F32))

    layers = [enc_layer() for _ in range(n_saits_layers)]
    stack = lambda name: jnp.stack([lyr[name] for lyr in layers])
    enc = {'emb_w': lin_w(actual_d_feature, d_model).astype(BF16),
           'emb_b': jnp.zeros((1, d_model), F32),
           'pos': sinusoidal_position_table(input_dim, d_model),
           'ln1': stack('ln1'),
           'wqkv': stack('wqkv').astype(BF16), 'bqkv': stack('bqkv'),
           'wo': stack('wo').astype(BF16), 'bo': stack('bo'),
           'ln2': stack('ln2'),
           'w1': stack('w1').astype(BF16), 'b1': stack('b1'),
           'w2': stack('w2').astype(BF16), 'b2': stack('b2')}

    # --- TemporalClassifier -------------------------------------------------------
    cdh = hidden // cls_heads
    chp = cls_heads * head_pad
    wq = _pad_head_cols(lin_w(hidden, hidden), cls_heads, cdh, head_pad)     # (D2, 512)
    wk = _pad_head_cols(lin_w(hidden, hidden), cls_heads, cdh, head_pad)
    wv = _pad_head_cols(lin_w(hidden, hidden), cls_heads, cdh, head_pad)
    wo = _pad_head_rows(lin_w(hidden, hidden), cls_heads, cdh, head_pad)     # (512, D2)
    wc = lin_w(hidden, num_classes)
    wc_pad = jnp.zeros((hidden, cls_pad), F32).at[:, :num_classes].set(wc)
    cls = {'wq': wq.astype(BF16), 'bq': jnp.zeros((1, chp), F32),
           'wkv': jnp.concatenate([wk, wv], axis=1).astype(BF16),
           'bkv': jnp.zeros((1, 2 * chp), F32),
           'wo': wo.astype(BF16), 'bo': jnp.zeros((1, hidden), F32),
           'wc': wc_pad.astype(BF16), 'bc': jnp.zeros((1, cls_pad), F32)}

    return {'embedding': embedding, 'embedding_b': embedding_b,
            'gnn': gnn, 'enc': enc, 'cls': cls}


if __name__ == "__main__":
    BATCH, NODE_NUM, INPUT_DIM = 2, 16, 10          # (batch, node_num, all_feature)
    DIM, D_MODEL, D_INNER, TOPK = 64, 128, 256, 5   # dim must be 64 so 2*dim == d_model

    root = jax.random.PRNGKey(0)
    k_data, k_params = jax.random.split(root)
    data = jax.random.normal(k_data, (BATCH, NODE_NUM, INPUT_DIM), dtype=F32)
    params = init_params(k_params, node_num=NODE_NUM, input_dim=INPUT_DIM,
                         dim=DIM, d_model=D_MODEL, d_inner=D_INNER)

    fwd = jax.jit(functools.partial(gdn_forward, topk=TOPK, num_classes=7))
    scores = fwd(params, data)
    jax.block_until_ready(scores)
    assert scores.shape == (BATCH, 7) and scores.dtype == jnp.float32
    print("KERNEL_OK")
</pallas_src>

<mosaic_0001>
module attributes {stable_mosaic.version = 11 : i64} {
  func.func @_classifier_kernel(%arg0: i32, %arg1: memref<1x16x128xf32, #tpu.memory_space<vmem>>, %arg2: memref<1x10x128xf32, #tpu.memory_space<vmem>>, %arg3: memref<128x512xbf16, #tpu.memory_space<vmem>>, %arg4: memref<1x512xf32, #tpu.memory_space<vmem>>, %arg5: memref<128x1024xbf16, #tpu.memory_space<vmem>>, %arg6: memref<1x1024xf32, #tpu.memory_space<vmem>>, %arg7: memref<512x128xbf16, #tpu.memory_space<vmem>>, %arg8: memref<1x128xf32, #tpu.memory_space<vmem>>, %arg9: memref<128x128xbf16, #tpu.memory_space<vmem>>, %arg10: memref<1x128xf32, #tpu.memory_space<vmem>>, %arg11: memref<1x1x128xf32, #tpu.memory_space<vmem>>) attributes {dimension_semantics = [#tpu.dimension_semantics<parallel>], iteration_bounds = array<i64: 2>, scalar_prefetch = 0 : i64, scratch_operands = 0 : i64, tpu.core_type = #tpu.core_type<tc>, window_params = [{transform_indices = @transform_0, window_bounds = array<i64: 1, 16, 128>}, {transform_indices = @transform_1, window_bounds = array<i64: 1, 10, 128>}, {pipeline_mode = #tpu.pipeline_mode<synchronous>, transform_indices = @transform_2, window_bounds = array<i64: 128, 512>}, {pipeline_mode = #tpu.pipeline_mode<synchronous>, transform_indices = @transform_3, window_bounds = array<i64: 1, 512>}, {pipeline_mode = #tpu.pipeline_mode<synchronous>, transform_indices = @transform_4, window_bounds = array<i64: 128, 1024>}, {pipeline_mode = #tpu.pipeline_mode<synchronous>, transform_indices = @transform_5, window_bounds = array<i64: 1, 1024>}, {pipeline_mode = #tpu.pipeline_mode<synchronous>, transform_indices = @transform_6, window_bounds = array<i64: 512, 128>}, {pipeline_mode = #tpu.pipeline_mode<synchronous>, transform_indices = @transform_7, window_bounds = array<i64: 1, 128>}, {pipeline_mode = #tpu.pipeline_mode<synchronous>, transform_indices = @transform_8, window_bounds = array<i64: 128, 128>}, {pipeline_mode = #tpu.pipeline_mode<synchronous>, transform_indices = @transform_9, window_bounds = array<i64: 1, 128>}, {transform_indices = @transform_10, window_bounds = array<i64: 1, 1, 128>}]} {
    %c0 = arith.constant 0 : index
    %c0_0 = arith.constant 0 : index
    %c0_1 = arith.constant 0 : index
    %0 = vector.load %arg1[%c0, %c0_0, %c0_1] : memref<1x16x128xf32, #tpu.memory_space<vmem>>, vector<1x16x128xf32>
    %1 = vector.shape_cast %0 : vector<1x16x128xf32> to vector<16x128xf32>
    %c0_2 = arith.constant 0 : index
    %c0_3 = arith.constant 0 : index
    %c0_4 = arith.constant 0 : index
    %2 = vector.load %arg2[%c0_2, %c0_3, %c0_4] : memref<1x10x128xf32, #tpu.memory_space<vmem>>, vector<1x10x128xf32>
    %3 = vector.shape_cast %2 : vector<1x10x128xf32> to vector<10x128xf32>
    %c0_5 = arith.constant 0 : index
    %c0_6 = arith.constant 0 : index
    %4 = vector.load %arg3[%c0_5, %c0_6] : memref<128x512xbf16, #tpu.memory_space<vmem>>, vector<128x512xbf16>
    %5 = arith.truncf %1 : vector<16x128xf32> to vector<16x128xbf16>
    %cst = arith.constant dense<0.000000e+00> : vector<16x512xf32>
    %6 = tpu.matmul %5, %4, %cst {dimension_numbers = #tpu.dot_dimension_numbers<[1], [0], [0], [1], [0, 0, 1, 1], [], []>} : vector<16x128xbf16>, vector<128x512xbf16>, vector<16x512xf32> -> vector<16x512xf32>
    %c0_7 = arith.constant 0 : index
    %c0_8 = arith.constant 0 : index
    %7 = vector.load %arg4[%c0_7, %c0_8] : memref<1x512xf32, #tpu.memory_space<vmem>>, vector<1x512xf32>
    %8 = vector.broadcast %7 : vector<1x512xf32> to vector<16x512xf32>
    %9 = arith.addf %6, %8 : vector<16x512xf32>
    %c0_9 = arith.constant 0 : index
    %c0_10 = arith.constant 0 : index
    %10 = vector.load %arg5[%c0_9, %c0_10] : memref<128x1024xbf16, #tpu.memory_space<vmem>>, vector<128x1024xbf16>
    %11 = arith.truncf %3 : vector<10x128xf32> to vector<10x128xbf16>
    %cst_11 = arith.constant dense<0.000000e+00> : vector<10x1024xf32>
    %12 = tpu.matmul %11, %10, %cst_11 {dimension_numbers = #tpu.dot_dimension_numbers<[1], [0], [0], [1], [0, 0, 1, 1], [], []>} : vector<10x128xbf16>, vector<128x1024xbf16>, vector<10x1024xf32> -> vector<10x1024xf32>
    %c0_12 = arith.constant 0 : index
    %c0_13 = arith.constant 0 : index
    %13 = vector.load %arg6[%c0_12, %c0_13] : memref<1x1024xf32, #tpu.memory_space<vmem>>, vector<1x1024xf32>
    %14 = vector.broadcast %13 : vector<1x1024xf32> to vector<10x1024xf32>
    %15 = arith.addf %12, %14 : vector<10x1024xf32>
    %16 = vector.extract_strided_slice %9 {offsets = [0, 0], sizes = [16, 128], strides = [1, 1]} : vector<16x512xf32> to vector<16x128xf32>
    %17 = vector.extract_strided_slice %15 {offsets = [0, 0], sizes = [10, 128], strides = [1, 1]} : vector<10x1024xf32> to vector<10x128xf32>
    %18 = vector.extract_strided_slice %15 {offsets = [0, 512], sizes = [10, 128], strides = [1, 1]} : vector<10x1024xf32> to vector<10x128xf32>
    %19 = arith.truncf %16 : vector<16x128xf32> to vector<16x128xbf16>
    %20 = arith.truncf %17 : vector<10x128xf32> to vector<10x128xbf16>
    %cst_14 = arith.constant dense<0.000000e+00> : vector<16x10xf32>
    %21 = tpu.matmul %19, %20, %cst_14 {dimension_numbers = #tpu.dot_dimension_numbers<[1], [1], [0], [0], [0, 0, 1, 0], [], []>} : vector<16x128xbf16>, vector<10x128xbf16>, vector<16x10xf32> -> vector<16x10xf32>
    %cst_15 = arith.constant 0.176776692 : f32
    %22 = vector.broadcast %cst_15 : f32 to vector<16x10xf32>
    %23 = arith.mulf %21, %22 : vector<16x10xf32>
    %cst_16 = arith.constant dense<0xFF800000> : vector<16xf32>
    %24 = vector.multi_reduction <maximumf>, %23, %cst_16 [1] : vector<16x10xf32> to vector<16xf32>
    %25 = vector.shape_cast %24 : vector<16xf32> to vector<16x1xf32>
    %26 = vector.broadcast %25 : vector<16x1xf32> to vector<16x10xf32>
    %27 = arith.subf %23, %26 : vector<16x10xf32>
    %28 = math.exp %27 : vector<16x10xf32>
    %cst_17 = arith.constant dense<0.000000e+00> : vector<16xf32>
    %29 = vector.multi_reduction <add>, %28, %cst_17 [1] : vector<16x10xf32> to vector<16xf32>
    %30 = vector.shape_cast %29 : vector<16xf32> to vector<16x1xf32>
    %31 = tpu.reciprocal %30 {approx = true} : vector<16x1xf32> -> vector<16x1xf32>
    %32 = vector.broadcast %31 : vector<16x1xf32> to vector<16x10xf32>
    %33 = arith.mulf %28, %32 : vector<16x10xf32>
    %34 = arith.truncf %33 : vector<16x10xf32> to vector<16x10xbf16>
    %35 = arith.truncf %18 : vector<10x128xf32> to vector<10x128xbf16>
    %cst_18 = arith.constant dense<0.000000e+00> : vector<16x128xf32>
    %36 = tpu.matmul %34, %35, %cst_18 {dimension_numbers = #tpu.dot_dimension_numbers<[1], [0], [0], [1], [0, 0, 1, 1], [], []>} : vector<16x10xbf16>, vector<10x128xbf16>, vector<16x128xf32> -> vector<16x128xf32>
    %37 = vector.extract_strided_slice %9 {offsets = [0, 128], sizes = [16, 128], strides = [1, 1]} : vector<16x512xf32> to vector<16x128xf32>
    %38 = vector.extract_strided_slice %15 {offsets = [0, 128], sizes = [10, 128], strides = [1, 1]} : vector<10x1024xf32> to vector<10x128xf32>
    %39 = vector.extract_strided_slice %15 {offsets = [0, 640], sizes = [10, 128], strides = [1, 1]} : vector<10x1024xf32> to vector<10x128xf32>
    %40 = arith.truncf %37 : vector<16x128xf32> to vector<16x128xbf16>
    %41 = arith.truncf %38 : vector<10x128xf32> to vector<10x128xbf16>
    %cst_19 = arith.constant dense<0.000000e+00> : vector<16x10xf32>
    %42 = tpu.matmul %40, %41, %cst_19 {dimension_numbers = #tpu.dot_dimension_numbers<[1], [1], [0], [0], [0, 0, 1, 0], [], []>} : vector<16x128xbf16>, vector<10x128xbf16>, vector<16x10xf32> -> vector<16x10xf32>
    %cst_20 = arith.constant 0.176776692 : f32
    %43 = vector.broadcast %cst_20 : f32 to vector<16x10xf32>
    %44 = arith.mulf %42, %43 : vector<16x10xf32>
    %cst_21 = arith.constant dense<0xFF800000> : vector<16xf32>
    %45 = vector.multi_reduction <maximumf>, %44, %cst_21 [1] : vector<16x10xf32> to vector<16xf32>
    %46 = vector.shape_cast %45 : vector<16xf32> to vector<16x1xf32>
    %47 = vector.broadcast %46 : vector<16x1xf32> to vector<16x10xf32>
    %48 = arith.subf %44, %47 : vector<16x10xf32>
    %49 = math.exp %48 : vector<16x10xf32>
    %cst_22 = arith.constant dense<0.000000e+00> : vector<16xf32>
    %50 = vector.multi_reduction <add>, %49, %cst_22 [1] : vector<16x10xf32> to vector<16xf32>
    %51 = vector.shape_cast %50 : vector<16xf32> to vector<16x1xf32>
    %52 = tpu.reciprocal %51 {approx = true} : vector<16x1xf32> -> vector<16x1xf32>
    %53 = vector.broadcast %52 : vector<16x1xf32> to vector<16x10xf32>
    %54 = arith.mulf %49, %53 : vector<16x10xf32>
    %55 = arith.truncf %54 : vector<16x10xf32> to vector<16x10xbf16>
    %56 = arith.truncf %39 : vector<10x128xf32> to vector<10x128xbf16>
    %cst_23 = arith.constant dense<0.000000e+00> : vector<16x128xf32>
    %57 = tpu.matmul %55, %56, %cst_23 {dimension_numbers = #tpu.dot_dimension_numbers<[1], [0], [0], [1], [0, 0, 1, 1], [], []>} : vector<16x10xbf16>, vector<10x128xbf16>, vector<16x128xf32> -> vector<16x128xf32>
    %58 = vector.extract_strided_slice %9 {offsets = [0, 256], sizes = [16, 128], strides = [1, 1]} : vector<16x512xf32> to vector<16x128xf32>
    %59 = vector.extract_strided_slice %15 {offsets = [0, 256], sizes = [10, 128], strides = [1, 1]} : vector<10x1024xf32> to vector<10x128xf32>
    %60 = vector.extract_strided_slice %15 {offsets = [0, 768], sizes = [10, 128], strides = [1, 1]} : vector<10x1024xf32> to vector<10x128xf32>
    %61 = arith.truncf %58 : vector<16x128xf32> to vector<16x128xbf16>
    %62 = arith.truncf %59 : vector<10x128xf32> to vector<10x128xbf16>
    %cst_24 = arith.constant dense<0.000000e+00> : vector<16x10xf32>
    %63 = tpu.matmul %61, %62, %cst_24 {dimension_numbers = #tpu.dot_dimension_numbers<[1], [1], [0], [0], [0, 0, 1, 0], [], []>} : vector<16x128xbf16>, vector<10x128xbf16>, vector<16x10xf32> -> vector<16x10xf32>
    %cst_25 = arith.constant 0.176776692 : f32
    %64 = vector.broadcast %cst_25 : f32 to vector<16x10xf32>
    %65 = arith.mulf %63, %64 : vector<16x10xf32>
    %cst_26 = arith.constant dense<0xFF800000> : vector<16xf32>
    %66 = vector.multi_reduction <maximumf>, %65, %cst_26 [1] : vector<16x10xf32> to vector<16xf32>
    %67 = vector.shape_cast %66 : vector<16xf32> to vector<16x1xf32>
    %68 = vector.broadcast %67 : vector<16x1xf32> to vector<16x10xf32>
    %69 = arith.subf %65, %68 : vector<16x10xf32>
    %70 = math.exp %69 : vector<16x10xf32>
    %cst_27 = arith.constant dense<0.000000e+00> : vector<16xf32>
    %71 = vector.multi_reduction <add>, %70, %cst_27 [1] : vector<16x10xf32> to vector<16xf32>
    %72 = vector.shape_cast %71 : vector<16xf32> to vector<16x1xf32>
    %73 = tpu.reciprocal %72 {approx = true} : vector<16x1xf32> -> vector<16x1xf32>
    %74 = vector.broadcast %73 : vector<16x1xf32> to vector<16x10xf32>
    %75 = arith.mulf %70, %74 : vector<16x10xf32>
    %76 = arith.truncf %75 : vector<16x10xf32> to vector<16x10xbf16>
    %77 = arith.truncf %60 : vector<10x128xf32> to vector<10x128xbf16>
    %cst_28 = arith.constant dense<0.000000e+00> : vector<16x128xf32>
    %78 = tpu.matmul %76, %77, %cst_28 {dimension_numbers = #tpu.dot_dimension_numbers<[1], [0], [0], [1], [0, 0, 1, 1], [], []>} : vector<16x10xbf16>, vector<10x128xbf16>, vector<16x128xf32> -> vector<16x128xf32>
    %79 = vector.extract_strided_slice %9 {offsets = [0, 384], sizes = [16, 128], strides = [1, 1]} : vector<16x512xf32> to vector<16x128xf32>
    %80 = vector.extract_strided_slice %15 {offsets = [0, 384], sizes = [10, 128], strides = [1, 1]} : vector<10x1024xf32> to vector<10x128xf32>
    %81 = vector.extract_strided_slice %15 {offsets = [0, 896], sizes = [10, 128], strides = [1, 1]} : vector<10x1024xf32> to vector<10x128xf32>
    %82 = arith.truncf %79 : vector<16x128xf32> to vector<16x128xbf16>
    %83 = arith.truncf %80 : vector<10x128xf32> to vector<10x128xbf16>
    %cst_29 = arith.constant dense<0.000000e+00> : vector<16x10xf32>
    %84 = tpu.matmul %82, %83, %cst_29 {dimension_numbers = #tpu.dot_dimension_numbers<[1], [1], [0], [0], [0, 0, 1, 0], [], []>} : vector<16x128xbf16>, vector<10x128xbf16>, vector<16x10xf32> -> vector<16x10xf32>
    %cst_30 = arith.constant 0.176776692 : f32
    %85 = vector.broadcast %cst_30 : f32 to vector<16x10xf32>
    %86 = arith.mulf %84, %85 : vector<16x10xf32>
    %cst_31 = arith.constant dense<0xFF800000> : vector<16xf32>
    %87 = vector.multi_reduction <maximumf>, %86, %cst_31 [1] : vector<16x10xf32> to vector<16xf32>
    %88 = vector.shape_cast %87 : vector<16xf32> to vector<16x1xf32>
    %89 = vector.broadcast %88 : vector<16x1xf32> to vector<16x10xf32>
    %90 = arith.subf %86, %89 : vector<16x10xf32>
    %91 = math.exp %90 : vector<16x10xf32>
    %cst_32 = arith.constant dense<0.000000e+00> : vector<16xf32>
    %92 = vector.multi_reduction <add>, %91, %cst_32 [1] : vector<16x10xf32> to vector<16xf32>
    %93 = vector.shape_cast %92 : vector<16xf32> to vector<16x1xf32>
    %94 = tpu.reciprocal %93 {approx = true} : vector<16x1xf32> -> vector<16x1xf32>
    %95 = vector.broadcast %94 : vector<16x1xf32> to vector<16x10xf32>
    %96 = arith.mulf %91, %95 : vector<16x10xf32>
    %97 = arith.truncf %96 : vector<16x10xf32> to vector<16x10xbf16>
    %98 = arith.truncf %81 : vector<10x128xf32> to vector<10x128xbf16>
    %cst_33 = arith.constant dense<0.000000e+00> : vector<16x128xf32>
    %99 = tpu.matmul %97, %98, %cst_33 {dimension_numbers = #tpu.dot_dimension_numbers<[1], [0], [0], [1], [0, 0, 1, 1], [], []>} : vector<16x10xbf16>, vector<10x128xbf16>, vector<16x128xf32> -> vector<16x128xf32>
    %100 = tpu.concatenate %36, %57, %78, %99 in 1 : vector<16x128xf32>, vector<16x128xf32>, vector<16x128xf32>, vector<16x128xf32> -> vector<16x512xf32>
    %c0_34 = arith.constant 0 : index
    %c0_35 = arith.constant 0 : index
    %101 = vector.load %arg7[%c0_34, %c0_35] : memref<512x128xbf16, #tpu.memory_space<vmem>>, vector<512x128xbf16>
    %102 = arith.truncf %100 : vector<16x512xf32> to vector<16x512xbf16>
    %cst_36 = arith.constant dense<0.000000e+00> : vector<16x128xf32>
    %103 = tpu.matmul %102, %101, %cst_36 {dimension_numbers = #tpu.dot_dimension_numbers<[1], [0], [0], [1], [0, 0, 1, 1], [], []>} : vector<16x512xbf16>, vector<512x128xbf16>, vector<16x128xf32> -> vector<16x128xf32>
    %c0_37 = arith.constant 0 : index
    %c0_38 = arith.constant 0 : index
    %104 = vector.load %arg8[%c0_37, %c0_38] : memref<1x128xf32, #tpu.memory_space<vmem>>, vector<1x128xf32>
    %105 = vector.broadcast %104 : vector<1x128xf32> to vector<16x128xf32>
    %106 = arith.addf %103, %105 : vector<16x128xf32>
    %cst_39 = arith.constant dense<0.000000e+00> : vector<128xf32>
    %107 = vector.multi_reduction <add>, %106, %cst_39 [0] : vector<16x128xf32> to vector<128xf32>
    %108 = vector.shape_cast %107 : vector<128xf32> to vector<1x128xf32>
    %cst_40 = arith.constant 1.600000e+01 : f32
    %109 = vector.broadcast %cst_40 : f32 to vector<1x128xf32>
    %110 = arith.divf %108, %109 : vector<1x128xf32>
    %c0_41 = arith.constant 0 : index
    %c0_42 = arith.constant 0 : index
    %111 = vector.load %arg9[%c0_41, %c0_42] : memref<128x128xbf16, #tpu.memory_space<vmem>>, vector<128x128xbf16>
    %112 = arith.truncf %110 : vector<1x128xf32> to vector<1x128xbf16>
    %cst_43 = arith.constant dense<0.000000e+00> : vector<1x128xf32>
    %113 = tpu.matmul %112, %111, %cst_43 {dimension_numbers = #tpu.dot_dimension_numbers<[1], [0], [0], [1], [0, 0, 1, 1], [], []>} : vector<1x128xbf16>, vector<128x128xbf16>, vector<1x128xf32> -> vector<1x128xf32>
    %c0_44 = arith.constant 0 : index
    %c0_45 = arith.constant 0 : index
    %114 = vector.load %arg10[%c0_44, %c0_45] : memref<1x128xf32, #tpu.memory_space<vmem>>, vector<1x128xf32>
    %115 = arith.addf %113, %114 : vector<1x128xf32>
    %c0_46 = arith.constant 0 : index
    %c0_47 = arith.constant 0 : index
    %c0_48 = arith.constant 0 : index
    %116 = vector.load %arg11[%c0_46, %c0_47, %c0_48] : memref<1x1x128xf32, #tpu.memory_space<vmem>>, vector<1x1x128xf32>
    %117 = vector.shape_cast %116 : vector<1x1x128xf32> to vector<1x128xf32>
    %118 = vector.shape_cast %115 : vector<1x128xf32> to vector<1x1x128xf32>
    tpu.vector_store %arg11[%c0_46, %c0_47, %c0_48], %118 {strides = array<i32>} : memref<1x1x128xf32, #tpu.memory_space<vmem>>, vector<1x1x128xf32>,
    return
  }
  func.func @transform_0(%arg0: i32) -> (i32, i32, i32) {
    %c0_i32 = arith.constant 0 : i32
    %c0_i32_0 = arith.constant 0 : i32
    %c0_i32_1 = arith.constant 0 : i32
    return %arg0, %c0_i32, %c0_i32_0 : i32, i32, i32
  }
  func.func @transform_1(%arg0: i32) -> (i32, i32, i32) {
    %c0_i32 = arith.constant 0 : i32
    %c0_i32_0 = arith.constant 0 : i32
    %c0_i32_1 = arith.constant 0 : i32
    return %arg0, %c0_i32, %c0_i32_0 : i32, i32, i32
  }
  func.func @transform_2(%arg0: i32) -> (i32, i32) {
    %c0_i32 = arith.constant 0 : i32
    %c0_i32_0 = arith.constant 0 : i32
    %c0_i32_1 = arith.constant 0 : i32
    return %c0_i32, %c0_i32_0 : i32, i32
  }
  func.func @transform_3(%arg0: i32) -> (i32, i32) {
    %c0_i32 = arith.constant 0 : i32
    %c0_i32_0 = arith.constant 0 : i32
    %c0_i32_1 = arith.constant 0 : i32
    return %c0_i32, %c0_i32_0 : i32, i32
  }
  func.func @transform_4(%arg0: i32) -> (i32, i32) {
    %c0_i32 = arith.constant 0 : i32
    %c0_i32_0 = arith.constant 0 : i32
    %c0_i32_1 = arith.constant 0 : i32
    return %c0_i32, %c0_i32_0 : i32, i32
  }
  func.func @transform_5(%arg0: i32) -> (i32, i32) {
    %c0_i32 = arith.constant 0 : i32
    %c0_i32_0 = arith.constant 0 : i32
    %c0_i32_1 = arith.constant 0 : i32
    return %c0_i32, %c0_i32_0 : i32, i32
  }
  func.func @transform_6(%arg0: i32) -> (i32, i32) {
    %c0_i32 = arith.constant 0 : i32
    %c0_i32_0 = arith.constant 0 : i32
    %c0_i32_1 = arith.constant 0 : i32
    return %c0_i32, %c0_i32_0 : i32, i32
  }
  func.func @transform_7(%arg0: i32) -> (i32, i32) {
    %c0_i32 = arith.constant 0 : i32
    %c0_i32_0 = arith.constant 0 : i32
    %c0_i32_1 = arith.constant 0 : i32
    return %c0_i32, %c0_i32_0 : i32, i32
  }
  func.func @transform_8(%arg0: i32) -> (i32, i32) {
    %c0_i32 = arith.constant 0 : i32
    %c0_i32_0 = arith.constant 0 : i32
    %c0_i32_1 = arith.constant 0 : i32
    return %c0_i32, %c0_i32_0 : i32, i32
  }
  func.func @transform_9(%arg0: i32) -> (i32, i32) {
    %c0_i32 = arith.constant 0 : i32
    %c0_i32_0 = arith.constant 0 : i32
    %c0_i32_1 = arith.constant 0 : i32
    return %c0_i32, %c0_i32_0 : i32, i32
  }
  func.func @transform_10(%arg0: i32) -> (i32, i32, i32) {
    %c0_i32 = arith.constant 0 : i32
    %c0_i32_0 = arith.constant 0 : i32
    %c0_i32_1 = arith.constant 0 : i32
    return %arg0, %c0_i32, %c0_i32_0 : i32, i32, i32
  }
}

module attributes {stable_mosaic.version = 11 : i64} {
  func.func @_gdn_gnn_kernel(%arg0: i32, %arg1: memref<1x16x20xf32, #tpu.memory_space<vmem>>, %arg2: memref<20x128xbf16, #tpu.memory_space<vmem>>, %arg3: memref<2x128xf32, #tpu.memory_space<vmem>>, %arg4: memref<2x128xf32, #tpu.memory_space<vmem>>, %arg5: memref<2x16x1xf32, #tpu.memory_space<vmem>>, %arg6: memref<2x1x16xf32, #tpu.memory_space<vmem>>, %arg7: memref<2x16x16xf32, #tpu.memory_space<vmem>>, %arg8: memref<1x128xf32, #tpu.memory_space<vmem>>, %arg9: memref<4x128xf32, #tpu.memory_space<vmem>>, %arg10: memref<1x16x128xf32, #tpu.memory_space<vmem>>) attributes {dimension_semantics = [#tpu.dimension_semantics<parallel>], iteration_bounds = array<i64: 2>, scalar_prefetch = 0 : i64, scratch_operands = 0 : i64, tpu.core_type = #tpu.core_type<tc>, window_params = [{transform_indices = @transform_0, window_bounds = array<i64: 1, 16, 20>}, {pipeline_mode = #tpu.pipeline_mode<synchronous>, transform_indices = @transform_1, window_bounds = array<i64: 20, 128>}, {pipeline_mode = #tpu.pipeline_mode<synchronous>, transform_indices = @transform_2, window_bounds = array<i64: 2, 128>}, {pipeline_mode = #tpu.pipeline_mode<synchronous>, transform_indices = @transform_3, window_bounds = array<i64: 2, 128>}, {pipeline_mode = #tpu.pipeline_mode<synchronous>, transform_indices = @transform_4, window_bounds = array<i64: 2, 16, 1>}, {pipeline_mode = #tpu.pipeline_mode<synchronous>, transform_indices = @transform_5, window_bounds = array<i64: 2, 1, 16>}, {pipeline_mode = #tpu.pipeline_mode<synchronous>, transform_indices = @transform_6, window_bounds = array<i64: 2, 16, 16>}, {pipeline_mode = #tpu.pipeline_mode<synchronous>, transform_indices = @transform_7, window_bounds = array<i64: 1, 128>}, {pipeline_mode = #tpu.pipeline_mode<synchronous>, transform_indices = @transform_8, window_bounds = array<i64: 4, 128>}, {transform_indices = @transform_9, window_bounds = array<i64: 1, 16, 128>}]} {
    %c0 = arith.constant 0 : index
    %c0_0 = arith.constant 0 : index
    %c0_1 = arith.constant 0 : index
    %0 = vector.load %arg1[%c0, %c0_0, %c0_1] : memref<1x16x20xf32, #tpu.memory_space<vmem>>, vector<1x16x20xf32>
    %1 = vector.shape_cast %0 : vector<1x16x20xf32> to vector<16x20xf32>
    %c0_2 = arith.constant 0 : index
    %c0_3 = arith.constant 0 : index
    %2 = vector.load %arg2[%c0_2, %c0_3] : memref<20x128xbf16, #tpu.memory_space<vmem>>, vector<20x128xbf16>
    %3 = arith.truncf %1 : vector<16x20xf32> to vector<16x20xbf16>
    %cst = arith.constant dense<0.000000e+00> : vector<16x128xf32>
    %4 = tpu.matmul %3, %2, %cst {dimension_numbers = #tpu.dot_dimension_numbers<[1], [0], [0], [1], [0, 0, 1, 1], [], []>} : vector<16x20xbf16>, vector<20x128xbf16>, vector<16x128xf32> -> vector<16x128xf32>
    %c0_4 = arith.constant 0 : index
    %c0_5 = arith.constant 0 : index
    %5 = vector.load %arg3[%c0_4, %c0_5] : memref<2x128xf32, #tpu.memory_space<vmem>>, vector<2x128xf32>
    %c0_6 = arith.constant 0 : index
    %c0_7 = arith.constant 0 : index
    %6 = vector.load %arg4[%c0_6, %c0_7] : memref<2x128xf32, #tpu.memory_space<vmem>>, vector<2x128xf32>
    %c0_8 = arith.constant 0 : index
    %c0_9 = arith.constant 0 : index
    %c0_10 = arith.constant 0 : index
    %7 = vector.load %arg5[%c0_8, %c0_9, %c0_10] : memref<2x16x1xf32, #tpu.memory_space<vmem>>, vector<2x16x1xf32>
    %c0_11 = arith.constant 0 : index
    %c0_12 = arith.constant 0 : index
    %c0_13 = arith.constant 0 : index
    %8 = vector.load %arg6[%c0_11, %c0_12, %c0_13] : memref<2x1x16xf32, #tpu.memory_space<vmem>>, vector<2x1x16xf32>
    %c0_14 = arith.constant 0 : index
    %c0_15 = arith.constant 0 : index
    %c0_16 = arith.constant 0 : index
    %9 = vector.load %arg7[%c0_14, %c0_15, %c0_16] : memref<2x16x16xf32, #tpu.memory_space<vmem>>, vector<2x16x16xf32>
    %10 = vector.extract_strided_slice %5 {offsets = [0, 0], sizes = [1, 128], strides = [1, 1]} : vector<2x128xf32> to vector<1x128xf32>
    %11 = vector.broadcast %10 : vector<1x128xf32> to vector<16x128xf32>
    %12 = arith.mulf %4, %11 : vector<16x128xf32>
    %cst_17 = arith.constant dense<0.000000e+00> : vector<16xf32>
    %13 = vector.multi_reduction <add>, %12, %cst_17 [1] : vector<16x128xf32> to vector<16xf32>
    %14 = vector.shape_cast %13 : vector<16xf32> to vector<16x1xf32>
    %15 = vector.extract_strided_slice %7 {offsets = [0, 0, 0], sizes = [1, 16, 1], strides = [1, 1, 1]} : vector<2x16x1xf32> to vector<1x16x1xf32>
    %16 = vector.shape_cast %15 : vector<1x16x1xf32> to vector<16x1xf32>
    %17 = arith.addf %14, %16 : vector<16x1xf32>
    %18 = vector.extract_strided_slice %6 {offsets = [0, 0], sizes = [1, 128], strides = [1, 1]} : vector<2x128xf32> to vector<1x128xf32>
    %19 = arith.truncf %18 : vector<1x128xf32> to vector<1x128xbf16>
    %20 = arith.truncf %4 : vector<16x128xf32> to vector<16x128xbf16>
    %cst_18 = arith.constant dense<0.000000e+00> : vector<1x16xf32>
    %21 = tpu.matmul %19, %20, %cst_18 {dimension_numbers = #tpu.dot_dimension_numbers<[1], [1], [0], [0], [0, 0, 1, 0], [], []>} : vector<1x128xbf16>, vector<16x128xbf16>, vector<1x16xf32> -> vector<1x16xf32>
    %22 = vector.extract_strided_slice %8 {offsets = [0, 0, 0], sizes = [1, 1, 16], strides = [1, 1, 1]} : vector<2x1x16xf32> to vector<1x1x16xf32>
    %23 = vector.shape_cast %22 : vector<1x1x16xf32> to vector<1x16xf32>
    %24 = arith.addf %21, %23 : vector<1x16xf32>
    %25 = vector.broadcast %17 : vector<16x1xf32> to vector<16x16xf32>
    %26 = vector.broadcast %24 : vector<1x16xf32> to vector<16x16xf32>
    %27 = arith.addf %25, %26 : vector<16x16xf32>
    %cst_19 = arith.constant 0.000000e+00 : f32
    %28 = vector.broadcast %cst_19 : f32 to vector<16x16xf32>
    %29 = arith.cmpf ogt, %27, %28 : vector<16x16xf32>
    %cst_20 = arith.constant 2.000000e-01 : f32
    %30 = vector.broadcast %cst_20 : f32 to vector<16x16xf32>
    %31 = arith.mulf %30, %27 : vector<16x16xf32>
    %32 = arith.select %29, %27, %31 : vector<16x16xi1>, vector<16x16xf32>
    %33 = vector.extract_strided_slice %9 {offsets = [0, 0, 0], sizes = [1, 16, 16], strides = [1, 1, 1]} : vector<2x16x16xf32> to vector<1x16x16xf32>
    %34 = vector.shape_cast %33 : vector<1x16x16xf32> to vector<16x16xf32>
    %cst_21 = arith.constant 5.000000e-01 : f32
    %35 = vector.broadcast %cst_21 : f32 to vector<16x16xf32>
    %36 = arith.cmpf ogt, %34, %35 : vector<16x16xf32>
    %cst_22 = arith.constant -1.000000e+09 : f32
    %37 = vector.broadcast %cst_22 : f32 to vector<16x16xf32>
    %38 = arith.select %36, %32, %37 : vector<16x16xi1>, vector<16x16xf32>
    %cst_23 = arith.constant dense<0xFF800000> : vector<16xf32>
    %39 = vector.multi_reduction <maximumf>, %38, %cst_23 [1] : vector<16x16xf32> to vector<16xf32>
    %40 = vector.shape_cast %39 : vector<16xf32> to vector<16x1xf32>
    %41 = vector.broadcast %40 : vector<16x1xf32> to vector<16x16xf32>
    %42 = arith.subf %38, %41 : vector<16x16xf32>
    %43 = math.exp %42 : vector<16x16xf32>
    %cst_24 = arith.constant dense<0.000000e+00> : vector<16xf32>
    %44 = vector.multi_reduction <add>, %43, %cst_24 [1] : vector<16x16xf32> to vector<16xf32>
    %45 = vector.shape_cast %44 : vector<16xf32> to vector<16x1xf32>
    %46 = tpu.reciprocal %45 {approx = true} : vector<16x1xf32> -> vector<16x1xf32>
    %47 = vector.broadcast %46 : vector<16x1xf32> to vector<16x16xf32>
    %48 = arith.mulf %43, %47 : vector<16x16xf32>
    %49 = arith.truncf %48 : vector<16x16xf32> to vector<16x16xbf16>
    %50 = arith.truncf %4 : vector<16x128xf32> to vector<16x128xbf16>
    %cst_25 = arith.constant dense<0.000000e+00> : vector<16x128xf32>
    %51 = tpu.matmul %49, %50, %cst_25 {dimension_numbers = #tpu.dot_dimension_numbers<[1], [0], [0], [1], [0, 0, 1, 1], [], []>} : vector<16x16xbf16>, vector<16x128xbf16>, vector<16x128xf32> -> vector<16x128xf32>
    %52 = vector.extract_strided_slice %5 {offsets = [1, 0], sizes = [1, 128], strides = [1, 1]} : vector<2x128xf32> to vector<1x128xf32>
    %53 = vector.broadcast %52 : vector<1x128xf32> to vector<16x128xf32>
    %54 = arith.mulf %4, %53 : vector<16x128xf32>
    %cst_26 = arith.constant dense<0.000000e+00> : vector<16xf32>
    %55 = vector.multi_reduction <add>, %54, %cst_26 [1] : vector<16x128xf32> to vector<16xf32>
    %56 = vector.shape_cast %55 : vector<16xf32> to vector<16x1xf32>
    %57 = vector.extract_strided_slice %7 {offsets = [1, 0, 0], sizes = [1, 16, 1], strides = [1, 1, 1]} : vector<2x16x1xf32> to vector<1x16x1xf32>
    %58 = vector.shape_cast %57 : vector<1x16x1xf32> to vector<16x1xf32>
    %59 = arith.addf %56, %58 : vector<16x1xf32>
    %60 = vector.extract_strided_slice %6 {offsets = [1, 0], sizes = [1, 128], strides = [1, 1]} : vector<2x128xf32> to vector<1x128xf32>
    %61 = arith.truncf %60 : vector<1x128xf32> to vector<1x128xbf16>
    %62 = arith.truncf %4 : vector<16x128xf32> to vector<16x128xbf16>
    %cst_27 = arith.constant dense<0.000000e+00> : vector<1x16xf32>
    %63 = tpu.matmul %61, %62, %cst_27 {dimension_numbers = #tpu.dot_dimension_numbers<[1], [1], [0], [0], [0, 0, 1, 0], [], []>} : vector<1x128xbf16>, vector<16x128xbf16>, vector<1x16xf32> -> vector<1x16xf32>
    %64 = vector.extract_strided_slice %8 {offsets = [1, 0, 0], sizes = [1, 1, 16], strides = [1, 1, 1]} : vector<2x1x16xf32> to vector<1x1x16xf32>
    %65 = vector.shape_cast %64 : vector<1x1x16xf32> to vector<1x16xf32>
    %66 = arith.addf %63, %65 : vector<1x16xf32>
    %67 = vector.broadcast %59 : vector<16x1xf32> to vector<16x16xf32>
    %68 = vector.broadcast %66 : vector<1x16xf32> to vector<16x16xf32>
    %69 = arith.addf %67, %68 : vector<16x16xf32>
    %cst_28 = arith.constant 0.000000e+00 : f32
    %70 = vector.broadcast %cst_28 : f32 to vector<16x16xf32>
    %71 = arith.cmpf ogt, %69, %70 : vector<16x16xf32>
    %cst_29 = arith.constant 2.000000e-01 : f32
    %72 = vector.broadcast %cst_29 : f32 to vector<16x16xf32>
    %73 = arith.mulf %72, %69 : vector<16x16xf32>
    %74 = arith.select %71, %69, %73 : vector<16x16xi1>, vector<16x16xf32>
    %75 = vector.extract_strided_slice %9 {offsets = [1, 0, 0], sizes = [1, 16, 16], strides = [1, 1, 1]} : vector<2x16x16xf32> to vector<1x16x16xf32>
    %76 = vector.shape_cast %75 : vector<1x16x16xf32> to vector<16x16xf32>
    %cst_30 = arith.constant 5.000000e-01 : f32
    %77 = vector.broadcast %cst_30 : f32 to vector<16x16xf32>
    %78 = arith.cmpf ogt, %76, %77 : vector<16x16xf32>
    %cst_31 = arith.constant -1.000000e+09 : f32
    %79 = vector.broadcast %cst_31 : f32 to vector<16x16xf32>
    %80 = arith.select %78, %74, %79 : vector<16x16xi1>, vector<16x16xf32>
    %cst_32 = arith.constant dense<0xFF800000> : vector<16xf32>
    %81 = vector.multi_reduction <maximumf>, %80, %cst_32 [1] : vector<16x16xf32> to vector<16xf32>
    %82 = vector.shape_cast %81 : vector<16xf32> to vector<16x1xf32>
    %83 = vector.broadcast %82 : vector<16x1xf32> to vector<16x16xf32>
    %84 = arith.subf %80, %83 : vector<16x16xf32>
    %85 = math.exp %84 : vector<16x16xf32>
    %cst_33 = arith.constant dense<0.000000e+00> : vector<16xf32>
    %86 = vector.multi_reduction <add>, %85, %cst_33 [1] : vector<16x16xf32> to vector<16xf32>
    %87 = vector.shape_cast %86 : vector<16xf32> to vector<16x1xf32>
    %88 = tpu.reciprocal %87 {approx = true} : vector<16x1xf32> -> vector<16x1xf32>
    %89 = vector.broadcast %88 : vector<16x1xf32> to vector<16x16xf32>
    %90 = arith.mulf %85, %89 : vector<16x16xf32>
    %91 = arith.truncf %90 : vector<16x16xf32> to vector<16x16xbf16>
    %92 = arith.truncf %4 : vector<16x128xf32> to vector<16x128xbf16>
    %cst_34 = arith.constant dense<0.000000e+00> : vector<16x128xf32>
    %93 = tpu.matmul %91, %92, %cst_34 {dimension_numbers = #tpu.dot_dimension_numbers<[1], [0], [0], [1], [0, 0, 1, 1], [], []>} : vector<16x16xbf16>, vector<16x128xbf16>, vector<16x128xf32> -> vector<16x128xf32>
    %94 = tpu.iota {dimensions = array<i32: 1>} : vector<16x128xi32>
    %c64_i32 = arith.constant 64 : i32
    %95 = vector.broadcast %c64_i32 : i32 to vector<16x128xi32>
    %96 = arith.cmpi slt, %94, %95 : vector<16x128xi32>
    %97 = arith.select %96, %51, %93 : vector<16x128xi1>, vector<16x128xf32>
    %c0_35 = arith.constant 0 : index
    %c0_36 = arith.constant 0 : index
    %98 = vector.load %arg8[%c0_35, %c0_36] : memref<1x128xf32, #tpu.memory_space<vmem>>, vector<1x128xf32>
    %99 = vector.broadcast %98 : vector<1x128xf32> to vector<16x128xf32>
    %100 = arith.addf %97, %99 : vector<16x128xf32>
    %c2 = arith.constant 2 : index
    %c0_37 = arith.constant 0 : index
    %101 = vector.load %arg9[%c2, %c0_37] : memref<4x128xf32, #tpu.memory_space<vmem>>, vector<1x128xf32>
    %102 = vector.broadcast %101 : vector<1x128xf32> to vector<16x128xf32>
    %103 = arith.subf %100, %102 : vector<16x128xf32>
    %c0_38 = arith.constant 0 : index
    %c0_39 = arith.constant 0 : index
    %104 = vector.load %arg9[%c0_38, %c0_39] : memref<4x128xf32, #tpu.memory_space<vmem>>, vector<1x128xf32>
    %105 = vector.broadcast %104 : vector<1x128xf32> to vector<16x128xf32>
    %106 = arith.mulf %103, %105 : vector<16x128xf32>
    %c3 = arith.constant 3 : index
    %c0_40 = arith.constant 0 : index
    %107 = vector.load %arg9[%c3, %c0_40] : memref<4x128xf32, #tpu.memory_space<vmem>>, vector<1x128xf32>
    %cst_41 = arith.constant 9.99999974E-6 : f32
    %108 = vector.broadcast %cst_41 : f32 to vector<1x128xf32>
    %109 = arith.addf %107, %108 : vector<1x128xf32>
    %110 = math.rsqrt %109 : vector<1x128xf32>
    %111 = vector.broadcast %110 : vector<1x128xf32> to vector<16x128xf32>
    %112 = arith.mulf %106, %111 : vector<16x128xf32>
    %c1 = arith.constant 1 : index
    %c0_42 = arith.constant 0 : index
    %113 = vector.load %arg9[%c1, %c0_42] : memref<4x128xf32, #tpu.memory_space<vmem>>, vector<1x128xf32>
    %114 = vector.broadcast %113 : vector<1x128xf32> to vector<16x128xf32>
    %115 = arith.addf %112, %114 : vector<16x128xf32>
    %cst_43 = arith.constant 0.000000e+00 : f32
    %116 = vector.broadcast %cst_43 : f32 to vector<16x128xf32>
    %117 = arith.maximumf %115, %116 : vector<16x128xf32>
    %cst_44 = arith.constant 0.000000e+00 : f32
    %118 = vector.broadcast %cst_44 : f32 to vector<16x128xf32>
    %119 = arith.cmpf ogt, %117, %118 : vector<16x128xf32>
    %cst_45 = arith.constant 0.00999999977 : f32
    %120 = vector.broadcast %cst_45 : f32 to vector<16x128xf32>
    %121 = arith.mulf %120, %117 : vector<16x128xf32>
    %122 = arith.select %119, %117, %121 : vector<16x128xi1>, vector<16x128xf32>
    %c0_46 = arith.constant 0 : index
    %c0_47 = arith.constant 0 : index
    %c0_48 = arith.constant 0 : index
    %123 = vector.load %arg10[%c0_46, %c0_47, %c0_48] : memref<1x16x128xf32, #tpu.memory_space<vmem>>, vector<1x16x128xf32>
    %124 = vector.shape_cast %123 : vector<1x16x128xf32> to vector<16x128xf32>
    %125 = vector.shape_cast %122 : vector<16x128xf32> to vector<1x16x128xf32>
    tpu.vector_store %arg10[%c0_46, %c0_47, %c0_48], %125 {strides = array<i32>} : memref<1x16x128xf32, #tpu.memory_space<vmem>>, vector<1x16x128xf32>,
    return
  }
  func.func @transform_0(%arg0: i32) -> (i32, i32, i32) {
    %c0_i32 = arith.constant 0 : i32
    %c0_i32_0 = arith.constant 0 : i32
    %c0_i32_1 = arith.constant 0 : i32
    return %arg0, %c0_i32, %c0_i32_0 : i32, i32, i32
  }
  func.func @transform_1(%arg0: i32) -> (i32, i32) {
    %c0_i32 = arith.constant 0 : i32
    %c0_i32_0 = arith.constant 0 : i32
    %c0_i32_1 = arith.constant 0 : i32
    return %c0_i32, %c0_i32_0 : i32, i32
  }
  func.func @transform_2(%arg0: i32) -> (i32, i32) {
    %c0_i32 = arith.constant 0 : i32
    %c0_i32_0 = arith.constant 0 : i32
    %c0_i32_1 = arith.constant 0 : i32
    return %c0_i32, %c0_i32_0 : i32, i32
  }
  func.func @transform_3(%arg0: i32) -> (i32, i32) {
    %c0_i32 = arith.constant 0 : i32
    %c0_i32_0 = arith.constant 0 : i32
    %c0_i32_1 = arith.constant 0 : i32
    return %c0_i32, %c0_i32_0 : i32, i32
  }
  func.func @transform_4(%arg0: i32) -> (i32, i32, i32) {
    %c0_i32 = arith.constant 0 : i32
    %c0_i32_0 = arith.constant 0 : i32
    %c0_i32_1 = arith.constant 0 : i32
    %c0_i32_2 = arith.constant 0 : i32
    return %c0_i32, %c0_i32_0, %c0_i32_1 : i32, i32, i32
  }
  func.func @transform_5(%arg0: i32) -> (i32, i32, i32) {
    %c0_i32 = arith.constant 0 : i32
    %c0_i32_0 = arith.constant 0 : i32
    %c0_i32_1 = arith.constant 0 : i32
    %c0_i32_2 = arith.constant 0 : i32
    return %c0_i32, %c0_i32_0, %c0_i32_1 : i32, i32, i32
  }
  func.func @transform_6(%arg0: i32) -> (i32, i32, i32) {
    %c0_i32 = arith.constant 0 : i32
    %c0_i32_0 = arith.constant 0 : i32
    %c0_i32_1 = arith.constant 0 : i32
    %c0_i32_2 = arith.constant 0 : i32
    return %c0_i32, %c0_i32_0, %c0_i32_1 : i32, i32, i32
  }
  func.func @transform_7(%arg0: i32) -> (i32, i32) {
    %c0_i32 = arith.constant 0 : i32
    %c0_i32_0 = arith.constant 0 : i32
    %c0_i32_1 = arith.constant 0 : i32
    return %c0_i32, %c0_i32_0 : i32, i32
  }
  func.func @transform_8(%arg0: i32) -> (i32, i32) {
    %c0_i32 = arith.constant 0 : i32
    %c0_i32_0 = arith.constant 0 : i32
    %c0_i32_1 = arith.constant 0 : i32
    return %c0_i32, %c0_i32_0 : i32, i32
  }
  func.func @transform_9(%arg0: i32) -> (i32, i32, i32) {
    %c0_i32 = arith.constant 0 : i32
    %c0_i32_0 = arith.constant 0 : i32
    %c0_i32_1 = arith.constant 0 : i32
    return %arg0, %c0_i32, %c0_i32_0 : i32, i32, i32
  }
}

module attributes {stable_mosaic.version = 11 : i64} {
  func.func @_encoder_kernel(%arg0: i32, %arg1: i32, %arg2: i32, %arg3: memref<1x10x32xf32, #tpu.memory_space<vmem>>, %arg4: memref<32x128xbf16, #tpu.memory_space<vmem>>, %arg5: memref<1x128xf32, #tpu.memory_space<vmem>>, %arg6: memref<10x128xf32, #tpu.memory_space<vmem>>, %arg7: memref<10x10xf32, #tpu.memory_space<vmem>>, %arg8: memref<1x2x128xf32, #tpu.memory_space<vmem>>, %arg9: memref<1x128x768xbf16, #tpu.memory_space<vmem>>, %arg10: memref<1x1x768xf32, #tpu.memory_space<vmem>>, %arg11: memref<1x256x128xbf16, #tpu.memory_space<vmem>>, %arg12: memref<1x1x128xf32, #tpu.memory_space<vmem>>, %arg13: memref<1x2x128xf32, #tpu.memory_space<vmem>>, %arg14: memref<1x128x256xbf16, #tpu.memory_space<vmem>>, %arg15: memref<1x1x256xf32, #tpu.memory_space<vmem>>, %arg16: memref<1x256x128xbf16, #tpu.memory_space<vmem>>, %arg17: memref<1x1x128xf32, #tpu.memory_space<vmem>>, %arg18: memref<1x10x128xf32, #tpu.memory_space<vmem>>) attributes {dimension_semantics = [#tpu.dimension_semantics<parallel>, #tpu.dimension_semantics<arbitrary>, #tpu.dimension_semantics<arbitrary>], iteration_bounds = array<i64: 2, 3, 3>, scalar_prefetch = 0 : i64, scratch_operands = 0 : i64, tpu.core_type = #tpu.core_type<tc>, window_params = [{transform_indices = @transform_0, window_bounds = array<i64: 1, 10, 32>}, {pipeline_mode = #tpu.pipeline_mode<synchronous>, transform_indices = @transform_1, window_bounds = array<i64: 32, 128>}, {pipeline_mode = #tpu.pipeline_mode<synchronous>, transform_indices = @transform_2, window_bounds = array<i64: 1, 128>}, {pipeline_mode = #tpu.pipeline_mode<synchronous>, transform_indices = @transform_3, window_bounds = array<i64: 10, 128>}, {pipeline_mode = #tpu.pipeline_mode<synchronous>, transform_indices = @transform_4, window_bounds = array<i64: 10, 10>}, {transform_indices = @transform_5, window_bounds = array<i64: 1, 2, 128>}, {transform_indices = @transform_6, window_bounds = array<i64: 1, 128, 768>}, {transform_indices = @transform_7, window_bounds = array<i64: 1, 1, 768>}, {transform_indices = @transform_8, window_bounds = array<i64: 1, 256, 128>}, {transform_indices = @transform_9, window_bounds = array<i64: 1, 1, 128>}, {transform_indices = @transform_10, window_bounds = array<i64: 1, 2, 128>}, {transform_indices = @transform_11, window_bounds = array<i64: 1, 128, 256>}, {transform_indices = @transform_12, window_bounds = array<i64: 1, 1, 256>}, {transform_indices = @transform_13, window_bounds = array<i64: 1, 256, 128>}, {transform_indices = @transform_14, window_bounds = array<i64: 1, 1, 128>}, {transform_indices = @transform_15, window_bounds = array<i64: 1, 10, 128>}]} {
    %c0_i32 = arith.constant 0 : i32
    %0 = arith.cmpi eq, %arg1, %c0_i32 : i32
    %c0_i32_0 = arith.constant 0 : i32
    %1 = arith.cmpi eq, %arg2, %c0_i32_0 : i32
    %2 = arith.andi %0, %1 : i1
    %3 = arith.extui %2 : i1 to i32
    %c0_i32_1 = arith.constant 0 : i32
    %4 = arith.cmpi ne, %3, %c0_i32_1 : i32
    scf.if %4 {
      %c0_63 = arith.constant 0 : index
      %c0_64 = arith.constant 0 : index
      %c0_65 = arith.constant 0 : index
      %140 = vector.load %arg3[%c0_63, %c0_64, %c0_65] : memref<1x10x32xf32, #tpu.memory_space<vmem>>, vector<1x10x32xf32>
      %141 = vector.shape_cast %140 : vector<1x10x32xf32> to vector<10x32xf32>
      %c0_66 = arith.constant 0 : index
      %c0_67 = arith.constant 0 : index
      %142 = vector.load %arg4[%c0_66, %c0_67] : memref<32x128xbf16, #tpu.memory_space<vmem>>, vector<32x128xbf16>
      %143 = arith.truncf %141 : vector<10x32xf32> to vector<10x32xbf16>
      %cst_68 = arith.constant dense<0.000000e+00> : vector<10x128xf32>
      %144 = tpu.matmul %143, %142, %cst_68 {dimension_numbers = #tpu.dot_dimension_numbers<[1], [0], [0], [1], [0, 0, 1, 1], [], []>} : vector<10x32xbf16>, vector<32x128xbf16>, vector<10x128xf32> -> vector<10x128xf32>
      %c0_69 = arith.constant 0 : index
      %c0_70 = arith.constant 0 : index
      %145 = vector.load %arg5[%c0_69, %c0_70] : memref<1x128xf32, #tpu.memory_space<vmem>>, vector<1x128xf32>
      %146 = vector.broadcast %145 : vector<1x128xf32> to vector<10x128xf32>
      %147 = arith.addf %144, %146 : vector<10x128xf32>
      %c0_71 = arith.constant 0 : index
      %c0_72 = arith.constant 0 : index
      %148 = vector.load %arg6[%c0_71, %c0_72] : memref<10x128xf32, #tpu.memory_space<vmem>>, vector<10x128xf32>
      %149 = arith.addf %147, %148 : vector<10x128xf32>
      %c0_73 = arith.constant 0 : index
      %c0_74 = arith.constant 0 : index
      %c0_75 = arith.constant 0 : index
      %150 = vector.load %arg18[%c0_73, %c0_74, %c0_75] : memref<1x10x128xf32, #tpu.memory_space<vmem>>, vector<1x10x128xf32>
      %151 = vector.shape_cast %150 : vector<1x10x128xf32> to vector<10x128xf32>
      %152 = vector.shape_cast %149 : vector<10x128xf32> to vector<1x10x128xf32>
      tpu.vector_store %arg18[%c0_73, %c0_74, %c0_75], %152 {strides = array<i32>} : memref<1x10x128xf32, #tpu.memory_space<vmem>>, vector<1x10x128xf32>,
    } else {
    }
    %c0 = arith.constant 0 : index
    %c0_2 = arith.constant 0 : index
    %c0_3 = arith.constant 0 : index
    %5 = vector.load %arg18[%c0, %c0_2, %c0_3] : memref<1x10x128xf32, #tpu.memory_space<vmem>>, vector<1x10x128xf32>
    %6 = vector.shape_cast %5 : vector<1x10x128xf32> to vector<10x128xf32>
    %c0_4 = arith.constant 0 : index
    %c0_5 = arith.constant 0 : index
    %c0_6 = arith.constant 0 : index
    %7 = vector.load %arg8[%c0_4, %c0_5, %c0_6] : memref<1x2x128xf32, #tpu.memory_space<vmem>>, vector<1x2x128xf32>
    %8 = vector.shape_cast %7 : vector<1x2x128xf32> to vector<2x128xf32>
    %9 = vector.extract_strided_slice %8 {offsets = [0, 0], sizes = [1, 128], strides = [1, 1]} : vector<2x128xf32> to vector<1x128xf32>
    %10 = vector.extract_strided_slice %8 {offsets = [1, 0], sizes = [1, 128], strides = [1, 1]} : vector<2x128xf32> to vector<1x128xf32>
    %cst = arith.constant dense<0.000000e+00> : vector<10xf32>
    %11 = vector.multi_reduction <add>, %6, %cst [1] : vector<10x128xf32> to vector<10xf32>
    %12 = vector.shape_cast %11 : vector<10xf32> to vector<10x1xf32>
    %cst_7 = arith.constant 1.280000e+02 : f32
    %13 = vector.broadcast %cst_7 : f32 to vector<10x1xf32>
    %14 = arith.divf %12, %13 : vector<10x1xf32>
    %15 = vector.broadcast %14 : vector<10x1xf32> to vector<10x128xf32>
    %16 = arith.subf %6, %15 : vector<10x128xf32>
    %17 = arith.mulf %16, %16 : vector<10x128xf32>
    %cst_8 = arith.constant dense<0.000000e+00> : vector<10xf32>
    %18 = vector.multi_reduction <add>, %17, %cst_8 [1] : vector<10x128xf32> to vector<10xf32>
    %19 = vector.shape_cast %18 : vector<10xf32> to vector<10x1xf32>
    %cst_9 = arith.constant 1.280000e+02 : f32
    %20 = vector.broadcast %cst_9 : f32 to vector<10x1xf32>
    %21 = arith.divf %19, %20 : vector<10x1xf32>
    %cst_10 = arith.constant 9.99999974E-6 : f32
    %22 = vector.broadcast %cst_10 : f32 to vector<10x1xf32>
    %23 = arith.addf %21, %22 : vector<10x1xf32>
    %24 = math.rsqrt %23 : vector<10x1xf32>
    %25 = vector.broadcast %24 : vector<10x1xf32> to vector<10x128xf32>
    %26 = arith.mulf %16, %25 : vector<10x128xf32>
    %27 = vector.broadcast %9 : vector<1x128xf32> to vector<10x128xf32>
    %28 = arith.mulf %26, %27 : vector<10x128xf32>
    %29 = vector.broadcast %10 : vector<1x128xf32> to vector<10x128xf32>
    %30 = arith.addf %28, %29 : vector<10x128xf32>
    %c0_11 = arith.constant 0 : index
    %c0_12 = arith.constant 0 : index
    %c0_13 = arith.constant 0 : index
    %31 = vector.load %arg9[%c0_11, %c0_12, %c0_13] : memref<1x128x768xbf16, #tpu.memory_space<vmem>>, vector<1x128x768xbf16>
    %32 = vector.shape_cast %31 : vector<1x128x768xbf16> to vector<128x768xbf16>
    %33 = arith.truncf %30 : vector<10x128xf32> to vector<10x128xbf16>
    %cst_14 = arith.constant dense<0.000000e+00> : vector<10x768xf32>
    %34 = tpu.matmul %33, %32, %cst_14 {dimension_numbers = #tpu.dot_dimension_numbers<[1], [0], [0], [1], [0, 0, 1, 1], [], []>} : vector<10x128xbf16>, vector<128x768xbf16>, vector<10x768xf32> -> vector<10x768xf32>
    %c0_15 = arith.constant 0 : index
    %c0_16 = arith.constant 0 : index
    %c0_17 = arith.constant 0 : index
    %35 = vector.load %arg10[%c0_15, %c0_16, %c0_17] : memref<1x1x768xf32, #tpu.memory_space<vmem>>, vector<1x1x768xf32>
    %36 = vector.shape_cast %35 : vector<1x1x768xf32> to vector<1x768xf32>
    %37 = vector.broadcast %36 : vector<1x768xf32> to vector<10x768xf32>
    %38 = arith.addf %34, %37 : vector<10x768xf32>
    %c0_18 = arith.constant 0 : index
    %c0_19 = arith.constant 0 : index
    %39 = vector.load %arg7[%c0_18, %c0_19] : memref<10x10xf32, #tpu.memory_space<vmem>>, vector<10x10xf32>
    %40 = vector.extract_strided_slice %38 {offsets = [0, 0], sizes = [10, 128], strides = [1, 1]} : vector<10x768xf32> to vector<10x128xf32>
    %41 = vector.extract_strided_slice %38 {offsets = [0, 256], sizes = [10, 128], strides = [1, 1]} : vector<10x768xf32> to vector<10x128xf32>
    %42 = vector.extract_strided_slice %38 {offsets = [0, 512], sizes = [10, 128], strides = [1, 1]} : vector<10x768xf32> to vector<10x128xf32>
    %43 = arith.truncf %40 : vector<10x128xf32> to vector<10x128xbf16>
    %44 = arith.truncf %41 : vector<10x128xf32> to vector<10x128xbf16>
    %cst_20 = arith.constant dense<0.000000e+00> : vector<10x10xf32>
    %45 = tpu.matmul %43, %44, %cst_20 {dimension_numbers = #tpu.dot_dimension_numbers<[1], [1], [0], [0], [0, 0, 1, 0], [], []>} : vector<10x128xbf16>, vector<10x128xbf16>, vector<10x10xf32> -> vector<10x10xf32>
    %cst_21 = arith.constant 1.250000e-01 : f32
    %46 = vector.broadcast %cst_21 : f32 to vector<10x10xf32>
    %47 = arith.mulf %45, %46 : vector<10x10xf32>
    %48 = arith.addf %47, %39 : vector<10x10xf32>
    %cst_22 = arith.constant dense<0xFF800000> : vector<10xf32>
    %49 = vector.multi_reduction <maximumf>, %48, %cst_22 [1] : vector<10x10xf32> to vector<10xf32>
    %50 = vector.shape_cast %49 : vector<10xf32> to vector<10x1xf32>
    %51 = vector.broadcast %50 : vector<10x1xf32> to vector<10x10xf32>
    %52 = arith.subf %48, %51 : vector<10x10xf32>
    %53 = math.exp %52 : vector<10x10xf32>
    %cst_23 = arith.constant dense<0.000000e+00> : vector<10xf32>
    %54 = vector.multi_reduction <add>, %53, %cst_23 [1] : vector<10x10xf32> to vector<10xf32>
    %55 = vector.shape_cast %54 : vector<10xf32> to vector<10x1xf32>
    %56 = tpu.reciprocal %55 {approx = true} : vector<10x1xf32> -> vector<10x1xf32>
    %57 = vector.broadcast %56 : vector<10x1xf32> to vector<10x10xf32>
    %58 = arith.mulf %53, %57 : vector<10x10xf32>
    %59 = arith.truncf %58 : vector<10x10xf32> to vector<10x10xbf16>
    %60 = arith.truncf %42 : vector<10x128xf32> to vector<10x128xbf16>
    %cst_24 = arith.constant dense<0.000000e+00> : vector<10x128xf32>
    %61 = tpu.matmul %59, %60, %cst_24 {dimension_numbers = #tpu.dot_dimension_numbers<[1], [0], [0], [1], [0, 0, 1, 1], [], []>} : vector<10x10xbf16>, vector<10x128xbf16>, vector<10x128xf32> -> vector<10x128xf32>
    %62 = vector.extract_strided_slice %38 {offsets = [0, 128], sizes = [10, 128], strides = [1, 1]} : vector<10x768xf32> to vector<10x128xf32>
    %63 = vector.extract_strided_slice %38 {offsets = [0, 384], sizes = [10, 128], strides = [1, 1]} : vector<10x768xf32> to vector<10x128xf32>
    %64 = vector.extract_strided_slice %38 {offsets = [0, 640], sizes = [10, 128], strides = [1, 1]} : vector<10x768xf32> to vector<10x128xf32>
    %65 = arith.truncf %62 : vector<10x128xf32> to vector<10x128xbf16>
    %66 = arith.truncf %63 : vector<10x128xf32> to vector<10x128xbf16>
    %cst_25 = arith.constant dense<0.000000e+00> : vector<10x10xf32>
    %67 = tpu.matmul %65, %66, %cst_25 {dimension_numbers = #tpu.dot_dimension_numbers<[1], [1], [0], [0], [0, 0, 1, 0], [], []>} : vector<10x128xbf16>, vector<10x128xbf16>, vector<10x10xf32> -> vector<10x10xf32>
    %cst_26 = arith.constant 1.250000e-01 : f32
    %68 = vector.broadcast %cst_26 : f32 to vector<10x10xf32>
    %69 = arith.mulf %67, %68 : vector<10x10xf32>
    %70 = arith.addf %69, %39 : vector<10x10xf32>
    %cst_27 = arith.constant dense<0xFF800000> : vector<10xf32>
    %71 = vector.multi_reduction <maximumf>, %70, %cst_27 [1] : vector<10x10xf32> to vector<10xf32>
    %72 = vector.shape_cast %71 : vector<10xf32> to vector<10x1xf32>
    %73 = vector.broadcast %72 : vector<10x1xf32> to vector<10x10xf32>
    %74 = arith.subf %70, %73 : vector<10x10xf32>
    %75 = math.exp %74 : vector<10x10xf32>
    %cst_28 = arith.constant dense<0.000000e+00> : vector<10xf32>
    %76 = vector.multi_reduction <add>, %75, %cst_28 [1] : vector<10x10xf32> to vector<10xf32>
    %77 = vector.shape_cast %76 : vector<10xf32> to vector<10x1xf32>
    %78 = tpu.reciprocal %77 {approx = true} : vector<10x1xf32> -> vector<10x1xf32>
    %79 = vector.broadcast %78 : vector<10x1xf32> to vector<10x10xf32>
    %80 = arith.mulf %75, %79 : vector<10x10xf32>
    %81 = arith.truncf %80 : vector<10x10xf32> to vector<10x10xbf16>
    %82 = arith.truncf %64 : vector<10x128xf32> to vector<10x128xbf16>
    %cst_29 = arith.constant dense<0.000000e+00> : vector<10x128xf32>
    %83 = tpu.matmul %81, %82, %cst_29 {dimension_numbers = #tpu.dot_dimension_numbers<[1], [0], [0], [1], [0, 0, 1, 1], [], []>} : vector<10x10xbf16>, vector<10x128xbf16>, vector<10x128xf32> -> vector<10x128xf32>
    %84 = tpu.concatenate %61, %83 in 1 : vector<10x128xf32>, vector<10x128xf32> -> vector<10x256xf32>
    %c0_30 = arith.constant 0 : index
    %c0_31 = arith.constant 0 : index
    %c0_32 = arith.constant 0 : index
    %85 = vector.load %arg11[%c0_30, %c0_31, %c0_32] : memref<1x256x128xbf16, #tpu.memory_space<vmem>>, vector<1x256x128xbf16>
    %86 = vector.shape_cast %85 : vector<1x256x128xbf16> to vector<256x128xbf16>
    %87 = arith.truncf %84 : vector<10x256xf32> to vector<10x256xbf16>
    %cst_33 = arith.constant dense<0.000000e+00> : vector<10x128xf32>
    %88 = tpu.matmul %87, %86, %cst_33 {dimension_numbers = #tpu.dot_dimension_numbers<[1], [0], [0], [1], [0, 0, 1, 1], [], []>} : vector<10x256xbf16>, vector<256x128xbf16>, vector<10x128xf32> -> vector<10x128xf32>
    %89 = arith.addf %6, %88 : vector<10x128xf32>
    %c0_34 = arith.constant 0 : index
    %c0_35 = arith.constant 0 : index
    %c0_36 = arith.constant 0 : index
    %90 = vector.load %arg12[%c0_34, %c0_35, %c0_36] : memref<1x1x128xf32, #tpu.memory_space<vmem>>, vector<1x1x128xf32>
    %91 = vector.shape_cast %90 : vector<1x1x128xf32> to vector<1x128xf32>
    %92 = vector.broadcast %91 : vector<1x128xf32> to vector<10x128xf32>
    %93 = arith.addf %89, %92 : vector<10x128xf32>
    %c0_37 = arith.constant 0 : index
    %c0_38 = arith.constant 0 : index
    %c0_39 = arith.constant 0 : index
    %94 = vector.load %arg13[%c0_37, %c0_38, %c0_39] : memref<1x2x128xf32, #tpu.memory_space<vmem>>, vector<1x2x128xf32>
    %95 = vector.shape_cast %94 : vector<1x2x128xf32> to vector<2x128xf32>
    %96 = vector.extract_strided_slice %95 {offsets = [0, 0], sizes = [1, 128], strides = [1, 1]} : vector<2x128xf32> to vector<1x128xf32>
    %97 = vector.extract_strided_slice %95 {offsets = [1, 0], sizes = [1, 128], strides = [1, 1]} : vector<2x128xf32> to vector<1x128xf32>
    %cst_40 = arith.constant dense<0.000000e+00> : vector<10xf32>
    %98 = vector.multi_reduction <add>, %93, %cst_40 [1] : vector<10x128xf32> to vector<10xf32>
    %99 = vector.shape_cast %98 : vector<10xf32> to vector<10x1xf32>
    %cst_41 = arith.constant 1.280000e+02 : f32
    %100 = vector.broadcast %cst_41 : f32 to vector<10x1xf32>
    %101 = arith.divf %99, %100 : vector<10x1xf32>
    %102 = vector.broadcast %101 : vector<10x1xf32> to vector<10x128xf32>
    %103 = arith.subf %93, %102 : vector<10x128xf32>
    %104 = arith.mulf %103, %103 : vector<10x128xf32>
    %cst_42 = arith.constant dense<0.000000e+00> : vector<10xf32>
    %105 = vector.multi_reduction <add>, %104, %cst_42 [1] : vector<10x128xf32> to vector<10xf32>
    %106 = vector.shape_cast %105 : vector<10xf32> to vector<10x1xf32>
    %cst_43 = arith.constant 1.280000e+02 : f32
    %107 = vector.broadcast %cst_43 : f32 to vector<10x1xf32>
    %108 = arith.divf %106, %107 : vector<10x1xf32>
    %cst_44 = arith.constant 9.99999974E-6 : f32
    %109 = vector.broadcast %cst_44 : f32 to vector<10x1xf32>
    %110 = arith.addf %108, %109 : vector<10x1xf32>
    %111 = math.rsqrt %110 : vector<10x1xf32>
    %112 = vector.broadcast %111 : vector<10x1xf32> to vector<10x128xf32>
    %113 = arith.mulf %103, %112 : vector<10x128xf32>
    %114 = vector.broadcast %96 : vector<1x128xf32> to vector<10x128xf32>
    %115 = arith.mulf %113, %114 : vector<10x128xf32>
    %116 = vector.broadcast %97 : vector<1x128xf32> to vector<10x128xf32>
    %117 = arith.addf %115, %116 : vector<10x128xf32>
    %c0_45 = arith.constant 0 : index
    %c0_46 = arith.constant 0 : index
    %c0_47 = arith.constant 0 : index
    %118 = vector.load %arg14[%c0_45, %c0_46, %c0_47] : memref<1x128x256xbf16, #tpu.memory_space<vmem>>, vector<1x128x256xbf16>
    %119 = vector.shape_cast %118 : vector<1x128x256xbf16> to vector<128x256xbf16>
    %120 = arith.truncf %117 : vector<10x128xf32> to vector<10x128xbf16>
    %cst_48 = arith.constant dense<0.000000e+00> : vector<10x256xf32>
    %121 = tpu.matmul %120, %119, %cst_48 {dimension_numbers = #tpu.dot_dimension_numbers<[1], [0], [0], [1], [0, 0, 1, 1], [], []>} : vector<10x128xbf16>, vector<128x256xbf16>, vector<10x256xf32> -> vector<10x256xf32>
    %c0_49 = arith.constant 0 : index
    %c0_50 = arith.constant 0 : index
    %c0_51 = arith.constant 0 : index
    %122 = vector.load %arg15[%c0_49, %c0_50, %c0_51] : memref<1x1x256xf32, #tpu.memory_space<vmem>>, vector<1x1x256xf32>
    %123 = vector.shape_cast %122 : vector<1x1x256xf32> to vector<1x256xf32>
    %124 = vector.broadcast %123 : vector<1x256xf32> to vector<10x256xf32>
    %125 = arith.addf %121, %124 : vector<10x256xf32>
    %cst_52 = arith.constant 0.000000e+00 : f32
    %126 = vector.broadcast %cst_52 : f32 to vector<10x256xf32>
    %127 = arith.maximumf %125, %126 : vector<10x256xf32>
    %c0_53 = arith.constant 0 : index
    %c0_54 = arith.constant 0 : index
    %c0_55 = arith.constant 0 : index
    %128 = vector.load %arg16[%c0_53, %c0_54, %c0_55] : memref<1x256x128xbf16, #tpu.memory_space<vmem>>, vector<1x256x128xbf16>
    %129 = vector.shape_cast %128 : vector<1x256x128xbf16> to vector<256x128xbf16>
    %130 = arith.truncf %127 : vector<10x256xf32> to vector<10x256xbf16>
    %cst_56 = arith.constant dense<0.000000e+00> : vector<10x128xf32>
    %131 = tpu.matmul %130, %129, %cst_56 {dimension_numbers = #tpu.dot_dimension_numbers<[1], [0], [0], [1], [0, 0, 1, 1], [], []>} : vector<10x256xbf16>, vector<256x128xbf16>, vector<10x128xf32> -> vector<10x128xf32>
    %c0_57 = arith.constant 0 : index
    %c0_58 = arith.constant 0 : index
    %c0_59 = arith.constant 0 : index
    %132 = vector.load %arg17[%c0_57, %c0_58, %c0_59] : memref<1x1x128xf32, #tpu.memory_space<vmem>>, vector<1x1x128xf32>
    %133 = vector.shape_cast %132 : vector<1x1x128xf32> to vector<1x128xf32>
    %134 = vector.broadcast %133 : vector<1x128xf32> to vector<10x128xf32>
    %135 = arith.addf %131, %134 : vector<10x128xf32>
    %136 = arith.addf %93, %135 : vector<10x128xf32>
    %c0_60 = arith.constant 0 : index
    %c0_61 = arith.constant 0 : index
    %c0_62 = arith.constant 0 : index
    %137 = vector.load %arg18[%c0_60, %c0_61, %c0_62] : memref<1x10x128xf32, #tpu.memory_space<vmem>>, vector<1x10x128xf32>
    %138 = vector.shape_cast %137 : vector<1x10x128xf32> to vector<10x128xf32>
    %139 = vector.shape_cast %136 : vector<10x128xf32> to vector<1x10x128xf32>
    tpu.vector_store %arg18[%c0_60, %c0_61, %c0_62], %139 {strides = array<i32>} : memref<1x10x128xf32, #tpu.memory_space<vmem>>, vector<1x10x128xf32>,
    return
  }
  func.func @transform_0(%arg0: i32, %arg1: i32, %arg2: i32) -> (i32, i32, i32) {
    %c0_i32 = arith.constant 0 : i32
    %c0_i32_0 = arith.constant 0 : i32
    %c0_i32_1 = arith.constant 0 : i32
    return %arg0, %c0_i32, %c0_i32_0 : i32, i32, i32
  }
  func.func @transform_1(%arg0: i32, %arg1: i32, %arg2: i32) -> (i32, i32) {
    %c0_i32 = arith.constant 0 : i32
    %c0_i32_0 = arith.constant 0 : i32
    %c0_i32_1 = arith.constant 0 : i32
    return %c0_i32, %c0_i32_0 : i32, i32
  }
  func.func @transform_2(%arg0: i32, %arg1: i32, %arg2: i32) -> (i32, i32) {
    %c0_i32 = arith.constant 0 : i32
    %c0_i32_0 = arith.constant 0 : i32
    %c0_i32_1 = arith.constant 0 : i32
    return %c0_i32, %c0_i32_0 : i32, i32
  }
  func.func @transform_3(%arg0: i32, %arg1: i32, %arg2: i32) -> (i32, i32) {
    %c0_i32 = arith.constant 0 : i32
    %c0_i32_0 = arith.constant 0 : i32
    %c0_i32_1 = arith.constant 0 : i32
    return %c0_i32, %c0_i32_0 : i32, i32
  }
  func.func @transform_4(%arg0: i32, %arg1: i32, %arg2: i32) -> (i32, i32) {
    %c0_i32 = arith.constant 0 : i32
    %c0_i32_0 = arith.constant 0 : i32
    %c0_i32_1 = arith.constant 0 : i32
    return %c0_i32, %c0_i32_0 : i32, i32
  }
  func.func @transform_5(%arg0: i32, %arg1: i32, %arg2: i32) -> (i32, i32, i32) {
    %c0_i32 = arith.constant 0 : i32
    %c0_i32_0 = arith.constant 0 : i32
    %c0_i32_1 = arith.constant 0 : i32
    return %arg1, %c0_i32, %c0_i32_0 : i32, i32, i32
  }
  func.func @transform_6(%arg0: i32, %arg1: i32, %arg2: i32) -> (i32, i32, i32) {
    %c0_i32 = arith.constant 0 : i32
    %c0_i32_0 = arith.constant 0 : i32
    %c0_i32_1 = arith.constant 0 : i32
    return %arg1, %c0_i32, %c0_i32_0 : i32, i32, i32
  }
  func.func @transform_7(%arg0: i32, %arg1: i32, %arg2: i32) -> (i32, i32, i32) {
    %c0_i32 = arith.constant 0 : i32
    %c0_i32_0 = arith.constant 0 : i32
    %c0_i32_1 = arith.constant 0 : i32
    return %arg1, %c0_i32, %c0_i32_0 : i32, i32, i32
  }
  func.func @transform_8(%arg0: i32, %arg1: i32, %arg2: i32) -> (i32, i32, i32) {
    %c0_i32 = arith.constant 0 : i32
    %c0_i32_0 = arith.constant 0 : i32
    %c0_i32_1 = arith.constant 0 : i32
    return %arg1, %c0_i32, %c0_i32_0 : i32, i32, i32
  }
  func.func @transform_9(%arg0: i32, %arg1: i32, %arg2: i32) -> (i32, i32, i32) {
    %c0_i32 = arith.constant 0 : i32
    %c0_i32_0 = arith.constant 0 : i32
    %c0_i32_1 = arith.constant 0 : i32
    return %arg1, %c0_i32, %c0_i32_0 : i32, i32, i32
  }
  func.func @transform_10(%arg0: i32, %arg1: i32, %arg2: i32) -> (i32, i32, i32) {
    %c0_i32 = arith.constant 0 : i32
    %c0_i32_0 = arith.constant 0 : i32
    %c0_i32_1 = arith.constant 0 : i32
    return %arg1, %c0_i32, %c0_i32_0 : i32, i32, i32
  }
  func.func @transform_11(%arg0: i32, %arg1: i32, %arg2: i32) -> (i32, i32, i32) {
    %c0_i32 = arith.constant 0 : i32
    %c0_i32_0 = arith.constant 0 : i32
    %c0_i32_1 = arith.constant 0 : i32
    return %arg1, %c0_i32, %c0_i32_0 : i32, i32, i32
  }
  func.func @transform_12(%arg0: i32, %arg1: i32, %arg2: i32) -> (i32, i32, i32) {
    %c0_i32 = arith.constant 0 : i32
    %c0_i32_0 = arith.constant 0 : i32
    %c0_i32_1 = arith.constant 0 : i32
    return %arg1, %c0_i32, %c0_i32_0 : i32, i32, i32
  }
  func.func @transform_13(%arg0: i32, %arg1: i32, %arg2: i32) -> (i32, i32, i32) {
    %c0_i32 = arith.constant 0 : i32
    %c0_i32_0 = arith.constant 0 : i32
    %c0_i32_1 = arith.constant 0 : i32
    return %arg1, %c0_i32, %c0_i32_0 : i32, i32, i32
  }
  func.func @transform_14(%arg0: i32, %arg1: i32, %arg2: i32) -> (i32, i32, i32) {
    %c0_i32 = arith.constant 0 : i32
    %c0_i32_0 = arith.constant 0 : i32
    %c0_i32_1 = arith.constant 0 : i32
    return %arg1, %c0_i32, %c0_i32_0 : i32, i32, i32
  }
  func.func @transform_15(%arg0: i32, %arg1: i32, %arg2: i32) -> (i32, i32, i32) {
    %c0_i32 = arith.constant 0 : i32
    %c0_i32_0 = arith.constant 0 : i32
    %c0_i32_1 = arith.constant 0 : i32
    return %arg0, %c0_i32, %c0_i32_0 : i32, i32, i32
  }
}

</mosaic_0001>

<bundles_post_ra>
// kernel: gdn_forward.3
= control target key start
LH: loop header
LB: loop body
LE: loop exit
PB: predicated region body
PF: predicated region fallthrough
CT: control target
= control target key end

     0   :  { %s777_s30 = smov 0   ;;  %s868_s0 = inlined_call_operand.vmem [shape: f32[2,16,20], index: 0, kind: input, shape index: {}]   ;;  %s869_s1 = inlined_call_operand.vmem [shape: bf16[20,128], index: 1, kind: input, shape index: {}]   ;;  %s870_s2 = inlined_call_operand.vmem [shape: f32[2,128], index: 2, kind: input, shape index: {}]   ;;  %s871_s3 = inlined_call_operand.vmem [shape: f32[2,128], index: 3, kind: input, shape index: {}]   ;;  %s872_s4 = inlined_call_operand.vmem [shape: f32[2,16,1], index: 4, kind: input, shape index: {}]   ;;  %s873_s5 = inlined_call_operand.vmem [shape: f32[2,1,16], index: 5, kind: input, shape index: {}]   ;;  %s874_s6 = inlined_call_operand.vmem [shape: f32[2,16,16], index: 6, kind: input, shape index: {}]   ;;  %s875_s7 = inlined_call_operand.vmem [shape: f32[1,128], index: 7, kind: input, shape index: {}]   ;;  %s876_s8 = inlined_call_operand.vmem [shape: f32[4,128], index: 8, kind: input, shape index: {}]   ;;  %s877_s9 = inlined_call_operand.vmem [shape: f32[2,16,128], index: 9, kind: output, shape index: {}]  }
   0x1 LB: > { %s663_s10 = sadd.s32 4294967295, %s724_s30   ;;  %p667_p0 = scmp.ge.s32.totalorder %s724_s30, 1  ;;  %s724_s30 = sphi %s777_s30, %s19_s30  }
   0x2   : > { %p287_p1 = scmp.lt.s32.totalorder %s724_s30, 3 }
   0x4   : > { %p288_p2 = pnand %p667_p0, %p287_p1 }
   0x5   : > { %p323_p3 = scmp.lt.s32.totalorder (!%p288_p2), %s663_s10, 1 }
   0x6   : > { %291 = sbr.rel (%p288_p2) target bundleno = 812 (0x32c), region = 56 }
   0xb   : > { %v338_v0 = vld [vmem:[%s869_s1 + $0x8] sm:$0x3]  ;;  %vm353_vm0 = vcmask 1041408   ;;  %s879_s10 = smov (!%p323_p3, %s663_s10), 1  ;;  %v683_v4 = vld [vmem:[%s869_s1] sm:$0xff]  ;;  %vm349_vm1 = vcmask 162816  }
   0xc   : > { %v345_v1 = vunpack.c.l.b16 %v338_v0  ;;  %s681_s13 = sshll.u32 %s879_s10, 4  ;;  %v371_v8 = vld [vmem:[%s870_s2] sm:$0x3]  ;;  %v726_v21 = vmov 0   ;;  %v375_v22 = vld [vmem:[%s872_s4 + $0x10] sm:$0xff]  ;;  %v376_v28 = vld [vmem:[%s872_s4 + $0x18] sm:$0xff] }
   0xd   : > { %s327_s16 = scalar_lea.vmem %s868_s0, %s681_s13  ;;  %v471_v9 = vperm.slane %v371_v8, 1  ;;  %v383_v10 = vperm.slane %v371_v8, 0  ;;  %v372_v18 = vld [vmem:[%s871_s3] sm:$0x3]  ;;  %694 = vset.pattern.permute.xlu0 %v726_v21  ;;  %693 = vset.pattern.permute.xlu2 %v726_v21  ;;  %v374_v30 = vld [vmem:[%s872_s4 + $0x8] sm:$0xff]  ;;  %vm430_vm4 = vcmask 130048   ;;  %s332_s19 = scalar_lea.vmem %s877_s9, %s681_s13 }
   0xe   : > { %v347_v2 = vpack.c.b16 %v345_v1, %v345_v1  ;;  %v334_v5 = vld [vmem:[%s327_s16] sm:$0xff]  ;;  %v335_v6 = vld [vmem:[%s327_s16 + $0x8] sm:$0xff]  ;;  %v392_v19 = vpack.c.bf16 %v372_v18, %v372_v18  ;;  %695 = vset.pattern.permute.xlu1 %v726_v21  ;;  %v381_v59 = vld [vmem:[%s874_s6 + $0x10] sm:$0xff] }
   0xf   : > { %v339_v7 = vpack.c.bf16 %v335_v6, %v334_v5  ;;  %v373_v23 = vld [vmem:[%s872_s4] sm:$0xff]  ;;  %v380_v49 = vld [vmem:[%s874_s6 + $0x8] sm:$0xff]  ;;  %vm516_vm8 = vcmp.gt.f32.partialorder %v381_v59, 0.5 }
  0x10   : > { %v355_v3 = vsel %vm353_vm0, %v347_v2, 0  ;;  %v481_v20 = vshrl.u32 %v392_v19, 16  ;;  %v377_v37 = vld [vmem:[%s873_s5] sm:$0x1]  ;;  %vm427_vm6 = vcmp.gt.f32.partialorder %v380_v49, 0.5  ;;  %v382_v2 = vld [vmem:[%s874_s6 + $0x18] sm:$0xff]  ;;  %v560_v49 = vlaneseq }
  0x11   : > { %363 = vmatpush.bf16.msra.mxu0 %v355_v3  ;;  %v379_v42 = vld [vmem:[%s874_s6] sm:$0xff]  ;;  %vm517_vm10 = vcmp.gt.f32.partialorder %v382_v2, 0.5 }
  0x12   : > { %vm426_vm3 = vcmp.gt.f32.partialorder %v379_v42, 0.5  ;;  %v378_v52 = vld [vmem:[%s873_s5 + $0x1] sm:$0x1]  ;;  %v579_v42 = vld [vmem:[%s876_s8 + $0x3] sm:$0x1] }
  0x15   : > { %364 = vmatpush.bf16.msra.mxu0 %v683_v4 }
  0x18   : > { %676 = vmatmul.msk.bf16.vlgmr.msra.gmra.mxu0 %vm349_vm1, %v339_v7 }
  0x95   : > { %v366_v11 = vpop.f32.mrf.mxu0 }
  0x96   : > { %v472_v12 = vmul.f32 %v471_v9, %v366_v11  ;;  %v384_v13 = vmul.f32 %v383_v10, %v366_v11 }
  0x98   : > { %474 = vadd.xlane.f32.xlu1 %v472_v12  ;;  %386 = vadd.xlane.f32.xlu0 %v384_v13 }
  0x9d   : > { %v368_v14 = vpop.f32.mrf.mxu0 }
  0x9e   : > { %v393_v15 = vpack.c.bf16 %v368_v14, %v366_v11  ;;  %v473_v16 = vmul.f32 %v471_v9, %v368_v14  ;;  %v385_v17 = vmul.f32 %v383_v10, %v368_v14 }
  0xa0   : > { %476 = vadd.xlane.f32.xlu1 %v473_v16  ;;  %401 = vmatpush.bf16.xpose.msra.mxu1 %v393_v15 }
  0xa1   : > { %464 = vmatpush.bf16.msra.mxu2 %v393_v15  ;;  %491 = vmatpush.bf16.xpose.msra.mxu3 %v393_v15 }
  0xa2   : > { %388 = vadd.xlane.f32.xlu0 %v385_v17 }
  0xa5   : > { %553 = vmatpush.bf16.msrb.mxu2 %v393_v15 }
  0xa7   : > { %402 = vmatmul.bf16.vlgmr.msra.gmra.mxu1 %v392_v19 }
  0xa8   : > { %492 = vmatmul.bf16.vlgmr.msra.gmra.mxu3 %v481_v20 }
 0x10b   : > { %v475_v24 = vpop.xlane.xlu1 %474  ;;  %v387_v25 = vpop.xlane.xlu0 %386 }
 0x10c   : > { %v478_v26 = vadd.f32 %v475_v24, %v375_v22  ;;  %v390_v27 = vadd.f32 %v387_v25, %v373_v23 }
 0x10e   : > { %409 = vperm.xlu2 %693, %v390_v27   ;;  %499 = vperm.xlu0 %694, %v478_v26  }
 0x113   : > { %v477_v29 = vpop.xlane.xlu1 %476 }
 0x114   : > { %v479_v31 = vadd.f32 %v477_v29, %v376_v28 }
 0x115   : > { %v389_v32 = vpop.xlane.xlu0 %388 }
 0x116   : > { %v391_v33 = vadd.f32 %v389_v32, %v374_v30  ;;  %504 = vperm.xlu1 %695, %v479_v31  }
 0x118   : > { %414 = vperm.xlu2 %693, %v391_v33  }
 0x124   : > { %v403_v34 = vpop.f32.mrf.mxu1 }
 0x125   : > { %v404_v38 = vadd.f32 %v403_v34, %v377_v37 }
 0x127   : > { %v417_v40 = vperm.slane %v404_v38, 0 }
 0x12b   : > { %v493_v36 = vpop.f32.mrf.mxu3 }
 0x12c   : > { %v405_v35 = vpop.f32.mrf.mxu1  ;;  %v494_v56 = vadd.f32 %v493_v36, %v378_v52  ;;  %v561_v52 = vand.u32 127, %v560_v49 }
 0x12e   : > { %v507_v57 = vperm.slane %v494_v56, 0  ;;  %vm562_vm13 = vcmp.lt.s32.totalorder %v561_v52, 64  ;;  %v697_v56 = vld [vmem:[%s876_s8 + $0x2] ss:$0 sm:$0xff] }
 0x133   : > { %v495_v39 = vpop.f32.mrf.mxu3 }
 0x168   : > { %v410_v41 = vpop.permute.xlu2 %409 }
 0x169   : > { %v418_v43 = vadd.f32 %v417_v40, %v410_v41 }
 0x16b   : > { %v422_v44 = vmul.f32 0.2, %v418_v43  ;;  %vm420_vm2 = vcmp.gt.f32.partialorder %v418_v43, 0.0 }
 0x16d   : > { %v424_v45 = vsel %vm420_vm2, %v418_v43, %v422_v44  ;;  %v580_v43 = vadd.f32 1e-05, %v579_v42 }
 0x16e   : > { %v428_v46 = vsel %vm426_vm3, %v424_v45, -1e+09 }
 0x16f   : > { %v431_v47 = vsel %vm430_vm4, %v428_v46, -inf  ;;  %vm587_vm11 = vweird.f32 %v580_v43 }
 0x170   : > { %432 = vmax.xlane.f32.xlu2 %v431_v47 }
 0x172   : > { %v415_v48 = vpop.permute.xlu2 %414 }
 0x173   : > { %v419_v50 = vadd.f32 %v417_v40, %v415_v48 }
 0x175   : > { %v423_v51 = vmul.f32 0.2, %v419_v50  ;;  %vm421_vm5 = vcmp.gt.f32.partialorder %v419_v50, 0.0 }
 0x177   : > { %v425_v53 = vsel %vm421_vm5, %v419_v50, %v423_v51 }
 0x178   : > { %v429_v54 = vsel %vm427_vm6, %v425_v53, -1e+09 }
 0x179   : > { %v434_v55 = vsel %vm430_vm4, %v429_v54, -inf }
 0x17a   : > { %435 = vmax.xlane.f32.xlu1 %v434_v55 }
 0x180   : > { %v500_v58 = vpop.permute.xlu0 %499 }
 0x181   : > { %v508_v60 = vadd.f32 %v507_v57, %v500_v58 }
 0x183   : > { %v512_v61 = vmul.f32 0.2, %v508_v60  ;;  %vm510_vm7 = vcmp.gt.f32.partialorder %v508_v60, 0.0 }
 0x185   : > { %v514_v62 = vsel %vm510_vm7, %v508_v60, %v512_v61  ;;  %v698_v60 = vld [vmem:[%s876_s8] ss:$0 sm:$0xff] }
 0x186   : > { %v518_v63 = vsel %vm516_vm8, %v514_v62, -1e+09 }
 0x187   : > { %v520_v0 = vsel %vm430_vm4, %v518_v63, -inf }
 0x188   : > { %v505_v1 = vpop.permute.xlu1 %504  ;;  %521 = vmax.xlane.f32.xlu0 %v520_v0  ;;  %v699_v0 = vld [vmem:[%s876_s8 + $0x1] ss:$0 sm:$0xff] }
 0x189   : > { %v509_v3 = vadd.f32 %v507_v57, %v505_v1 }
 0x18b   : > { %v513_v4 = vmul.f32 0.2, %v509_v3  ;;  %vm511_vm9 = vcmp.gt.f32.partialorder %v509_v3, 0.0 }
 0x18d   : > { %v515_v5 = vsel %vm511_vm9, %v509_v3, %v513_v4 }
 0x18e   : > { %v519_v6 = vsel %vm517_vm10, %v515_v5, -1e+09 }
 0x18f   : > { %v523_v7 = vsel %vm430_vm4, %v519_v6, -inf }
 0x190   : > { %524 = vmax.xlane.f32.xlu2 %v523_v7 }
 0x1e3   : > { %v433_v8 = vpop.xlane.xlu2 %432 }
 0x1e4   : > { %v437_v9 = vsub.f32 %v428_v46, %v433_v8 }
 0x1e6   : > { %v439_v10 = vmul.f32 1.442695, %v437_v9 }
 0x1e8   : > { %700 = vpow2.f32 %v439_v10 }
 0x1ed   : > { %v436_v11 = vpop.xlane.xlu1 %435 }
 0x1ee   : > { %v701_v12 = vpop.eup %700  ;;  %v438_v13 = vsub.f32 %v429_v54, %v436_v11  ;;  %v696_v54 = vld [vmem:[%s875_s7] ss:$0 sm:$0xff] }
 0x1ef   : > { %v443_v14 = vsel %vm430_vm4, %v701_v12, 0.0 }
 0x1f0   : > { %v441_v15 = vmul.f32 1.442695, %v438_v13  ;;  %444 = vadd.xlane.f32.xlu2 %v443_v14 }
 0x1f2   : > { %702 = vpow2.f32 %v441_v15 }
 0x1f8   : > { %v703_v16 = vpop.eup %702 }
 0x1f9   : > { %v446_v17 = vsel %vm430_vm4, %v703_v16, 0.0 }
 0x1fa   : > { %447 = vadd.xlane.f32.xlu2 %v446_v17 }
 0x1fb   : > { %v522_v18 = vpop.xlane.xlu0 %521 }
 0x1fc   : > { %v526_v19 = vsub.f32 %v518_v63, %v522_v18 }
 0x1fe   : > { %v528_v20 = vmul.f32 1.442695, %v526_v19 }
 0x200   : > { %704 = vpow2.f32 %v528_v20 }
 0x203   : > { %v525_v21 = vpop.xlane.xlu2 %524 }
 0x204   : > { %v527_v22 = vsub.f32 %v519_v6, %v525_v21 }
 0x206   : > { %v705_v23 = vpop.eup %704  ;;  %v530_v24 = vmul.f32 1.442695, %v527_v22 }
 0x207   : > { %v532_v25 = vsel %vm430_vm4, %v705_v23, 0.0 }
 0x208   : > { %706 = vpow2.f32 %v530_v24  ;;  %533 = vadd.xlane.f32.xlu2 %v532_v25 }
 0x20e   : > { %v707_v26 = vpop.eup %706 }
 0x20f   : > { %v535_v27 = vsel %vm430_vm4, %v707_v26, 0.0 }
 0x210   : > { %536 = vadd.xlane.f32.xlu1 %v535_v27 }
 0x263   : > { %v445_v28 = vpop.xlane.xlu2 %444 }
 0x264   : > { %708 = vrcp.f32 %v445_v28 }
 0x26a   : > { %v709_v30 = vpop.eup %708 }
 0x26b   : > { %v451_v32 = vmul.f32 %v709_v30, %v701_v12 }
 0x26d   : > { %v448_v29 = vpop.xlane.xlu2 %447 }
 0x26e   : > { %710 = vrcp.f32 %v448_v29 }
 0x274   : > { %v711_v31 = vpop.eup %710 }
 0x275   : > { %v452_v33 = vmul.f32 %v711_v31, %v703_v16 }
 0x277   : > { %v453_v34 = vpack.c.bf16 %v452_v33, %v451_v32 }
 0x279   : > { %677 = vmatmul.msk.bf16.vlgmr.msra.gmra.mxu2 %vm430_vm4, %v453_v34 }
 0x27b   : > { %v534_v35 = vpop.xlane.xlu2 %533 }
 0x27c   : > { %712 = vrcp.f32 %v534_v35 }
 0x282   : > { %v713_v37 = vpop.eup %712 }
 0x283   : > { %v537_v36 = vpop.xlane.xlu1 %536  ;;  %v540_v39 = vmul.f32 %v713_v37, %v705_v23 }
 0x284   : > { %714 = vrcp.f32 %v537_v36 }
 0x285   : > { %716 = vrsqrt.f32 %v580_v43 }
 0x28a   : > { %v715_v38 = vpop.eup %714 }
 0x28b   : > { %v541_v40 = vmul.f32 %v715_v38, %v707_v26  ;;  %v717_v44 = vpop.eup %716 }
 0x28c   : > { %v582_v45 = vmul.f32 %v717_v44, %v580_v43  ;;  %vm588_vm12 = vweird.f32 %v717_v44 }
 0x28d   : > { %v542_v41 = vpack.c.bf16 %v541_v40, %v540_v39  ;;  %vm589_vm14 = vmor %vm587_vm11, %vm588_vm12 }
 0x28e   : > { %v583_v47 = vmul.f32 %v717_v44, %v582_v45 }
 0x28f   : > { %678 = vmatmul.msk.bf16.vlgmr.msrb.gmra.mxu2 %vm430_vm4, %v542_v41 }
 0x290   : > { %v584_v48 = vmul.f32 0.5, %v583_v47 }
 0x292   : > { %v585_v51 = vsub.f32 1.5, %v584_v48 }
 0x294   : > { %v586_v53 = vmul.f32 %v717_v44, %v585_v51 }
 0x296   : > { %v590_v58 = vsel %vm589_vm14, %v717_v44, %v586_v53 }
 0x297   : > { %v591_v62 = vperm.slane %v590_v58, 0 }
 0x2fc   : > { %v466_v46 = vpop.f32.mrf.mxu2 }
 0x304   : > { %v468_v50 = vpop.f32.mrf.mxu2 }
 0x312   : > { %v555_v55 = vpop.f32.mrf.mxu2 }
 0x313   : > { %v563_v57 = vsel %vm562_vm13, %v466_v46, %v555_v55 }
 0x314   : > { %v569_v59 = vadd.f32 %v696_v54, %v563_v57 }
 0x316   : > { %v573_v61 = vsub.f32 %v569_v59, %v697_v56 }
 0x318   : > { %v577_v63 = vmul.f32 %v698_v60, %v573_v61 }
 0x31a   : > { %v592_v1 = vmul.f32 %v591_v62, %v577_v63  ;;  %v557_v2 = vpop.f32.mrf.mxu2 }
 0x31b   : > { %v564_v3 = vsel %vm562_vm13, %v468_v50, %v557_v2 }
 0x31c   : > { %v596_v4 = vadd.f32 %v699_v0, %v592_v1  ;;  %v570_v5 = vadd.f32 %v696_v54, %v564_v3 }
 0x31e   : > { %v598_v6 = vmax.f32 %v596_v4, 0.0  ;;  %v574_v7 = vsub.f32 %v570_v5, %v697_v56 }
 0x320   : > { %vm600_vm15 = vcmp.gt.f32.partialorder %v598_v6, 0.0  ;;  %v602_v8 = vmul.f32 0.01, %v598_v6  ;;  %v578_v9 = vmul.f32 %v698_v60, %v574_v7 }
 0x322   : > { %v604_v10 = vsel %vm600_vm15, %v598_v6, %v602_v8  ;;  %v593_v11 = vmul.f32 %v591_v62, %v578_v9 }
 0x323   : > { %606 = vst [vmem:[%s332_s19] sm:$0xff] %v604_v10 }
 0x324   : > { %v597_v12 = vadd.f32 %v699_v0, %v593_v11 }
 0x326   : > { %v599_v13 = vmax.f32 %v597_v12, 0.0 }
 0x328   : > { %vm601_vm0 = vcmp.gt.f32.partialorder %v599_v13, 0.0  ;;  %v603_v14 = vmul.f32 0.01, %v599_v13 }
 0x32a   : > { %v605_v15 = vsel %vm601_vm0, %v599_v13, %v603_v14 }
 0x32b   : > { %607 = vst [vmem:[%s332_s19 + $0x8] sm:$0xff] %v605_v15 }
 0x32c PF: > { %s19_s30 = sadd.s32 1, %s724_s30  }
 0x32d   : > { %p16_p4 = scmp.ge.s32.totalorder %s19_s30, 4  }
 0x32f   :  { %18 = sbr.rel (!%p16_p4) target bundleno = 1 (0x1), region = 86 }

// kernel: gdn_forward.4
= control target key start
LH: loop header
LB: loop body
LE: loop exit
PB: predicated region body
PF: predicated region fallthrough
CT: control target
= control target key end

     0   :  { %s2769_s18 = smov 0   ;;  %s2771_s19 = smov 0   ;;  %s3176_s0 = inlined_call_operand.vmem [shape: f32[2,10,32], index: 0, kind: input, shape index: {}]   ;;  %s3177_s1 = inlined_call_operand.vmem [shape: bf16[32,128], index: 1, kind: input, shape index: {}]   ;;  %s3178_s2 = inlined_call_operand.vmem [shape: f32[1,128], index: 2, kind: input, shape index: {}]   ;;  %s3179_s3 = inlined_call_operand.vmem [shape: f32[10,128], index: 3, kind: input, shape index: {}]   ;;  %s3180_s4 = inlined_call_operand.vmem [shape: f32[10,10], index: 4, kind: input, shape index: {}]   ;;  %s3181_s5 = inlined_call_operand.vmem [shape: f32[3,2,128], index: 5, kind: input, shape index: {}]   ;;  %s3182_s6 = inlined_call_operand.vmem [shape: bf16[3,128,768], index: 6, kind: input, shape index: {}]   ;;  %s3183_s7 = inlined_call_operand.vmem [shape: f32[3,1,768], index: 7, kind: input, shape index: {}]   ;;  %s3184_s8 = inlined_call_operand.vmem [shape: bf16[3,256,128], index: 8, kind: input, shape index: {}]   ;;  %s3185_s9 = inlined_call_operand.vmem [shape: f32[3,1,128], index: 9, kind: input, shape index: {}]   ;;  %s3186_s10 = inlined_call_operand.vmem [shape: f32[3,2,128], index: 10, kind: input, shape index: {}]   ;;  %s3187_s11 = inlined_call_operand.vmem [shape: bf16[3,128,256], index: 11, kind: input, shape index: {}]   ;;  %s3188_s12 = inlined_call_operand.vmem [shape: f32[3,1,256], index: 12, kind: input, shape index: {}]   ;;  %s3189_s13 = inlined_call_operand.vmem [shape: bf16[3,256,128], index: 13, kind: input, shape index: {}]   ;;  %s3190_s14 = inlined_call_operand.vmem [shape: f32[3,1,128], index: 14, kind: input, shape index: {}]   ;;  %s3191_s15 = inlined_call_operand.vmem [shape: f32[2,10,128], index: 15, kind: output, shape index: {}]  }
   0x1   :  { %3200 = sst [smem:[#allocation10_spill]] %s3176_s0  ;;  %s2773_s20 = smov 0  }
   0x2   :  { %3201 = sst [smem:[#allocation11_spill]] %s3177_s1  ;;  %s2775_s21 = smov 0  }
   0x3   :  { %3202 = sst [smem:[#allocation12_spill]] %s3178_s2  ;;  %s2777_s22 = smov 0  }
   0x4   :  { %3203 = sst [smem:[#allocation13_spill]] %s3179_s3  ;;  %s2779_s23 = smov 0  }
   0x5   :  { %3204 = sst [smem:[#allocation14_spill]] %s3180_s4  ;;  %s2781_s24 = smov 0  }
   0x6   :  { %3205 = sst [smem:[#allocation15_spill]] %s3181_s5 }
   0x7   :  { %3206 = sst [smem:[#allocation16_spill]] %s3182_s6 }
   0x8   :  { %3207 = sst [smem:[#allocation17_spill]] %s3184_s8 }
   0x9 LB: > { %3208 = sst [smem:[#allocation2_spill]] %s2674_s21  ;;  %s37_s25 = sadd.s32 1, %s2674_s21  ;;  %s2686_s24 = sphi %s2781_s24, %s25_s24   ;;  %s2682_s23 = sphi %s2779_s23, %s3236_s23   ;;  %s2678_s22 = sphi %s2777_s22, %s3235_s22   ;;  %s2674_s21 = sphi %s2775_s21, %s3234_s21   ;;  %s2670_s20 = sphi %s2773_s20, %s3233_s20   ;;  %s2666_s19 = sphi %s2771_s19, %s3232_s19   ;;  %s2662_s18 = sphi %s2769_s18, %s3231_s18  }
   0xa   : > { %3209 = sst [smem:[#allocation3_spill]] %s2678_s22  ;;  %p38_p0 = scmp.ge.s32.totalorder %s37_s25, 3 }
   0xb   : > { %3210 = sst [smem:[#allocation4_spill]] %s2682_s23  ;;  %s40_s26 = sadd.s32 1, %s2678_s22 }
   0xc   : > { %3211 = sst [smem:[#allocation5_spill]] %s2686_s24  ;;  %p2029_p1 = scmp.ge.s32.totalorder %s2686_s24, 1 }
   0xd   : > { %p548_p2 = scmp.lt.s32.totalorder %s2686_s24, 19  ;;  %s3238_s25 = smov (%p38_p0, %s37_s25), 0 }
   0xe   : > { %3212 = sst [smem:[#allocation6_spill]] %s3238_s25  ;;  %s3240_s26 = smov (!%p38_p0, %s40_s26), %s2678_s22 }
   0xf   : > { %p549_p3 = pnand %p2029_p1, %p548_p2  ;;  %p42_p4 = scmp.ge.s32.totalorder %s3240_s26, 3 }
  0x10   : > { %s44_s27 = sadd.s32 1, %s2682_s23 }
  0x11   : > { %s3242_s26 = smov (%p42_p4, %s3240_s26), 0  ;;  %s3244_s27 = smov (!%p42_p4, %s44_s27), %s2682_s23 }
  0x12   : > { %3213 = sst [smem:[#allocation7_spill]] %s3242_s26  ;;  %p46_p5 = scmp.ge.s32.totalorder %s3244_s27, 2 }
  0x13   : > { %552 = sbr.rel (%p549_p3) target bundleno = 1888 (0x760), region = 80 }
  0x14   : > { %s3246_s27 = smov (%p46_p5, %s3244_s27), 0 }
  0x15   : > { %3214 = sst [smem:[#allocation8_spill]] %s3246_s27 }
  0x18   : > { %p638_p6 = scmp.lt.s32.totalorder %s2670_s20, 1  ;;  %p643_p7 = scmp.lt.s32.totalorder %s2666_s19, 2 }
  0x19   : > { %p691_p8 = scmp.eq.s32.totalorder %s2666_s19, 0  ;;  %p692_p9 = scmp.eq.s32.totalorder %s2662_s18, 0 }
  0x1a   : > { %s3248_s20 = smov (!%p638_p6, %s2670_s20), 1  ;;  %s3250_s19 = smov (!%p643_p7, %s2666_s19), 2 }
  0x1b   : > { %s2441_s28 = sshll.u32 %s3248_s20, 4  ;;  %p2813_p10 = pnand %p692_p9, %p691_p8 }
  0x1c   : > { %s3217_s0 = sld [smem:[#allocation10_spill]]  ;;  %s2821_s27 = sshll.u32 %s3250_s19, 1 }
  0x1d   : > { %s3215_s29 = scalar_select %p2813_p10, 1, 0 }
  0x1e   : > { %s2544_s23 = smul.u32 384, %s3250_s19  ;;  %s2442_s22 = sshll.u32 %s3250_s19, 7 }
  0x1f   : > { %3216 = sst [smem:[#allocation9_spill]] %s3215_s29  ;;  %s2545_s20 = smul.u32 6, %s3250_s19 }
  0x20   : > { %s3219_s6 = sld [smem:[#allocation16_spill]]  ;;  %s684_s5 = scalar_lea.vmem %s3190_s14, %s3250_s19 }
  0x21   : > { %s3220_s8 = sld [smem:[#allocation17_spill]]  ;;  %s2843_s26 = scalar_lea.vmem %s3183_s7, %s2545_s20 }
  0x22   : > { %s642_s17 = scalar_lea.vmem %s3217_s0, %s2441_s28  ;;  %s2865_s20 = scalar_lea.vmem %s3189_s13, %s2442_s22 }
  0x23   : > { %s2874_s21 = scalar_lea.vmem %s3191_s15, %s2441_s28  ;;  %696 = sbr.rel (%p2813_p10) target bundleno = 189 (0xbd), region = 84 }
  0x24   : > { %s3222_s30 = sld [smem:[#allocation11_spill]] (!%p2813_p10) }
  0x25   : > { %s3223_s25 = sld [smem:[#allocation12_spill]] (!%p2813_p10) }
  0x26   : > { %s2833_s4 = scalar_lea.vmem %s3219_s6, %s2544_s23  ;;  %s2856_s6 = scalar_lea.vmem %s3187_s11, %s2442_s22 }
  0x27   : > { %s2838_s16 = scalar_lea.vmem %s3220_s8, %s2442_s22  ;;  %s676_s8 = scalar_lea.vmem %s3188_s12, %s2821_s27 }
  0x28   : > { %v697_v2 = vld [vmem:[%s642_s17] sm:$0xff]  ;;  %v698_v3 = vld [vmem:[%s642_s17 + $0x8] sm:$0x3]  ;;  %vm720_vm0 = vcmask 261120   ;;  %s3224_s29 = sld [smem:[#allocation13_spill]] }
  0x29   : > { %v703_v4 = vpack.c.bf16 %v698_v3, %v697_v2 }
  0x2a   : > { %v2447_v0 = vld [vmem:[%s3222_s30 + $0x8] sm:$0xff]  ;;  %v2446_v1 = vld [vmem:[%s3222_s30] sm:$0xff] }
  0x2b   : > { %730 = vmatpush.bf16.msra.mxu0 %v2447_v0  ;;  %v2603_v5 = vld [vmem:[%s3223_s25] ss:$0 sm:$0xff] }
  0x2e   : > { %v738_v7 = vld [vmem:[%s3224_s29] sm:$0xff]  ;;  %v739_v11 = vld [vmem:[%s3224_s29 + $0x8] sm:$0x3] }
  0x2f   : > { %731 = vmatpush.bf16.msra.mxu0 %v2446_v1 }
  0x32   : > { %2052 = vmatmul.msk.bf16.vlgmr.msra.gmra.mxu0 %vm720_vm0, %v703_v4 }
  0xaf   : > { %v733_v6 = vpop.f32.mrf.mxu0 }
  0xb0   : > { %v734_v8 = vadd.f32 %v2603_v5, %v733_v6 }
  0xb2   : > { %v740_v9 = vadd.f32 %v738_v7, %v734_v8 }
  0xb4   : > { %742 = vst [vmem:[%s2874_s21] sm:$0xff] %v740_v9 }
  0xb7   : > { %v735_v10 = vpop.f32.mrf.mxu0 }
  0xb8   : > { %v736_v12 = vadd.f32 %v2603_v5, %v735_v10 }
  0xba   : > { %v741_v13 = vadd.f32 %v739_v11, %v736_v12 }
  0xbc   : > { %743 = vst [vmem:[%s2874_s21 + $0x8] sm:$0x3] %v741_v13 }
  0xbd PF: > { %vm749_vm1 = vcmask 1041408   ;;  %v2901_v16 = vld [vmem:[%s2874_s21] sm:$0xff]  ;;  %v2688_v17 = vmov 128.0   ;;  %v2223_v20 = vld [vmem:[%s2833_s4 + $0x150] sm:$0xf]  ;;  %s3225_s22 = sld [smem:[#allocation15_spill]]  ;;  %s3228_s23 = scalar_lea.vmem %s3185_s9, %s3250_s19 }
  0xbe   : > { %2606 = vrcp.f32 %v2688_v17  ;;  %v2493_v21 = vld [vmem:[%s2833_s4 + $0x164] sm:$0xf0]  ;;  %v2490_v22 = vld [vmem:[%s2833_s4 + $0x154] sm:$0xf]  ;;  %v2225_v24 = vld [vmem:[%s2833_s4 + $0x168] sm:$0xf0]  ;;  %s3229_s24 = scalar_lea.vmem %s3186_s10, %s2821_s27 }
  0xbf   : > { %v2224_v23 = vor.u32 %v2493_v21, %v2223_v20  ;;  %v2199_v25 = vld [vmem:[%s2833_s4 + $0x120] sm:$0xf]  ;;  %v2487_v26 = vld [vmem:[%s2833_s4 + $0x134] sm:$0xf0]  ;;  %v2228_v27 = vor.u32 %v2490_v22, %v2225_v24  ;;  %v2484_v28 = vld [vmem:[%s2833_s4 + $0x124] sm:$0xf] }
  0xc0   : > { %v2201_v29 = vld [vmem:[%s2833_s4 + $0x138] sm:$0xf0]  ;;  %v2200_v30 = vor.u32 %v2487_v26, %v2199_v25  ;;  %v2175_v45 = vld [vmem:[%s2833_s4 + $0xf0] sm:$0xf]  ;;  %v2481_v46 = vld [vmem:[%s2833_s4 + $0x104] sm:$0xf0] }
  0xc1   : > { %1106 = vmatpush.bf16.msra.mxu0 %v2224_v23  ;;  %1120 = vmatpush.bf16.msra.mxu1 %v2228_v27  ;;  %v2204_v32 = vor.u32 %v2484_v28, %v2201_v29  ;;  %v2478_v47 = vld [vmem:[%s2833_s4 + $0xf4] sm:$0xf]  ;;  %v2176_v48 = vor.u32 %v2481_v46, %v2175_v45  ;;  %v2177_v49 = vld [vmem:[%s2833_s4 + $0x108] sm:$0xf0]  ;;  %v2151_v51 = vld [vmem:[%s2833_s4 + $0xc0] sm:$0xf] }
  0xc2   : > { %v2180_v50 = vor.u32 %v2478_v47, %v2177_v49  ;;  %v2475_v52 = vld [vmem:[%s2833_s4 + $0xd4] sm:$0xf0]  ;;  %v2472_v53 = vld [vmem:[%s2833_s4 + $0xc4] sm:$0xf]  ;;  %v2153_v55 = vld [vmem:[%s2833_s4 + $0xd8] sm:$0xf0] }
  0xc3   : > { %v2896_v14 = vld [vmem:[%s2874_s21 + $0x8] sm:$0x3]  ;;  %v2152_v54 = vor.u32 %v2475_v52, %v2151_v51  ;;  %v2231_v56 = vld [vmem:[%s2833_s4 + $0x158] sm:$0xf]  ;;  %v2494_v57 = vld [vmem:[%s2833_s4 + $0x16c] sm:$0xf0]  ;;  %v2156_v58 = vor.u32 %v2472_v53, %v2153_v55 }
  0xc4   : > { %v750_v15 = vsel %vm749_vm1, %v2896_v14, 0.0  ;;  %v2607_v18 = vpop.eup %2606  ;;  %v2232_v59 = vor.u32 %v2494_v57, %v2231_v56  ;;  %v2491_v60 = vld [vmem:[%s2833_s4 + $0x15c] sm:$0xf]  ;;  %v2233_v61 = vld [vmem:[%s2833_s4 + $0x170] sm:$0xf0]  ;;  %vm1241_vm9 = vcmask 1044480  }
  0xc5   : > { %751 = vadd.xlane.f32.xlu0 %v750_v15  ;;  %v754_v19 = vmul.f32 128.0, %v2607_v18  ;;  %1107 = vmatpush.bf16.msra.mxu0 %v2200_v30  ;;  %vm758_vm2 = vweird.f32 %v2607_v18  ;;  %v2236_v62 = vor.u32 %v2491_v60, %v2233_v61  ;;  %v2127_v63 = vld [vmem:[%s2833_s4 + $0x90] sm:$0xf]  ;;  %v2469_v0 = vld [vmem:[%s2833_s4 + $0xa4] sm:$0xf0]  ;;  %s3227_s28 = sld [smem:[#allocation14_spill]] }
  0xc6   : > { %1121 = vmatpush.bf16.msra.mxu1 %v2204_v32  ;;  %1134 = vmatpush.bf16.msra.mxu2 %v2232_v59  ;;  %v2466_v1 = vld [vmem:[%s2833_s4 + $0x94] sm:$0xf]  ;;  %v2128_v2 = vor.u32 %v2469_v0, %v2127_v63  ;;  %v2129_v3 = vld [vmem:[%s2833_s4 + $0xa8] sm:$0xf0]  ;;  %v2207_v4 = vld [vmem:[%s2833_s4 + $0x128] sm:$0xf] }
  0xc7   : > { %v755_v31 = vsub.f32 1.0, %v754_v19  ;;  %1148 = vmatpush.bf16.msra.mxu3 %v2236_v62  ;;  %v2488_v5 = vld [vmem:[%s2833_s4 + $0x13c] sm:$0xf0]  ;;  %v2132_v6 = vor.u32 %v2466_v1, %v2129_v3  ;;  %v2485_v8 = vld [vmem:[%s2833_s4 + $0x12c] sm:$0xf]  ;;  %vm1212_vm10 = vcmask 80896  }
  0xc8   : > { %v2208_v7 = vor.u32 %v2488_v5, %v2207_v4  ;;  %v2209_v9 = vld [vmem:[%s2833_s4 + $0x140] sm:$0xf0]  ;;  %v2103_v11 = vld [vmem:[%s2833_s4 + $0x60] sm:$0xf]  ;;  %v2463_v12 = vld [vmem:[%s2833_s4 + $0x74] sm:$0xf0] }
  0xc9   : > { %v756_v33 = vmul.f32 %v2607_v18, %v755_v31  ;;  %1108 = vmatpush.bf16.msra.mxu0 %v2176_v48  ;;  %v2212_v10 = vor.u32 %v2485_v8, %v2209_v9  ;;  %v2460_v13 = vld [vmem:[%s2833_s4 + $0x64] sm:$0xf]  ;;  %v2104_v15 = vor.u32 %v2463_v12, %v2103_v11  ;;  %v2105_v17 = vld [vmem:[%s2833_s4 + $0x78] sm:$0xf0]  ;;  %v2482_v19 = vld [vmem:[%s2833_s4 + $0x10c] sm:$0xf0] }
  0xca   : > { %1122 = vmatpush.bf16.msra.mxu1 %v2180_v50  ;;  %1135 = vmatpush.bf16.msra.mxu2 %v2208_v7  ;;  %v2108_v20 = vor.u32 %v2460_v13, %v2105_v17  ;;  %v2479_v22 = vld [vmem:[%s2833_s4 + $0xfc] sm:$0xf]  ;;  %v2185_v23 = vld [vmem:[%s2833_s4 + $0x110] sm:$0xf0]  ;;  %v2079_v25 = vld [vmem:[%s2833_s4 + $0x30] sm:$0xf] }
  0xcb   : > { %v757_v35 = vadd.f32 %v2607_v18, %v756_v33  ;;  %1149 = vmatpush.bf16.msra.mxu3 %v2212_v10  ;;  %v2188_v24 = vor.u32 %v2479_v22, %v2185_v23  ;;  %v2457_v26 = vld [vmem:[%s2833_s4 + $0x44] sm:$0xf0]  ;;  %v2454_v27 = vld [vmem:[%s2833_s4 + $0x34] sm:$0xf]  ;;  %v2081_v29 = vld [vmem:[%s2833_s4 + $0x48] sm:$0xf0] }
  0xcc   : > { %v2080_v28 = vor.u32 %v2457_v26, %v2079_v25  ;;  %v2159_v30 = vld [vmem:[%s2833_s4 + $0xc8] sm:$0xf]  ;;  %v2476_v31 = vld [vmem:[%s2833_s4 + $0xdc] sm:$0xf0]  ;;  %v2084_v32 = vor.u32 %v2454_v27, %v2081_v29  ;;  %v2135_v45 = vld [vmem:[%s2833_s4 + $0x98] sm:$0xf] }
  0xcd   : > { %747 = vadd.xlane.f32.xlu0 %v2901_v16  ;;  %v2912_v36 = vsel %vm758_vm2, %v2607_v18, %v757_v35  ;;  %1109 = vmatpush.bf16.msra.mxu0 %v2152_v54  ;;  %v2183_v18 = vld [vmem:[%s2833_s4 + $0xf8] sm:$0xf]  ;;  %v2160_v33 = vor.u32 %v2476_v31, %v2159_v30  ;;  %v2161_v35 = vld [vmem:[%s2833_s4 + $0xe0] sm:$0xf0]  ;;  %v2470_v46 = vld [vmem:[%s2833_s4 + $0xac] sm:$0xf0] }
  0xce   : > { %1123 = vmatpush.bf16.msra.mxu1 %v2156_v58  ;;  %v2184_v21 = vor.u32 %v2482_v19, %v2183_v18  ;;  %v2136_v48 = vor.u32 %v2470_v46, %v2135_v45  ;;  %v2467_v49 = vld [vmem:[%s2833_s4 + $0x9c] sm:$0xf]  ;;  %v2137_v50 = vld [vmem:[%s2833_s4 + $0xb0] sm:$0xf0]  ;;  %v2239_v51 = vld [vmem:[%s2833_s4 + $0x160] sm:$0xf] }
  0xcf   : > { %1150 = vmatpush.bf16.msra.mxu3 %v2188_v24  ;;  %v2140_v52 = vor.u32 %v2467_v49, %v2137_v50  ;;  %v2495_v53 = vld [vmem:[%s2833_s4 + $0x174] sm:$0xf0]  ;;  %v2492_v54 = vld [vmem:[%s2833_s4 + $0x164] sm:$0xf]  ;;  %v2241_v55 = vld [vmem:[%s2833_s4 + $0x178] sm:$0xf0] }
  0xd0   : > { %1136 = vmatpush.bf16.msra.mxu2 %v2184_v21  ;;  %v2240_v56 = vor.u32 %v2495_v53, %v2239_v51  ;;  %v2244_v57 = vor.u32 %v2492_v54, %v2241_v55  ;;  %v2111_v58 = vld [vmem:[%s2833_s4 + $0x68] sm:$0xf]  ;;  %v2464_v59 = vld [vmem:[%s2833_s4 + $0x7c] sm:$0xf0]  ;;  %v2461_v60 = vld [vmem:[%s2833_s4 + $0x6c] sm:$0xf] }
  0xd1   : > { %1110 = vmatpush.bf16.msra.mxu0 %v2128_v2  ;;  %v2112_v61 = vor.u32 %v2464_v59, %v2111_v58  ;;  %v2113_v62 = vld [vmem:[%s2833_s4 + $0x80] sm:$0xf0]  ;;  %v2215_v63 = vld [vmem:[%s2833_s4 + $0x130] sm:$0xf]  ;;  %v2489_v0 = vld [vmem:[%s2833_s4 + $0x144] sm:$0xf0] }
  0xd2   : > { %1124 = vmatpush.bf16.msra.mxu1 %v2132_v6  ;;  %v2116_v1 = vor.u32 %v2461_v60, %v2113_v62  ;;  %v2216_v2 = vor.u32 %v2489_v0, %v2215_v63  ;;  %v2486_v3 = vld [vmem:[%s2833_s4 + $0x134] sm:$0xf]  ;;  %v2217_v4 = vld [vmem:[%s2833_s4 + $0x148] sm:$0xf0]  ;;  %v2087_v6 = vld [vmem:[%s2833_s4 + $0x38] sm:$0xf] }
  0xd3   : > { %v2220_v5 = vor.u32 %v2486_v3, %v2217_v4  ;;  %v2458_v7 = vld [vmem:[%s2833_s4 + $0x4c] sm:$0xf0]  ;;  %v2455_v8 = vld [vmem:[%s2833_s4 + $0x3c] sm:$0xf]  ;;  %v2089_v10 = vld [vmem:[%s2833_s4 + $0x50] sm:$0xf0] }
  0xd4   : > { %1137 = vmatpush.bf16.msra.mxu2 %v2160_v33  ;;  %v2088_v9 = vor.u32 %v2458_v7, %v2087_v6  ;;  %v2191_v11 = vld [vmem:[%s2833_s4 + $0x100] sm:$0xf]  ;;  %v2483_v12 = vld [vmem:[%s2833_s4 + $0x114] sm:$0xf0]  ;;  %v2092_v13 = vor.u32 %v2455_v8, %v2089_v10  ;;  %v2480_v17 = vld [vmem:[%s2833_s4 + $0x104] sm:$0xf] }
  0xd5   : > { %1111 = vmatpush.bf16.msra.mxu0 %v2104_v15  ;;  %v2192_v15 = vor.u32 %v2483_v12, %v2191_v11  ;;  %v2193_v18 = vld [vmem:[%s2833_s4 + $0x118] sm:$0xf0]  ;;  %v2063_v22 = vld [vmem:[%s2833_s4 + $0x8] sm:$0xf]  ;;  %v2452_v23 = vld [vmem:[%s2833_s4 + $0x1c] sm:$0xf0] }
  0xd6   : > { %1125 = vmatpush.bf16.msra.mxu1 %v2108_v20  ;;  %v2196_v20 = vor.u32 %v2480_v17, %v2193_v18  ;;  %v2449_v24 = vld [vmem:[%s2833_s4 + $0xc] sm:$0xf]  ;;  %v2064_v25 = vor.u32 %v2452_v23, %v2063_v22  ;;  %v2065_v26 = vld [vmem:[%s2833_s4 + $0x20] sm:$0xf0]  ;;  %v2167_v27 = vld [vmem:[%s2833_s4 + $0xd0] sm:$0xf] }
  0xd7   : > { %v2068_v30 = vor.u32 %v2449_v24, %v2065_v26  ;;  %v2169_v33 = vld [vmem:[%s2833_s4 + $0xe8] sm:$0xf0]  ;;  %v2119_v45 = vld [vmem:[%s2833_s4 + $0x70] sm:$0xf]  ;;  %v2465_v46 = vld [vmem:[%s2833_s4 + $0x84] sm:$0xf0] }
  0xd8   : > { %1138 = vmatpush.bf16.msra.mxu2 %v2136_v48  ;;  %v2121_v49 = vld [vmem:[%s2833_s4 + $0x88] sm:$0xf0]  ;;  %v2120_v50 = vor.u32 %v2465_v46, %v2119_v45  ;;  %v2459_v53 = vld [vmem:[%s2833_s4 + $0x54] sm:$0xf0]  ;;  %v2071_v62 = vld [vmem:[%s2833_s4 + $0x10] sm:$0xf] }
  0xd9   : > { %1112 = vmatpush.bf16.msra.mxu0 %v2080_v28  ;;  %v2477_v28 = vld [vmem:[%s2833_s4 + $0xe4] sm:$0xf0]  ;;  %v2450_v0 = vld [vmem:[%s2833_s4 + $0x14] sm:$0xf]  ;;  %vm1216_vm11 = vcmask 74752  }
  0xda   : > { %1126 = vmatpush.bf16.msra.mxu1 %v2084_v32  ;;  %v2168_v31 = vor.u32 %v2477_v28, %v2167_v27  ;;  %v2474_v32 = vld [vmem:[%s2833_s4 + $0xd4] sm:$0xf]  ;;  %v2453_v63 = vld [vmem:[%s2833_s4 + $0x24] sm:$0xf0] }
  0xdb   : > { %v2072_v4 = vor.u32 %v2453_v63, %v2071_v62 }
  0xdc   : > { %1139 = vmatpush.bf16.msra.mxu2 %v2112_v61 }
  0xe0   : > { %1140 = vmatpush.bf16.msra.mxu2 %v2088_v9 }
  0xe4   : > { %1141 = vmatpush.bf16.msra.mxu2 %v2064_v25 }
 0x138   : > { %v752_v34 = vpop.xlane.xlu0 %751 }
 0x139   : > { %v761_v39 = vmul.f32 %v2912_v36, %v752_v34  ;;  %v2473_v34 = vld [vmem:[%s2833_s4 + $0xcc] sm:$0xf] }
 0x13b   : > { %v2922_v42 = vsub.f32 %v2896_v14, %v761_v39  ;;  %v2451_v39 = vld [vmem:[%s2833_s4 + $0x14] sm:$0xf0] }
 0x13d   : > { %v765_v43 = vmul.f32 %v2922_v42, %v2922_v42 }
 0x13f   : > { %v768_v44 = vsel %vm749_vm1, %v765_v43, 0.0 }
 0x140   : > { %v748_v37 = vpop.xlane.xlu0 %747 }
 0x141   : > { %v760_v38 = vmul.f32 %v2912_v36, %v748_v37  ;;  %v2164_v37 = vor.u32 %v2473_v34, %v2161_v35  ;;  %v2172_v34 = vor.u32 %v2474_v32, %v2169_v33  ;;  %v2143_v35 = vld [vmem:[%s2833_s4 + $0xa0] sm:$0xf] }
 0x142   : > { %v852_v32 = vld [vmem:[%s2843_s26] sm:$0x3f] }
 0x143   : > { %v2917_v40 = vsub.f32 %v2901_v16, %v760_v38  ;;  %v2055_v38 = vld [vmem:[%s2833_s4] sm:$0xf]  ;;  %1151 = vmatpush.bf16.msra.mxu3 %v2164_v37  ;;  %v2471_v37 = vld [vmem:[%s2833_s4 + $0xb4] sm:$0xf0]  ;;  %v856_v33 = vperm.slane %v852_v32, 2  ;;  %v854_v45 = vperm.slane %v852_v32, 0 }
 0x144   : > { %v2056_v43 = vor.u32 %v2451_v39, %v2055_v38  ;;  %v2468_v38 = vld [vmem:[%s2833_s4 + $0xa4] sm:$0xf]  ;;  %v2144_v39 = vor.u32 %v2471_v37, %v2143_v35  ;;  %v855_v63 = vperm.slane %v852_v32, 1 }
 0x145   : > { %v764_v41 = vmul.f32 %v2917_v40, %v2917_v40 }
 0x146   : > { %1113 = vmatpush.bf16.msra.mxu0 %v2056_v43 }
 0x147   : > { %766 = vadd.xlane.f32.xlu1 %v764_v41  ;;  %v2448_v41 = vld [vmem:[%s2833_s4 + $0x4] sm:$0xf]  ;;  %1152 = vmatpush.bf16.msra.mxu3 %v2140_v52  ;;  %v2095_v52 = vld [vmem:[%s2833_s4 + $0x40] sm:$0xf] }
 0x148   : > { %v2096_v60 = vor.u32 %v2459_v53, %v2095_v52 }
 0x14a   : > { %1162 = vmatpush.bf16.msrb.mxu0 %v2240_v56  ;;  %v2456_v56 = vld [vmem:[%s2833_s4 + $0x44] sm:$0xf] }
 0x14b   : > { %1153 = vmatpush.bf16.msra.mxu3 %v2116_v1  ;;  %v2073_v1 = vld [vmem:[%s2833_s4 + $0x28] sm:$0xf0] }
 0x14e   : > { %1163 = vmatpush.bf16.msrb.mxu0 %v2216_v2 }
 0x14f   : > { %769 = vadd.xlane.f32.xlu1 %v768_v44  ;;  %v2057_v44 = vld [vmem:[%s2833_s4 + $0x18] sm:$0xf0]  ;;  %1154 = vmatpush.bf16.msra.mxu3 %v2092_v13 }
 0x150   : > { %v2060_v47 = vor.u32 %v2448_v41, %v2057_v44  ;;  %v2145_v41 = vld [vmem:[%s2833_s4 + $0xb8] sm:$0xf0] }
 0x151   : > { %v2148_v44 = vor.u32 %v2468_v38, %v2145_v41 }
 0x152   : > { %1127 = vmatpush.bf16.msra.mxu1 %v2060_v47  ;;  %1164 = vmatpush.bf16.msrb.mxu0 %v2192_v15  ;;  %v2462_v47 = vld [vmem:[%s2833_s4 + $0x74] sm:$0xf] }
 0x153   : > { %1155 = vmatpush.bf16.msra.mxu3 %v2068_v30  ;;  %v2124_v51 = vor.u32 %v2462_v47, %v2121_v49  ;;  %v858_v49 = vperm.slane %v852_v32, 4 }
 0x156   : > { %1176 = vmatpush.bf16.msrb.mxu1 %v2244_v57  ;;  %1165 = vmatpush.bf16.msrb.mxu0 %v2168_v31  ;;  %v2097_v57 = vld [vmem:[%s2833_s4 + $0x58] sm:$0xf0]  ;;  %s3226_s4 = scalar_lea.vmem %s3225_s22, %s2821_s27 }
 0x157   : > { %v2100_v61 = vor.u32 %v2456_v56, %v2097_v57  ;;  %v746_v10 = vld [vmem:[%s3226_s4] sm:$0x3] }
 0x158   : > { %v797_v15 = vperm.slane %v746_v10, 0 }
 0x15a   : > { %1177 = vmatpush.bf16.msrb.mxu1 %v2220_v5  ;;  %1166 = vmatpush.bf16.msrb.mxu0 %v2144_v39  ;;  %v2076_v5 = vor.u32 %v2450_v0, %v2073_v1 }
 0x15e   : > { %1178 = vmatpush.bf16.msrb.mxu1 %v2196_v20  ;;  %1167 = vmatpush.bf16.msrb.mxu0 %v2120_v50  ;;  %v800_v20 = vperm.slane %v746_v10, 1  ;;  %v859_v50 = vperm.slane %v852_v32, 5 }
 0x162   : > { %1179 = vmatpush.bf16.msrb.mxu1 %v2172_v34  ;;  %1168 = vmatpush.bf16.msrb.mxu0 %v2096_v60 }
 0x166   : > { %1180 = vmatpush.bf16.msrb.mxu1 %v2148_v44  ;;  %1169 = vmatpush.bf16.msrb.mxu0 %v2072_v4  ;;  %v1190_v4 = vld [vmem:[%s3227_s28] sm:$0xff] }
 0x16a   : > { %1181 = vmatpush.bf16.msrb.mxu1 %v2124_v51 }
 0x16e   : > { %1182 = vmatpush.bf16.msrb.mxu1 %v2100_v61 }
 0x172   : > { %1183 = vmatpush.bf16.msrb.mxu1 %v2076_v5 }
 0x1ba   : > { %v767_v19 = vpop.xlane.xlu1 %766 }
 0x1bb   : > { %v771_v21 = vmul.f32 %v767_v19, %v2912_v36 }
 0x1bd   : > { %v773_v29 = vadd.f32 1e-05, %v771_v21 }
 0x1bf   : > { %2608 = vrsqrt.f32 %v773_v29  ;;  %vm781_vm4 = vweird.f32 %v773_v29 }
 0x1c2   : > { %v770_v43 = vpop.xlane.xlu1 %769 }
 0x1c3   : > { %v772_v48 = vmul.f32 %v770_v43, %v2912_v36 }
 0x1c5   : > { %v2609_v54 = vpop.eup %2608  ;;  %v774_v55 = vadd.f32 1e-05, %v772_v48 }
 0x1c6   : > { %v776_v58 = vmul.f32 %v2609_v54, %v773_v29  ;;  %vm782_vm3 = vweird.f32 %v2609_v54 }
 0x1c7   : > { %2610 = vrsqrt.f32 %v774_v55  ;;  %vm783_vm5 = vmor %vm781_vm4, %vm782_vm3  ;;  %vm791_vm7 = vweird.f32 %v774_v55 }
 0x1c8   : > { %v777_v59 = vmul.f32 %v2609_v54, %v776_v58 }
 0x1ca   : > { %v778_v2 = vmul.f32 0.5, %v777_v59 }
 0x1cc   : > { %v779_v3 = vsub.f32 1.5, %v778_v2 }
 0x1cd   : > { %v2611_v6 = vpop.eup %2610 }
 0x1ce   : > { %v780_v7 = vmul.f32 %v2609_v54, %v779_v3  ;;  %v786_v8 = vmul.f32 %v2611_v6, %v774_v55  ;;  %vm792_vm6 = vweird.f32 %v2611_v6 }
 0x1cf   : > { %vm793_vm8 = vmor %vm791_vm7, %vm792_vm6 }
 0x1d0   : > { %v787_v9 = vmul.f32 %v2611_v6, %v786_v8  ;;  %v784_v11 = vsel %vm783_vm5, %v2609_v54, %v780_v7 }
 0x1d1   : > { %v795_v17 = vmul.f32 %v784_v11, %v2917_v40 }
 0x1d2   : > { %v788_v12 = vmul.f32 0.5, %v787_v9  ;;  %v1191_v9 = vld [vmem:[%s3227_s28 + $0x8] sm:$0x3] }
 0x1d3   : > { %v798_v21 = vmul.f32 %v797_v15, %v795_v17 }
 0x1d4   : > { %v789_v13 = vsub.f32 1.5, %v788_v12 }
 0x1d5   : > { %v801_v24 = vadd.f32 %v800_v20, %v798_v21 }
 0x1d6   : > { %v790_v18 = vmul.f32 %v2611_v6, %v789_v13 }
 0x1d8   : > { %v794_v19 = vsel %vm793_vm8, %v2611_v6, %v790_v18 }
 0x1d9   : > { %v796_v22 = vmul.f32 %v794_v19, %v2922_v42  ;;  %v857_v42 = vperm.slane %v852_v32, 3 }
 0x1db   : > { %v799_v23 = vmul.f32 %v797_v15, %v796_v22 }
 0x1dd   : > { %v802_v25 = vadd.f32 %v800_v20, %v799_v23 }
 0x1df   : > { %v851_v26 = vpack.c.bf16 %v802_v25, %v801_v24 }
 0x1e1   : > { %1114 = vmatmul.bf16.vlgmr.msra.gmra.mxu0 %v851_v26  ;;  %1128 = vmatmul.bf16.vlgmr.msra.gmra.mxu1 %v851_v26 }
 0x1e2   : > { %1142 = vmatmul.bf16.vlgmr.msra.gmra.mxu2 %v851_v26  ;;  %1156 = vmatmul.bf16.vlgmr.msra.gmra.mxu3 %v851_v26 }
 0x1f1   : > { %1170 = vmatmul.bf16.vlgmr.msrb.gmra.mxu0 %v851_v26  ;;  %1184 = vmatmul.bf16.vlgmr.msrb.gmra.mxu1 %v851_v26 }
 0x25e   : > { %v1115_v40 = vpop.f32.mrf.mxu0  ;;  %v1129_v27 = vpop.f32.mrf.mxu1 }
 0x25f   : > { %v1116_v51 = vadd.f32 %v1115_v40, %v854_v45  ;;  %v1130_v1 = vadd.f32 %v1129_v27, %v855_v63 }
 0x265   : > { %v1143_v28 = vpop.f32.mrf.mxu2  ;;  %v1157_v29 = vpop.f32.mrf.mxu3 }
 0x266   : > { %v1117_v30 = vpop.f32.mrf.mxu0  ;;  %v1131_v31 = vpop.f32.mrf.mxu1  ;;  %v1144_v37 = vadd.f32 %v1143_v28, %v856_v33  ;;  %v1158_v38 = vadd.f32 %v1157_v29, %v857_v42 }
 0x267   : > { %v1118_v48 = vadd.f32 %v1117_v30, %v854_v45  ;;  %v1132_v0 = vadd.f32 %v1131_v31, %v855_v63  ;;  %v2503_v45 = vld [vmem:[%s2838_s16 + $0x38] sm:$0xff] }
 0x268   : > { %1453 = vmatpush.bf16.msra.mxu0 %v2503_v45  ;;  %v2525_v45 = vld [vmem:[%s2856_s6 + $0x64] sm:$0xf0] }
 0x269   : > { %v1192_v52 = vpack.c.bf16 %v1118_v48, %v1116_v51  ;;  %v1259_v2 = vpack.c.bf16 %v1132_v0, %v1130_v1  ;;  %v2500_v51 = vld [vmem:[%s2838_s16 + $0x20] sm:$0xff]  ;;  %v2498_v0 = vld [vmem:[%s2838_s16 + $0x10] sm:$0xff] }
 0x26a   : > { %v2510_v1 = vld [vmem:[%s2838_s16 + $0x70] sm:$0xff] }
 0x26d   : > { %v1145_v34 = vpop.f32.mrf.mxu2  ;;  %v1159_v35 = vpop.f32.mrf.mxu3 }
 0x26e   : > { %v1146_v39 = vadd.f32 %v1145_v34, %v856_v33  ;;  %v1160_v41 = vadd.f32 %v1159_v35, %v857_v42  ;;  %v1171_v43 = vpop.f32.mrf.mxu0  ;;  %v1185_v44 = vpop.f32.mrf.mxu1 }
 0x26f   : > { %v1172_v55 = vadd.f32 %v1171_v43, %v858_v49  ;;  %v1186_v56 = vadd.f32 %v1185_v44, %v859_v50 }
 0x270   : > { %v1260_v46 = vpack.c.bf16 %v1160_v41, %v1158_v38  ;;  %v1193_v47 = vpack.c.bf16 %v1146_v39, %v1144_v37 }
 0x272   : > { %1201 = vmatpush.bf16.xpose.msrb.mxu2 %v1193_v47  ;;  %v2502_v47 = vld [vmem:[%s2838_s16 + $0x30] sm:$0xff] }
 0x273   : > { %1454 = vmatpush.bf16.msra.mxu0 %v2502_v47 }
 0x276   : > { %v1173_v53 = vpop.f32.mrf.mxu0  ;;  %v1187_v54 = vpop.f32.mrf.mxu1 }
 0x277   : > { %v1174_v57 = vadd.f32 %v1173_v53, %v858_v49  ;;  %v1188_v58 = vadd.f32 %v1187_v54, %v859_v50  ;;  %v2501_v49 = vld [vmem:[%s2838_s16 + $0x28] sm:$0xff] }
 0x278   : > { %1455 = vmatpush.bf16.msra.mxu0 %v2501_v49 }
 0x279   : > { %v1302_v59 = vpack.c.bf16 %v1188_v58, %v1186_v56  ;;  %1202 = vmatmul.bf16.vlgmr.msrb.gmra.mxu2 %v1192_v52  ;;  %v1237_v60 = vpack.c.bf16 %v1174_v57, %v1172_v55  ;;  %v2499_v56 = vld [vmem:[%s2838_s16 + $0x18] sm:$0xff] }
 0x27a   : > { %1268 = vmatpush.bf16.xpose.msra.mxu2 %v1260_v46  ;;  %v2511_v46 = vld [vmem:[%s2838_s16 + $0x78] sm:$0xff] }
 0x27b   : > { %v1243_v61 = vsel %vm1241_vm9, %v1237_v60, 0  ;;  %v1307_v62 = vsel %vm1241_vm9, %v1302_v59, 0  ;;  %1467 = vmatpush.bf16.msra.mxu1 %v2511_v46  ;;  %v2524_v46 = vld [vmem:[%s2856_s6 + $0x64] sm:$0xf] }
 0x27c   : > { %1252 = vmatpush.bf16.msrb.mxu3 %v1243_v61  ;;  %1456 = vmatpush.bf16.msra.mxu0 %v2500_v51  ;;  %v2523_v51 = vld [vmem:[%s2856_s6 + $0x54] sm:$0xf0] }
 0x27f   : > { %1468 = vmatpush.bf16.msra.mxu1 %v2510_v1 }
 0x280   : > { %1316 = vmatpush.bf16.msra.mxu3 %v1307_v62  ;;  %1457 = vmatpush.bf16.msra.mxu0 %v2499_v56  ;;  %v2345_v56 = vld [vmem:[%s2856_s6 + $0x40] sm:$0xf] }
 0x284   : > { %1458 = vmatpush.bf16.msra.mxu0 %v2498_v0  ;;  %v2518_v0 = vld [vmem:[%s2856_s6 + $0x34] sm:$0xf] }
 0x289   : > { %1269 = vmatmul.bf16.vlgmr.msra.gmra.mxu2 %v1259_v2  ;;  %v2497_v2 = vld [vmem:[%s2838_s16 + $0x8] sm:$0xff] }
 0x28a   : > { %1459 = vmatpush.bf16.msra.mxu0 %v2497_v2  ;;  %v2339_v2 = vld [vmem:[%s2856_s6 + $0x38] sm:$0xf0] }
 0x2fc   : > { %v1203_v3 = vpop.f32.mrf.mxu2 }
 0x2fd   : > { %v1208_v5 = vmul.f32 0.125, %v1203_v3  ;;  %v2509_v3 = vld [vmem:[%s2838_s16 + $0x68] sm:$0xff] }
 0x2fe   : > { %1469 = vmatpush.bf16.msra.mxu1 %v2509_v3  ;;  %v2342_v3 = vor.u32 %v2518_v0, %v2339_v2  ;;  %v2539_v0 = vld [vmem:[%s2865_s20 + $0x58] sm:$0xff]  ;;  %v2538_v2 = vld [vmem:[%s2865_s20 + $0x50] sm:$0xff] }
 0x2ff   : > { %v1210_v6 = vadd.f32 %v1208_v5, %v1190_v4  ;;  %v2508_v5 = vld [vmem:[%s2838_s16 + $0x60] sm:$0xff] }
 0x301   : > { %v1213_v7 = vsel %vm1212_vm10, %v1210_v6, -inf }
 0x302   : > { %1214 = vmax.xlane.f32.xlu2 %v1213_v7  ;;  %1470 = vmatpush.bf16.msra.mxu1 %v2508_v5  ;;  %v2506_v7 = vld [vmem:[%s2838_s16 + $0x50] sm:$0xff]  ;;  %v2517_v5 = vld [vmem:[%s2856_s6 + $0x24] sm:$0xf0] }
 0x304   : > { %v1205_v8 = vpop.f32.mrf.mxu2 }
 0x305   : > { %v1209_v10 = vmul.f32 0.125, %v1205_v8  ;;  %v2505_v8 = vld [vmem:[%s2838_s16 + $0x48] sm:$0xff] }
 0x307   : > { %v1211_v11 = vadd.f32 %v1209_v10, %v1191_v9 }
 0x309   : > { %v1217_v12 = vsel %vm1216_vm11, %v1211_v11, -inf }
 0x30a   : > { %1218 = vmax.xlane.f32.xlu2 %v1217_v12 }
 0x30c   : > { %v1270_v13 = vpop.f32.mrf.mxu2 }
 0x30d   : > { %v1275_v15 = vmul.f32 0.125, %v1270_v13 }
 0x30f   : > { %v1277_v17 = vadd.f32 %v1275_v15, %v1190_v4  ;;  %v2496_v4 = vld [vmem:[%s2838_s16] sm:$0xff] }
 0x310   : > { %1460 = vmatpush.bf16.msra.mxu0 %v2496_v4  ;;  %v2329_v4 = vld [vmem:[%s2856_s6 + $0x20] sm:$0xf] }
 0x311   : > { %v1279_v18 = vsel %vm1212_vm10, %v1277_v17, -inf }
 0x312   : > { %1280 = vmax.xlane.f32.xlu0 %v1279_v18 }
 0x314   : > { %v1272_v19 = vpop.f32.mrf.mxu2 }
 0x315   : > { %v1276_v20 = vmul.f32 0.125, %v1272_v19 }
 0x317   : > { %v1278_v21 = vadd.f32 %v1276_v20, %v1191_v9  ;;  %v2504_v9 = vld [vmem:[%s2838_s16 + $0x40] sm:$0xff] }
 0x319   : > { %v1282_v22 = vsel %vm1216_vm11, %v1278_v21, -inf }
 0x31a   : > { %1283 = vmax.xlane.f32.xlu1 %v1282_v22 }
 0x375   : > { %v1215_v23 = vpop.xlane.xlu2 %1214 }
 0x376   : > { %v1220_v24 = vsub.f32 %v1210_v6, %v1215_v23  ;;  %v2507_v6 = vld [vmem:[%s2838_s16 + $0x58] sm:$0xff] }
 0x377   : > { %1471 = vmatpush.bf16.msra.mxu1 %v2507_v6  ;;  %v2516_v6 = vld [vmem:[%s2856_s6 + $0x24] sm:$0xf] }
 0x378   : > { %v1222_v25 = vmul.f32 1.442695, %v1220_v24 }
 0x37a   : > { %2612 = vpow2.f32 %v1222_v25 }
 0x37b   : > { %1472 = vmatpush.bf16.msra.mxu1 %v2506_v7  ;;  %v2330_v7 = vor.u32 %v2517_v5, %v2329_v4  ;;  %v2528_v4 = vld [vmem:[%s2865_s20] sm:$0xff] }
 0x37c   : > { %v2536_v5 = vld [vmem:[%s2865_s20 + $0x40] sm:$0xff] }
 0x37d   : > { %v1219_v26 = vpop.xlane.xlu2 %1218 }
 0x37e   : > { %v1221_v40 = vsub.f32 %v1211_v11, %v1219_v26 }
 0x37f   : > { %1473 = vmatpush.bf16.msra.mxu1 %v2505_v8  ;;  %v2331_v8 = vld [vmem:[%s2856_s6 + $0x28] sm:$0xf0] }
 0x380   : > { %v2613_v27 = vpop.eup %2612  ;;  %v1224_v28 = vmul.f32 1.442695, %v1221_v40 }
 0x381   : > { %v1226_v29 = vsel %vm1212_vm10, %v2613_v27, 0.0 }
 0x382   : > { %2614 = vpow2.f32 %v1224_v28  ;;  %1227 = vadd.xlane.f32.xlu2 %v1226_v29 }
 0x383   : > { %1474 = vmatpush.bf16.msra.mxu1 %v2504_v9  ;;  %v2334_v9 = vor.u32 %v2516_v6, %v2331_v8  ;;  %v1555_v6 = vld [vmem:[%s676_s8] sm:$0x3] }
 0x385   : > { %v1281_v30 = vpop.xlane.xlu0 %1280 }
 0x386   : > { %v1285_v31 = vsub.f32 %v1277_v17, %v1281_v30 }
 0x388   : > { %v2615_v32 = vpop.eup %2614  ;;  %v1287_v33 = vmul.f32 1.442695, %v1285_v31 }
 0x389   : > { %v1229_v42 = vsel %vm1216_vm11, %v2615_v32, 0.0 }
 0x38a   : > { %2616 = vpow2.f32 %v1287_v33  ;;  %1230 = vadd.xlane.f32.xlu0 %v1229_v42 }
 0x38d   : > { %v1284_v34 = vpop.xlane.xlu1 %1283 }
 0x38e   : > { %v1286_v35 = vsub.f32 %v1278_v21, %v1284_v34  ;;  %v2604_v21 = vld [vmem:[%s3228_s23] ss:$0 sm:$0xff] }
 0x390   : > { %v2617_v37 = vpop.eup %2616  ;;  %v1289_v38 = vmul.f32 1.442695, %v1286_v35  ;;  %v2369_v35 = vld [vmem:[%s2856_s6 + $0x70] sm:$0xf] }
 0x391   : > { %v1291_v39 = vsel %vm1212_vm10, %v2617_v37, 0.0 }
 0x392   : > { %2618 = vpow2.f32 %v1289_v38  ;;  %1292 = vadd.xlane.f32.xlu1 %v1291_v39  ;;  %v2526_v38 = vld [vmem:[%s2856_s6 + $0x74] sm:$0xf] }
 0x398   : > { %v2619_v41 = vpop.eup %2618 }
 0x399   : > { %v1294_v43 = vsel %vm1216_vm11, %v2619_v41, 0.0 }
 0x39a   : > { %1295 = vadd.xlane.f32.xlu2 %v1294_v43 }
 0x3f5   : > { %v1228_v44 = vpop.xlane.xlu2 %1227 }
 0x3f6   : > { %2620 = vrcp.f32 %v1228_v44  ;;  %v2361_v44 = vld [vmem:[%s2856_s6 + $0x60] sm:$0xf] }
 0x3f7   : > { %v2362_v47 = vor.u32 %v2525_v45, %v2361_v44  ;;  %v2540_v44 = vld [vmem:[%s2865_s20 + $0x60] sm:$0xff] }
 0x3fc   : > { %v2621_v50 = vpop.eup %2620 }
 0x3fd   : > { %v1231_v48 = vpop.xlane.xlu0 %1230  ;;  %v1234_v53 = vmul.f32 %v2621_v50, %v2613_v27  ;;  %v2353_v50 = vld [vmem:[%s2856_s6 + $0x50] sm:$0xf] }
 0x3fe   : > { %2622 = vrcp.f32 %v1231_v48  ;;  %v2363_v48 = vld [vmem:[%s2856_s6 + $0x68] sm:$0xf0] }
 0x3ff   : > { %v2366_v49 = vor.u32 %v2524_v46, %v2363_v48 }
 0x404   : > { %v2623_v52 = vpop.eup %2622 }
 0x405   : > { %v1235_v54 = vmul.f32 %v2623_v52, %v2615_v32  ;;  %v1293_v57 = vpop.xlane.xlu1 %1292  ;;  %v2522_v52 = vld [vmem:[%s2856_s6 + $0x54] sm:$0xf] }
 0x406   : > { %2624 = vrcp.f32 %v1293_v57  ;;  %v2521_v57 = vld [vmem:[%s2856_s6 + $0x44] sm:$0xf0] }
 0x407   : > { %v1236_v55 = vpack.c.bf16 %v1235_v54, %v1234_v53  ;;  %v2354_v53 = vor.u32 %v2523_v51, %v2353_v50  ;;  %v2355_v54 = vld [vmem:[%s2856_s6 + $0x58] sm:$0xf0]  ;;  %v1489_v51 = vld [vmem:[%s3229_s24] sm:$0x3] }
 0x409   : > { %2245 = vmatmul.msk.bf16.vlgmr.msrb.gmra.mxu3 %vm1212_vm10, %v1236_v55  ;;  %v2358_v55 = vor.u32 %v2522_v52, %v2355_v54  ;;  %v1532_v54 = vperm.slane %v1489_v51, 0 }
 0x40c   : > { %v2625_v59 = vpop.eup %2624 }
 0x40d   : > { %v1296_v58 = vpop.xlane.xlu2 %1295  ;;  %v1299_v61 = vmul.f32 %v2625_v59, %v2617_v37  ;;  %v2527_v37 = vld [vmem:[%s2856_s6 + $0x74] sm:$0xf0]  ;;  %v2346_v59 = vor.u32 %v2521_v57, %v2345_v56 }
 0x40e   : > { %2626 = vrcp.f32 %v1296_v58  ;;  %v2370_v39 = vor.u32 %v2527_v37, %v2369_v35  ;;  %v2520_v58 = vld [vmem:[%s2856_s6 + $0x44] sm:$0xf] }
 0x410   : > { %1641 = vmatpush.bf16.msrb.mxu2 %v2370_v39  ;;  %v2541_v39 = vld [vmem:[%s2865_s20 + $0x68] sm:$0xff] }
 0x414   : > { %v2627_v60 = vpop.eup %2626  ;;  %1642 = vmatpush.bf16.msrb.mxu2 %v2362_v47 }
 0x415   : > { %v1300_v62 = vmul.f32 %v2627_v60, %v2619_v41  ;;  %v2371_v41 = vld [vmem:[%s2856_s6 + $0x78] sm:$0xf0]  ;;  %v2347_v60 = vld [vmem:[%s2856_s6 + $0x48] sm:$0xf0] }
 0x416   : > { %v2374_v43 = vor.u32 %v2526_v38, %v2371_v41  ;;  %v2533_v38 = vld [vmem:[%s2865_s20 + $0x28] sm:$0xff] }
 0x417   : > { %v1301_v63 = vpack.c.bf16 %v1300_v62, %v1299_v61  ;;  %v2350_v61 = vor.u32 %v2520_v58, %v2347_v60  ;;  %v2337_v62 = vld [vmem:[%s2856_s6 + $0x30] sm:$0xf] }
 0x418   : > { %1655 = vmatpush.bf16.msrb.mxu3 %v2374_v43  ;;  %1643 = vmatpush.bf16.msrb.mxu2 %v2354_v53 }
 0x419   : > { %2246 = vmatmul.msk.bf16.vlgmr.msra.gmra.mxu3 %vm1212_vm10, %v1301_v63  ;;  %v2519_v63 = vld [vmem:[%s2856_s6 + $0x34] sm:$0xf0] }
 0x41a   : > { %v2338_v1 = vor.u32 %v2519_v63, %v2337_v62 }
 0x41c   : > { %1656 = vmatpush.bf16.msrb.mxu3 %v2366_v49  ;;  %1644 = vmatpush.bf16.msrb.mxu2 %v2346_v59  ;;  %v1535_v59 = vperm.slane %v1489_v51, 1 }
 0x420   : > { %1657 = vmatpush.bf16.msrb.mxu3 %v2358_v55  ;;  %1645 = vmatpush.bf16.msrb.mxu2 %v2338_v1  ;;  %v2530_v1 = vld [vmem:[%s2865_s20 + $0x10] sm:$0xff] }
 0x424   : > { %1658 = vmatpush.bf16.msrb.mxu3 %v2350_v61  ;;  %1646 = vmatpush.bf16.msrb.mxu2 %v2330_v7 }
 0x428   : > { %1659 = vmatpush.bf16.msrb.mxu3 %v2342_v3  ;;  %v2537_v3 = vld [vmem:[%s2865_s20 + $0x48] sm:$0xff] }
 0x42c   : > { %1660 = vmatpush.bf16.msrb.mxu3 %v2334_v9  ;;  %v1557_v9 = vperm.slane %v1555_v6, 0 }
 0x48c   : > { %v1254_v10 = vpop.f32.mrf.mxu3 }
 0x494   : > { %v1256_v11 = vpop.f32.mrf.mxu3 }
 0x495   : > { %v1355_v12 = vpack.c.bf16 %v1256_v11, %v1254_v10  ;;  %v2321_v10 = vld [vmem:[%s2856_s6 + $0x10] sm:$0xf]  ;;  %v2515_v11 = vld [vmem:[%s2856_s6 + $0x14] sm:$0xf0] }
 0x497   : > { %1461 = vmatmul.bf16.vlgmr.msra.gmra.mxu0 %v1355_v12  ;;  %v2514_v12 = vld [vmem:[%s2856_s6 + $0x14] sm:$0xf] }
 0x49c   : > { %v1318_v13 = vpop.f32.mrf.mxu3 }
 0x4a4   : > { %v1320_v15 = vpop.f32.mrf.mxu3 }
 0x4a5   : > { %v1356_v17 = vpack.c.bf16 %v1320_v15, %v1318_v13  ;;  %v2322_v15 = vor.u32 %v2515_v11, %v2321_v10  ;;  %v1558_v10 = vperm.slane %v1555_v6, 1 }
 0x4a7   : > { %1475 = vmatmul.bf16.vlgmr.msra.gmra.mxu1 %v1356_v17  ;;  %v2323_v17 = vld [vmem:[%s2856_s6 + $0x18] sm:$0xf0]  ;;  %1647 = vmatpush.bf16.msrb.mxu2 %v2322_v15 }
 0x514   : > { %v1462_v18 = vpop.f32.mrf.mxu0 }
 0x51c   : > { %v1464_v24 = vpop.f32.mrf.mxu0 }
 0x524   : > { %v1476_v19 = vpop.f32.mrf.mxu1 }
 0x525   : > { %v1477_v20 = vadd.f32 %v1476_v19, %v1462_v18  ;;  %v2326_v19 = vor.u32 %v2514_v12, %v2323_v17 }
 0x527   : > { %v1481_v22 = vadd.f32 %v1477_v20, %v2901_v16  ;;  %v2313_v20 = vld [vmem:[%s2856_s6] sm:$0xf]  ;;  %1661 = vmatpush.bf16.msrb.mxu3 %v2326_v19 }
 0x529   : > { %v3063_v23 = vadd.f32 %v2604_v21, %v1481_v22  ;;  %v2512_v22 = vld [vmem:[%s2856_s6 + $0x4] sm:$0xf] }
 0x52b   : > { %1490 = vadd.xlane.f32.xlu1 %v3063_v23 }
 0x52c   : > { %v1478_v25 = vpop.f32.mrf.mxu1 }
 0x52d   : > { %v1479_v26 = vadd.f32 %v1478_v25, %v1464_v24  ;;  %v2315_v25 = vld [vmem:[%s2856_s6 + $0x8] sm:$0xf0] }
 0x52f   : > { %v1482_v40 = vadd.f32 %v1479_v26, %v2896_v14 }
 0x531   : > { %v3067_v27 = vadd.f32 %v2604_v21, %v1482_v40  ;;  %v2513_v21 = vld [vmem:[%s2856_s6 + $0x4] sm:$0xf0]  ;;  %v2318_v40 = vor.u32 %v2512_v22, %v2315_v25 }
 0x532   : > { %v2314_v24 = vor.u32 %v2513_v21, %v2313_v20 }
 0x533   : > { %v1492_v28 = vsel %vm749_vm1, %v3067_v27, 0.0  ;;  %1662 = vmatpush.bf16.msrb.mxu3 %v2318_v40 }
 0x534   : > { %1493 = vadd.xlane.f32.xlu0 %v1492_v28  ;;  %1648 = vmatpush.bf16.msrb.mxu2 %v2314_v24  ;;  %v2535_v28 = vld [vmem:[%s2865_s20 + $0x38] sm:$0xff] }
 0x535   : > { %1807 = vmatpush.bf16.msrb.mxu0 %v2535_v28 }
 0x59e   : > { %v1491_v16 = vpop.xlane.xlu1 %1490 }
 0x59f   : > { %v1495_v29 = vmul.f32 %v1491_v16, %v2912_v36  ;;  %v2543_v16 = vld [vmem:[%s2865_s20 + $0x78] sm:$0xff] }
 0x5a0   : > { %1821 = vmatpush.bf16.msrb.mxu1 %v2543_v16 }
 0x5a1   : > { %v3073_v30 = vsub.f32 %v3063_v23, %v1495_v29 }
 0x5a3   : > { %v1499_v31 = vmul.f32 %v3073_v30, %v3073_v30 }
 0x5a5   : > { %1501 = vadd.xlane.f32.xlu2 %v1499_v31 }
 0x5a7   : > { %v1494_v14 = vpop.xlane.xlu0 %1493 }
 0x5a8   : > { %v1496_v32 = vmul.f32 %v1494_v14, %v2912_v36 }
 0x5aa   : > { %v3079_v33 = vsub.f32 %v3067_v27, %v1496_v32  ;;  %v2534_v32 = vld [vmem:[%s2865_s20 + $0x30] sm:$0xff] }
 0x5ab   : > { %1808 = vmatpush.bf16.msrb.mxu0 %v2534_v32 }
 0x5ac   : > { %v1500_v42 = vmul.f32 %v3079_v33, %v3079_v33 }
 0x5ae   : > { %v1503_v34 = vsel %vm749_vm1, %v1500_v42, 0.0  ;;  %v2542_v42 = vld [vmem:[%s2865_s20 + $0x70] sm:$0xff] }
 0x5af   : > { %1504 = vadd.xlane.f32.xlu0 %v1503_v34  ;;  %1822 = vmatpush.bf16.msrb.mxu1 %v2542_v42 }
 0x5b0   : > { %1809 = vmatpush.bf16.msrb.mxu0 %v2533_v38 }
 0x5b3   : > { %1823 = vmatpush.bf16.msrb.mxu1 %v2541_v39 }
 0x5b7   : > { %1824 = vmatpush.bf16.msrb.mxu1 %v2540_v44 }
 0x5bb   : > { %1825 = vmatpush.bf16.msrb.mxu1 %v2539_v0 }
 0x5bf   : > { %1826 = vmatpush.bf16.msrb.mxu1 %v2538_v2 }
 0x5c3   : > { %1827 = vmatpush.bf16.msrb.mxu1 %v2537_v3 }
 0x5c7   : > { %1828 = vmatpush.bf16.msrb.mxu1 %v2536_v5 }
 0x618   : > { %v1502_v13 = vpop.xlane.xlu2 %1501 }
 0x619   : > { %v1506_v18 = vmul.f32 %v1502_v13, %v2912_v36 }
 0x61b   : > { %v1508_v26 = vadd.f32 1e-05, %v1506_v18 }
 0x61d   : > { %2628 = vrsqrt.f32 %v1508_v26  ;;  %vm1516_vm13 = vweird.f32 %v1508_v26 }
 0x622   : > { %v1505_v29 = vpop.xlane.xlu0 %1504 }
 0x623   : > { %v2629_v31 = vpop.eup %2628  ;;  %v1507_v14 = vmul.f32 %v1505_v29, %v2912_v36  ;;  %v2532_v36 = vld [vmem:[%s2865_s20 + $0x20] sm:$0xff] }
 0x624   : > { %v1511_v34 = vmul.f32 %v2629_v31, %v1508_v26  ;;  %vm1517_vm12 = vweird.f32 %v2629_v31  ;;  %1810 = vmatpush.bf16.msrb.mxu0 %v2532_v36  ;;  %v2605_v26 = vld [vmem:[%s684_s5] ss:$0 sm:$0xff] }
 0x625   : > { %v1509_v35 = vadd.f32 1e-05, %v1507_v14  ;;  %vm1518_vm14 = vmor %vm1516_vm13, %vm1517_vm12 }
 0x626   : > { %v1512_v37 = vmul.f32 %v2629_v31, %v1511_v34 }
 0x627   : > { %2630 = vrsqrt.f32 %v1509_v35  ;;  %vm1526_vm0 = vweird.f32 %v1509_v35 }
 0x628   : > { %v1513_v41 = vmul.f32 0.5, %v1512_v37 }
 0x62a   : > { %v1514_v43 = vsub.f32 1.5, %v1513_v41 }
 0x62c   : > { %v1515_v46 = vmul.f32 %v2629_v31, %v1514_v43 }
 0x62d   : > { %v2631_v45 = vpop.eup %2630 }
 0x62e   : > { %v1521_v47 = vmul.f32 %v2631_v45, %v1509_v35  ;;  %v1519_v49 = vsel %vm1518_vm14, %v2629_v31, %v1515_v46  ;;  %vm1527_vm15 = vweird.f32 %v2631_v45 }
 0x62f   : > { %v1530_v53 = vmul.f32 %v1519_v49, %v3073_v30  ;;  %vm1528_vm1 = vmor %vm1526_vm0, %vm1527_vm15  ;;  %v2531_v30 = vld [vmem:[%s2865_s20 + $0x18] sm:$0xff] }
 0x630   : > { %v1522_v48 = vmul.f32 %v2631_v45, %v1521_v47  ;;  %1811 = vmatpush.bf16.msrb.mxu0 %v2531_v30 }
 0x631   : > { %v1533_v58 = vmul.f32 %v1532_v54, %v1530_v53 }
 0x632   : > { %v1523_v50 = vmul.f32 0.5, %v1522_v48 }
 0x633   : > { %v1536_v61 = vadd.f32 %v1535_v59, %v1533_v58 }
 0x634   : > { %v1524_v52 = vsub.f32 1.5, %v1523_v50  ;;  %1812 = vmatpush.bf16.msrb.mxu0 %v2530_v1 }
 0x636   : > { %v1525_v55 = vmul.f32 %v2631_v45, %v1524_v52 }
 0x638   : > { %v1529_v56 = vsel %vm1528_vm1, %v2631_v45, %v1525_v55 }
 0x639   : > { %v1531_v57 = vmul.f32 %v1529_v56, %v3079_v33  ;;  %v2529_v33 = vld [vmem:[%s2865_s20 + $0x8] sm:$0xff] }
 0x63a   : > { %1813 = vmatpush.bf16.msrb.mxu0 %v2529_v33 }
 0x63b   : > { %v1534_v60 = vmul.f32 %v1532_v54, %v1531_v57 }
 0x63d   : > { %v1537_v62 = vadd.f32 %v1535_v59, %v1534_v60 }
 0x63e   : > { %1814 = vmatpush.bf16.msrb.mxu0 %v2528_v4 }
 0x63f   : > { %v1554_v63 = vpack.c.bf16 %v1537_v62, %v1536_v61 }
 0x641   : > { %1649 = vmatmul.bf16.vlgmr.msrb.gmra.mxu2 %v1554_v63  ;;  %1663 = vmatmul.bf16.vlgmr.msrb.gmra.mxu3 %v1554_v63 }
 0x6c4   : > { %v1650_v7 = vpop.f32.mrf.mxu2  ;;  %v1664_v8 = vpop.f32.mrf.mxu3 }
 0x6c5   : > { %v1651_v11 = vadd.f32 %v1650_v7, %v1557_v9  ;;  %v1665_v12 = vadd.f32 %v1664_v8, %v1558_v10 }
 0x6c7   : > { %v1669_v19 = vmax.f32 %v1651_v11, 0.0  ;;  %v1670_v20 = vmax.f32 %v1665_v12, 0.0 }
 0x6cc   : > { %v1652_v13 = vpop.f32.mrf.mxu2  ;;  %v1666_v15 = vpop.f32.mrf.mxu3 }
 0x6cd   : > { %v1653_v17 = vadd.f32 %v1652_v13, %v1557_v9  ;;  %v1667_v18 = vadd.f32 %v1666_v15, %v1558_v10 }
 0x6cf   : > { %v1671_v21 = vmax.f32 %v1653_v17, 0.0  ;;  %v1672_v22 = vmax.f32 %v1667_v18, 0.0 }
 0x6d1   : > { %v1705_v24 = vpack.c.bf16 %v1671_v21, %v1669_v19  ;;  %v1706_v25 = vpack.c.bf16 %v1672_v22, %v1670_v20 }
 0x6d3   : > { %1815 = vmatmul.bf16.vlgmr.msrb.gmra.mxu0 %v1705_v24  ;;  %1829 = vmatmul.bf16.vlgmr.msrb.gmra.mxu1 %v1706_v25 }
 0x750   : > { %v1816_v40 = vpop.f32.mrf.mxu0  ;;  %v1830_v28 = vpop.f32.mrf.mxu1 }
 0x751   : > { %v1817_v16 = vadd.f32 %v2605_v26, %v1816_v40 }
 0x753   : > { %v1831_v29 = vadd.f32 %v1830_v28, %v1817_v16 }
 0x755   : > { %v1835_v31 = vadd.f32 %v1831_v29, %v3063_v23 }
 0x757   : > { %1837 = vst [vmem:[%s2874_s21] sm:$0xff] %v1835_v31 }
 0x758   : > { %v1818_v14 = vpop.f32.mrf.mxu0  ;;  %v1832_v42 = vpop.f32.mrf.mxu1 }
 0x759   : > { %v1819_v32 = vadd.f32 %v2605_v26, %v1818_v14 }
 0x75b   : > { %v1833_v34 = vadd.f32 %v1832_v42, %v1819_v32 }
 0x75d   : > { %v1836_v35 = vadd.f32 %v1833_v34, %v3067_v27 }
 0x75f   : > { %1838 = vst [vmem:[%s2874_s21 + $0x8] sm:$0x3] %v1836_v35 }
 0x760 PF: > { %s3230_s20 = sld [smem:[#allocation5_spill]] }
 0x761   : > { %s3231_s18 = sld [smem:[#allocation2_spill]] }
 0x762   : > { %s3232_s19 = sld [smem:[#allocation3_spill]] }
 0x763   : > { %s3234_s21 = sld [smem:[#allocation6_spill]] }
 0x764   : > { %s3235_s22 = sld [smem:[#allocation7_spill]] }
 0x765   : > { %s3236_s23 = sld [smem:[#allocation8_spill]] }
 0x766   : > { %s25_s24 = sadd.s32 1, %s3230_s20   ;;  %s3233_s20 = sld [smem:[#allocation4_spill]] }
 0x767   : > { %p22_p11 = scmp.ge.s32.totalorder %s25_s24, 20  }
 0x769   :  { %24 = sbr.rel (!%p22_p11) target bundleno = 9 (0x9), region = 144 }

// kernel: gdn_forward.5
= control target key start
LH: loop header
LB: loop body
LE: loop exit
PB: predicated region body
PF: predicated region fallthrough
CT: control target
= control target key end

     0   :  { %s3667_s0 = inlined_call_operand.vmem [shape: f32[2,16,128], index: 0, kind: input, shape index: {}]   ;;  %s3668_s1 = inlined_call_operand.vmem [shape: f32[2,10,128], index: 1, kind: input, shape index: {}]   ;;  %s3669_s2 = inlined_call_operand.vmem [shape: bf16[128,512], index: 2, kind: input, shape index: {}]   ;;  %s3670_s3 = inlined_call_operand.vmem [shape: f32[1,512], index: 3, kind: input, shape index: {}]   ;;  %s3671_s4 = inlined_call_operand.vmem [shape: bf16[128,1024], index: 4, kind: input, shape index: {}]   ;;  %s3672_s5 = inlined_call_operand.vmem [shape: f32[1,1024], index: 5, kind: input, shape index: {}]   ;;  %s3673_s6 = inlined_call_operand.vmem [shape: bf16[512,128], index: 6, kind: input, shape index: {}]   ;;  %s3674_s7 = inlined_call_operand.vmem [shape: f32[1,128], index: 7, kind: input, shape index: {}]   ;;  %s3675_s8 = inlined_call_operand.vmem [shape: bf16[128,128], index: 8, kind: input, shape index: {}]   ;;  %s3676_s9 = inlined_call_operand.vmem [shape: f32[1,128], index: 9, kind: input, shape index: {}]   ;;  %s3677_s10 = inlined_call_operand.hbm [shape: f32[2,1,128], index: 10, kind: output, shape index: {}]  }
   0x1   :  { %3678 = sst [smem:[#allocation6_spill]] %s3669_s2 }
   0x2   :  { %15 = vsyncpa [#allocation3], 0 }
   0x3   :  { %17 = vsyncpa [#allocation3 + $0x1], 0  ;;  %s2792_s13 = smov 0   ;;  %s2794_s14 = smov 0  }
   0x4   :  { %s2796_s15 = smov 0   ;;  %s2798_s16 = smov 0  }
   0x5 LB: > { %s2813_s17 = sadd.s32 4294967295, %s2734_s16   ;;  %s1901_s18 = sadd.s32 4294967294, %s2734_s16   ;;  %s2734_s16 = sphi %s2798_s16, %s3687_s16   ;;  %s2730_s15 = sphi %s2796_s15, %s3686_s15   ;;  %s2726_s14 = sphi %s2794_s14, %s3685_s14   ;;  %s2722_s13 = sphi %s2792_s13, %s3684_s13  }
   0x6   : > { %s2817_s19 = sadd.s32 1, %s2734_s16   ;;  %s250_s20 = sadd.s32 1, %s2730_s15 }
   0x7   : > { %s247_s21 = ssub.s32 %s2734_s16, %s2817_s19  ;;  %p260_p0 = scmp.ne.s32.totalorder %s2730_s15, %s2726_s14 }
   0x8   : > { %p248_p1 = scmp.eq.s32.totalorder %s247_s21, 0  ;;  %p261_p2 = scmp.eq.s32.totalorder %s2813_s17, 1 }
   0x9   : > { %p266_p3 = scmp.ne.s32.totalorder %s2726_s14, %s2722_s13  ;;  %p267_p4 = scmp.eq.s32.totalorder %s1901_s18, 1 }
   0xa   : > { %s2828_s22 = scalar_select %p248_p1, %s2730_s15, %s250_s20  }
   0xb   : > { %p2830_p5 = por %p261_p2, %p260_p0  ;;  %p2834_p6 = por %p267_p4, %p266_p3 }
   0xc   : > { %3679 = sst [smem:[#allocation5_spill]] %s2828_s22  ;;  %p1904_p7 = scmp.ge.s32.totalorder %s2734_s16, 1 }
   0xd   : > { %p325_p8 = scmp.lt.s32.totalorder %s2734_s16, 3 }
   0xf   : > { %p326_p9 = pnand %p1904_p7, %p325_p8 }
  0x10   : > { %s3682_s2 = sld [smem:[#allocation6_spill]] (!%p326_p9)  ;;  %p367_p10 = scmp.lt.s32.totalorder (!%p326_p9), %s2813_s17, 1 }
  0x11   : > { %329 = sbr.rel (%p326_p9) target bundleno = 1085 (0x43d), region = 60  ;;  %s365_s29 = sand.u32 (!%p326_p9), 1, %s2726_s14  }
  0x12   : > { %s366_s12 = scalar_lea.vmem (!%p326_p9), [#allocation2], %s365_s29  ;;  %s1822_s25 = scalar_lea.sflag (!%p326_p9), [#allocation3], %s365_s29 }
  0x13   : > { %s2692_s30 = scalar_lea.hbm (!%p326_p9), %s3677_s10, 2 }
  0x16   : > { %v2023_v0 = vld [vmem:[%s3682_s2 + $0xe0] sm:$0xf]  ;;  %v2491_v1 = vld [vmem:[%s3682_s2 + $0xec] sm:$0xf0]  ;;  %v2489_v2 = vld [vmem:[%s3682_s2 + $0xe4] sm:$0xf] }
  0x17   : > { %v2024_v3 = vor.u32 %v2491_v1, %v2023_v0  ;;  %v2025_v4 = vld [vmem:[%s3682_s2 + $0xf0] sm:$0xf0]  ;;  %v2031_v5 = vld [vmem:[%s3682_s2 + $0xe8] sm:$0xf]  ;;  %v2492_v6 = vld [vmem:[%s3682_s2 + $0xf4] sm:$0xf0] }
  0x18   : > { %v2028_v7 = vor.u32 %v2489_v2, %v2025_v4  ;;  %v2032_v8 = vor.u32 %v2492_v6, %v2031_v5  ;;  %v2490_v9 = vld [vmem:[%s3682_s2 + $0xec] sm:$0xf]  ;;  %v2033_v10 = vld [vmem:[%s3682_s2 + $0xf8] sm:$0xf0]  ;;  %v2007_v11 = vld [vmem:[%s3682_s2 + $0xc0] sm:$0xf] }
  0x19   : > { %585 = vmatpush.bf16.msra.mxu0 %v2024_v3  ;;  %v2036_v12 = vor.u32 %v2490_v9, %v2033_v10  ;;  %v2487_v13 = vld [vmem:[%s3682_s2 + $0xcc] sm:$0xf0]  ;;  %v2485_v14 = vld [vmem:[%s3682_s2 + $0xc4] sm:$0xf]  ;;  %v2009_v15 = vld [vmem:[%s3682_s2 + $0xd0] sm:$0xf0] }
  0x1a   : > { %599 = vmatpush.bf16.msra.mxu1 %v2028_v7  ;;  %613 = vmatpush.bf16.msra.mxu2 %v2032_v8  ;;  %v2008_v16 = vor.u32 %v2487_v13, %v2007_v11  ;;  %v2012_v17 = vor.u32 %v2485_v14, %v2009_v15  ;;  %v2015_v18 = vld [vmem:[%s3682_s2 + $0xc8] sm:$0xf]  ;;  %v2488_v19 = vld [vmem:[%s3682_s2 + $0xd4] sm:$0xf0]  ;;  %v2486_v20 = vld [vmem:[%s3682_s2 + $0xcc] sm:$0xf] }
  0x1b   : > { %627 = vmatpush.bf16.msra.mxu3 %v2036_v12  ;;  %v2016_v21 = vor.u32 %v2488_v19, %v2015_v18  ;;  %v2017_v22 = vld [vmem:[%s3682_s2 + $0xd8] sm:$0xf0]  ;;  %v1991_v23 = vld [vmem:[%s3682_s2 + $0xa0] sm:$0xf]  ;;  %v2483_v24 = vld [vmem:[%s3682_s2 + $0xac] sm:$0xf0] }
  0x1c   : > { %v2020_v25 = vor.u32 %v2486_v20, %v2017_v22  ;;  %v2481_v26 = vld [vmem:[%s3682_s2 + $0xa4] sm:$0xf]  ;;  %v1993_v27 = vld [vmem:[%s3682_s2 + $0xb0] sm:$0xf0]  ;;  %v1999_v28 = vld [vmem:[%s3682_s2 + $0xa8] sm:$0xf]  ;;  %v1992_v29 = vor.u32 %v2483_v24, %v1991_v23 }
  0x1d   : > { %586 = vmatpush.bf16.msra.mxu0 %v2008_v16  ;;  %v2484_v30 = vld [vmem:[%s3682_s2 + $0xb4] sm:$0xf0]  ;;  %v2482_v31 = vld [vmem:[%s3682_s2 + $0xac] sm:$0xf]  ;;  %v2001_v32 = vld [vmem:[%s3682_s2 + $0xb8] sm:$0xf0]  ;;  %v1996_v33 = vor.u32 %v2481_v26, %v1993_v27 }
  0x1e   : > { %600 = vmatpush.bf16.msra.mxu1 %v2012_v17  ;;  %614 = vmatpush.bf16.msra.mxu2 %v2016_v21  ;;  %v2000_v34 = vor.u32 %v2484_v30, %v1999_v28  ;;  %v1975_v35 = vld [vmem:[%s3682_s2 + $0x80] sm:$0xf]  ;;  %v2479_v36 = vld [vmem:[%s3682_s2 + $0x8c] sm:$0xf0]  ;;  %v2477_v37 = vld [vmem:[%s3682_s2 + $0x84] sm:$0xf]  ;;  %v2004_v38 = vor.u32 %v2482_v31, %v2001_v32 }
  0x1f   : > { %628 = vmatpush.bf16.msra.mxu3 %v2020_v25  ;;  %v1977_v39 = vld [vmem:[%s3682_s2 + $0x90] sm:$0xf0]  ;;  %v1983_v40 = vld [vmem:[%s3682_s2 + $0x88] sm:$0xf]  ;;  %v2480_v41 = vld [vmem:[%s3682_s2 + $0x94] sm:$0xf0]  ;;  %v1976_v44 = vor.u32 %v2479_v36, %v1975_v35 }
  0x20   : > { %v2478_v42 = vld [vmem:[%s3682_s2 + $0x8c] sm:$0xf]  ;;  %v1985_v43 = vld [vmem:[%s3682_s2 + $0x98] sm:$0xf0]  ;;  %v1980_v45 = vor.u32 %v2477_v37, %v1977_v39  ;;  %v1984_v46 = vor.u32 %v2480_v41, %v1983_v40  ;;  %v1959_v47 = vld [vmem:[%s3682_s2 + $0x60] sm:$0xf] }
  0x21   : > { %587 = vmatpush.bf16.msra.mxu0 %v1992_v29  ;;  %v2475_v48 = vld [vmem:[%s3682_s2 + $0x6c] sm:$0xf0]  ;;  %v2473_v49 = vld [vmem:[%s3682_s2 + $0x64] sm:$0xf]  ;;  %v1988_v50 = vor.u32 %v2478_v42, %v1985_v43  ;;  %v1961_v51 = vld [vmem:[%s3682_s2 + $0x70] sm:$0xf0] }
  0x22   : > { %601 = vmatpush.bf16.msra.mxu1 %v1996_v33  ;;  %615 = vmatpush.bf16.msra.mxu2 %v2000_v34  ;;  %v1967_v52 = vld [vmem:[%s3682_s2 + $0x68] sm:$0xf]  ;;  %v2476_v53 = vld [vmem:[%s3682_s2 + $0x74] sm:$0xf0]  ;;  %v2474_v54 = vld [vmem:[%s3682_s2 + $0x6c] sm:$0xf]  ;;  %v1960_v56 = vor.u32 %v2475_v48, %v1959_v47  ;;  %v1964_v57 = vor.u32 %v2473_v49, %v1961_v51 }
  0x23   : > { %629 = vmatpush.bf16.msra.mxu3 %v2004_v38  ;;  %v1969_v55 = vld [vmem:[%s3682_s2 + $0x78] sm:$0xf0]  ;;  %v1968_v58 = vor.u32 %v2476_v53, %v1967_v52  ;;  %v1943_v59 = vld [vmem:[%s3682_s2 + $0x40] sm:$0xf]  ;;  %v2471_v60 = vld [vmem:[%s3682_s2 + $0x4c] sm:$0xf0] }
  0x24   : > { %v2469_v61 = vld [vmem:[%s3682_s2 + $0x44] sm:$0xf]  ;;  %v1972_v62 = vor.u32 %v2474_v54, %v1969_v55  ;;  %v1945_v63 = vld [vmem:[%s3682_s2 + $0x50] sm:$0xf0]  ;;  %v1951_v0 = vld [vmem:[%s3682_s2 + $0x48] sm:$0xf]  ;;  %v1944_v4 = vor.u32 %v2471_v60, %v1943_v59 }
  0x25   : > { %588 = vmatpush.bf16.msra.mxu0 %v1976_v44  ;;  %v2472_v1 = vld [vmem:[%s3682_s2 + $0x54] sm:$0xf0]  ;;  %v2470_v2 = vld [vmem:[%s3682_s2 + $0x4c] sm:$0xf]  ;;  %v1953_v3 = vld [vmem:[%s3682_s2 + $0x58] sm:$0xf0]  ;;  %v1948_v5 = vor.u32 %v2469_v61, %v1945_v63 }
  0x26   : > { %602 = vmatpush.bf16.msra.mxu1 %v1980_v45  ;;  %616 = vmatpush.bf16.msra.mxu2 %v1984_v46  ;;  %v1952_v6 = vor.u32 %v2472_v1, %v1951_v0  ;;  %v1927_v7 = vld [vmem:[%s3682_s2 + $0x20] sm:$0xf]  ;;  %v2467_v8 = vld [vmem:[%s3682_s2 + $0x2c] sm:$0xf0]  ;;  %v2465_v9 = vld [vmem:[%s3682_s2 + $0x24] sm:$0xf]  ;;  %v1956_v10 = vor.u32 %v2470_v2, %v1953_v3 }
  0x27   : > { %630 = vmatpush.bf16.msra.mxu3 %v1988_v50  ;;  %v1929_v11 = vld [vmem:[%s3682_s2 + $0x30] sm:$0xf0]  ;;  %v1935_v12 = vld [vmem:[%s3682_s2 + $0x28] sm:$0xf]  ;;  %v2468_v13 = vld [vmem:[%s3682_s2 + $0x34] sm:$0xf0]  ;;  %v1928_v16 = vor.u32 %v2467_v8, %v1927_v7 }
  0x28   : > { %v2466_v14 = vld [vmem:[%s3682_s2 + $0x2c] sm:$0xf]  ;;  %v1937_v15 = vld [vmem:[%s3682_s2 + $0x38] sm:$0xf0]  ;;  %v1911_v17 = vld [vmem:[%s3682_s2] sm:$0xf]  ;;  %v1932_v20 = vor.u32 %v2465_v9, %v1929_v11  ;;  %v1936_v21 = vor.u32 %v2468_v13, %v1935_v12 }
  0x29   : > { %589 = vmatpush.bf16.msra.mxu0 %v1960_v56  ;;  %v2463_v18 = vld [vmem:[%s3682_s2 + $0xc] sm:$0xf0]  ;;  %v2461_v19 = vld [vmem:[%s3682_s2 + $0x4] sm:$0xf]  ;;  %v1913_v22 = vld [vmem:[%s3682_s2 + $0x10] sm:$0xf0]  ;;  %v1940_v25 = vor.u32 %v2466_v14, %v1937_v15 }
  0x2a   : > { %603 = vmatpush.bf16.msra.mxu1 %v1964_v57  ;;  %617 = vmatpush.bf16.msra.mxu2 %v1968_v58  ;;  %v1919_v23 = vld [vmem:[%s3682_s2 + $0x8] sm:$0xf]  ;;  %v2464_v24 = vld [vmem:[%s3682_s2 + $0x14] sm:$0xf0]  ;;  %v2263_v26 = vld [vmem:[%s3671_s4 + $0x1c0] sm:$0xf]  ;;  %v1912_v31 = vor.u32 %v2463_v18, %v1911_v17  ;;  %v1916_v35 = vor.u32 %v2461_v19, %v1913_v22 }
  0x2b   : > { %631 = vmatpush.bf16.msra.mxu3 %v1972_v62  ;;  %v2553_v27 = vld [vmem:[%s3671_s4 + $0x1dc] sm:$0xf0]  ;;  %v2549_v28 = vld [vmem:[%s3671_s4 + $0x1c4] sm:$0xf]  ;;  %v2271_v30 = vld [vmem:[%s3671_s4 + $0x1c8] sm:$0xf]  ;;  %v1920_v36 = vor.u32 %v2464_v24, %v1919_v23 }
  0x2c   : > { %v2265_v29 = vld [vmem:[%s3671_s4 + $0x1e0] sm:$0xf0]  ;;  %v2554_v32 = vld [vmem:[%s3671_s4 + $0x1e4] sm:$0xf0]  ;;  %v2462_v33 = vld [vmem:[%s3682_s2 + $0xc] sm:$0xf]  ;;  %v2264_v39 = vor.u32 %v2553_v27, %v2263_v26 }
  0x2d   : > { %590 = vmatpush.bf16.msra.mxu0 %v1944_v4  ;;  %v1921_v34 = vld [vmem:[%s3682_s2 + $0x18] sm:$0xf0]  ;;  %v2550_v37 = vld [vmem:[%s3671_s4 + $0x1cc] sm:$0xf]  ;;  %s3058_s26 = scalar_select %p367_p10, %s2813_s17, 1  ;;  %v2268_v40 = vor.u32 %v2549_v28, %v2265_v29  ;;  %v2272_v43 = vor.u32 %v2554_v32, %v2271_v30  ;;  %vm1202_vm0 = vcmask 1044480  }
  0x2e   : > { %604 = vmatpush.bf16.msra.mxu1 %v1948_v5  ;;  %618 = vmatpush.bf16.msra.mxu2 %v1952_v6  ;;  %v2273_v38 = vld [vmem:[%s3671_s4 + $0x1e8] sm:$0xf0]  ;;  %v2231_v41 = vld [vmem:[%s3671_s4 + $0x180] sm:$0xf]  ;;  %v1924_v44 = vor.u32 %v2462_v33, %v1921_v34  ;;  %v2541_v45 = vld [vmem:[%s3671_s4 + $0x184] sm:$0xf] }
  0x2f   : > { %632 = vmatpush.bf16.msra.mxu3 %v1956_v10  ;;  %v2545_v42 = vld [vmem:[%s3671_s4 + $0x19c] sm:$0xf0]  ;;  %v2233_v46 = vld [vmem:[%s3671_s4 + $0x1a0] sm:$0xf0]  ;;  %s2459_s21 = sshll.u32 %s3058_s26, 4  ;;  %v2276_v47 = vor.u32 %v2550_v37, %v2273_v38  ;;  %vm1174_vm1 = vcmask 80896   ;;  %s1830_s26 = scalar_lea.hbm %s3677_s10, %s2813_s17 }
  0x30   : > { %v2239_v48 = vld [vmem:[%s3671_s4 + $0x188] sm:$0xf]  ;;  %v2542_v50 = vld [vmem:[%s3671_s4 + $0x18c] sm:$0xf]  ;;  %s371_s18 = scalar_lea.vmem %s3667_s0, %s2459_s21  ;;  %v2232_v54 = vor.u32 %v2545_v42, %v2231_v41  ;;  %v2236_v55 = vor.u32 %v2541_v45, %v2233_v46  ;;  %v2199_v57 = vld [vmem:[%s3671_s4 + $0x140] sm:$0xf]  ;;  %s376_s2 = scalar_lea.vmem %s3668_s1, %s2459_s21 }
  0x31   : > { %591 = vmatpush.bf16.msra.mxu0 %v1928_v16  ;;  %v2546_v49 = vld [vmem:[%s3671_s4 + $0x1a4] sm:$0xf0]  ;;  %v2241_v51 = vld [vmem:[%s3671_s4 + $0x1a8] sm:$0xf0]  ;;  %v378_v52 = vld [vmem:[%s371_s18] sm:$0xff]  ;;  %s1834_s20 = sshll.u32 %s1830_s26, 4  ;;  %s1835_s20 = int_to_ptr.hbm [resolvable:$true] %s1834_s20 }
  0x32   : > { %605 = vmatpush.bf16.msra.mxu1 %v1932_v20  ;;  %619 = vmatpush.bf16.msra.mxu2 %v1936_v21  ;;  %v379_v53 = vld [vmem:[%s371_s18 + $0x8] sm:$0xff]  ;;  %v2240_v58 = vor.u32 %v2546_v49, %v2239_v48  ;;  %v2537_v59 = vld [vmem:[%s3671_s4 + $0x15c] sm:$0xf0]  ;;  %v2533_v60 = vld [vmem:[%s3671_s4 + $0x144] sm:$0xf]  ;;  %v2244_v62 = vor.u32 %v2542_v50, %v2241_v51  ;;  %s1832_s18 = sshll.u32 %s366_s12, 4  ;;  %s1833_s18 = int_to_ptr.vmem [resolvable:$true] %s1832_s18 }
  0x33   : > { %633 = vmatpush.bf16.msra.mxu3 %v1940_v25  ;;  %v414_v56 = vpack.c.bf16 %v379_v53, %v378_v52  ;;  %v2201_v61 = vld [vmem:[%s3671_s4 + $0x160] sm:$0xf0]  ;;  %v2207_v63 = vld [vmem:[%s3671_s4 + $0x148] sm:$0xf]  ;;  %v2534_v1 = vld [vmem:[%s3671_s4 + $0x14c] sm:$0xf]  ;;  %v2200_v3 = vor.u32 %v2537_v59, %v2199_v57 }
  0x34   : > { %v2538_v0 = vld [vmem:[%s3671_s4 + $0x164] sm:$0xf0]  ;;  %v2209_v2 = vld [vmem:[%s3671_s4 + $0x168] sm:$0xf0]  ;;  %v2204_v4 = vor.u32 %v2533_v60, %v2201_v61  ;;  %v2167_v5 = vld [vmem:[%s3671_s4 + $0x100] sm:$0xf] }
  0x35   : > { %592 = vmatpush.bf16.msra.mxu0 %v1912_v31  ;;  %v2208_v6 = vor.u32 %v2538_v0, %v2207_v63  ;;  %v2529_v7 = vld [vmem:[%s3671_s4 + $0x11c] sm:$0xf0]  ;;  %v2525_v8 = vld [vmem:[%s3671_s4 + $0x104] sm:$0xf]  ;;  %v2212_v10 = vor.u32 %v2534_v1, %v2209_v2  ;;  %v2175_v11 = vld [vmem:[%s3671_s4 + $0x108] sm:$0xf] }
  0x36   : > { %606 = vmatpush.bf16.msra.mxu1 %v1916_v35  ;;  %620 = vmatpush.bf16.msra.mxu2 %v1920_v36  ;;  %v2169_v9 = vld [vmem:[%s3671_s4 + $0x120] sm:$0xf0]  ;;  %v2530_v12 = vld [vmem:[%s3671_s4 + $0x124] sm:$0xf0]  ;;  %v2526_v13 = vld [vmem:[%s3671_s4 + $0x10c] sm:$0xf]  ;;  %v2168_v15 = vor.u32 %v2529_v7, %v2167_v5 }
  0x37   : > { %634 = vmatpush.bf16.msra.mxu3 %v1924_v44  ;;  %v2177_v14 = vld [vmem:[%s3671_s4 + $0x128] sm:$0xf0]  ;;  %v2172_v16 = vor.u32 %v2525_v8, %v2169_v9  ;;  %v2135_v17 = vld [vmem:[%s3671_s4 + $0xc0] sm:$0xf]  ;;  %v2176_v18 = vor.u32 %v2530_v12, %v2175_v11  ;;  %v2517_v20 = vld [vmem:[%s3671_s4 + $0xc4] sm:$0xf] }
  0x38   : > { %593 = vmatmul.bf16.vlgmr.msra.gmra.mxu0 %v414_v56  ;;  %v2521_v19 = vld [vmem:[%s3671_s4 + $0xdc] sm:$0xf0]  ;;  %v2137_v21 = vld [vmem:[%s3671_s4 + $0xe0] sm:$0xf0]  ;;  %v2180_v22 = vor.u32 %v2526_v13, %v2177_v14  ;;  %v2143_v23 = vld [vmem:[%s3671_s4 + $0xc8] sm:$0xf] }
  0x39   : > { %1044 = vmatpush.bf16.msrb.mxu0 %v2264_v39  ;;  %607 = vmatmul.bf16.vlgmr.msra.gmra.mxu1 %v414_v56  ;;  %v2522_v24 = vld [vmem:[%s3671_s4 + $0xe4] sm:$0xf0]  ;;  %v2518_v25 = vld [vmem:[%s3671_s4 + $0xcc] sm:$0xf]  ;;  %v2136_v27 = vor.u32 %v2521_v19, %v2135_v17  ;;  %v2140_v28 = vor.u32 %v2517_v20, %v2137_v21  ;;  %v2103_v29 = vld [vmem:[%s3671_s4 + $0x80] sm:$0xf] }
  0x3a   : > { %1058 = vmatpush.bf16.msrb.mxu1 %v2268_v40  ;;  %1072 = vmatpush.bf16.msrb.mxu2 %v2272_v43  ;;  %v2145_v26 = vld [vmem:[%s3671_s4 + $0xe8] sm:$0xf0]  ;;  %v2513_v30 = vld [vmem:[%s3671_s4 + $0x9c] sm:$0xf0]  ;;  %v2144_v31 = vor.u32 %v2522_v24, %v2143_v23  ;;  %v2509_v32 = vld [vmem:[%s3671_s4 + $0x84] sm:$0xf] }
  0x3b   : > { %1086 = vmatpush.bf16.msrb.mxu3 %v2276_v47  ;;  %621 = vmatmul.bf16.vlgmr.msra.gmra.mxu2 %v414_v56  ;;  %v2105_v33 = vld [vmem:[%s3671_s4 + $0xa0] sm:$0xf0]  ;;  %v2148_v34 = vor.u32 %v2518_v25, %v2145_v26  ;;  %v2111_v35 = vld [vmem:[%s3671_s4 + $0x88] sm:$0xf]  ;;  %v2510_v37 = vld [vmem:[%s3671_s4 + $0x8c] sm:$0xf]  ;;  %v2104_v39 = vor.u32 %v2513_v30, %v2103_v29 }
  0x3c   : > { %635 = vmatmul.bf16.vlgmr.msra.gmra.mxu3 %v414_v56  ;;  %v2514_v36 = vld [vmem:[%s3671_s4 + $0xa4] sm:$0xf0]  ;;  %v2113_v38 = vld [vmem:[%s3671_s4 + $0xa8] sm:$0xf0]  ;;  %v2108_v40 = vor.u32 %v2509_v32, %v2105_v33  ;;  %v2071_v41 = vld [vmem:[%s3671_s4 + $0x40] sm:$0xf] }
  0x3d   : > { %1045 = vmatpush.bf16.msrb.mxu0 %v2232_v54  ;;  %v2112_v42 = vor.u32 %v2514_v36, %v2111_v35  ;;  %v2505_v43 = vld [vmem:[%s3671_s4 + $0x5c] sm:$0xf0]  ;;  %v2501_v44 = vld [vmem:[%s3671_s4 + $0x44] sm:$0xf]  ;;  %v2116_v46 = vor.u32 %v2510_v37, %v2113_v38  ;;  %v2079_v47 = vld [vmem:[%s3671_s4 + $0x48] sm:$0xf] }
  0x3e   : > { %1059 = vmatpush.bf16.msrb.mxu1 %v2236_v55  ;;  %1073 = vmatpush.bf16.msrb.mxu2 %v2240_v58  ;;  %v2073_v45 = vld [vmem:[%s3671_s4 + $0x60] sm:$0xf0]  ;;  %v2506_v48 = vld [vmem:[%s3671_s4 + $0x64] sm:$0xf0]  ;;  %v2502_v49 = vld [vmem:[%s3671_s4 + $0x4c] sm:$0xf]  ;;  %v2072_v51 = vor.u32 %v2505_v43, %v2071_v41 }
  0x3f   : > { %1087 = vmatpush.bf16.msrb.mxu3 %v2244_v62  ;;  %v2081_v50 = vld [vmem:[%s3671_s4 + $0x68] sm:$0xf0]  ;;  %v2076_v52 = vor.u32 %v2501_v44, %v2073_v45  ;;  %v2039_v53 = vld [vmem:[%s3671_s4] sm:$0xf]  ;;  %v2493_v55 = vld [vmem:[%s3671_s4 + $0x4] sm:$0xf]  ;;  %v2080_v56 = vor.u32 %v2506_v48, %v2079_v47 }
  0x40   : > { %v2497_v54 = vld [vmem:[%s3671_s4 + $0x1c] sm:$0xf0]  ;;  %v2041_v57 = vld [vmem:[%s3671_s4 + $0x20] sm:$0xf0]  ;;  %v2047_v58 = vld [vmem:[%s3671_s4 + $0x8] sm:$0xf]  ;;  %v2084_v60 = vor.u32 %v2502_v49, %v2081_v50 }
  0x41   : > { %1046 = vmatpush.bf16.msrb.mxu0 %v2200_v3  ;;  %v2498_v59 = vld [vmem:[%s3671_s4 + $0x24] sm:$0xf0]  ;;  %v2494_v61 = vld [vmem:[%s3671_s4 + $0xc] sm:$0xf]  ;;  %v2551_v62 = vld [vmem:[%s3671_s4 + $0x1d4] sm:$0xf]  ;;  %v2040_v5 = vor.u32 %v2497_v54, %v2039_v53 }
  0x42   : > { %1060 = vmatpush.bf16.msrb.mxu1 %v2204_v4  ;;  %1074 = vmatpush.bf16.msrb.mxu2 %v2208_v6  ;;  %v2281_v63 = vld [vmem:[%s3671_s4 + $0x1f0] sm:$0xf0]  ;;  %v2049_v0 = vld [vmem:[%s3671_s4 + $0x28] sm:$0xf0]  ;;  %v2287_v1 = vld [vmem:[%s3671_s4 + $0x1d8] sm:$0xf]  ;;  %v2044_v6 = vor.u32 %v2493_v55, %v2041_v57  ;;  %v2048_v7 = vor.u32 %v2498_v59, %v2047_v58 }
  0x43   : > { %1088 = vmatpush.bf16.msrb.mxu3 %v2212_v10  ;;  %v2556_v2 = vld [vmem:[%s3671_s4 + $0x1f4] sm:$0xf0]  ;;  %v380_v3 = vld [vmem:[%s376_s2] sm:$0xff]  ;;  %v381_v4 = vld [vmem:[%s376_s2 + $0x8] sm:$0x3]  ;;  %v2284_v8 = vor.u32 %v2551_v62, %v2281_v63  ;;  %v2052_v9 = vor.u32 %v2494_v61, %v2049_v0  ;;  %s2686_s27 = sshra.s32 %s1835_s20, 4  ;;  %s2687_s27 = int_to_ptr.hbm [resolvable:$true] %s2686_s27 }
  0x44   : > { %v2288_v10 = vor.u32 %v2556_v2, %v2287_v1  ;;  %v3251_v11 = vpack.c.bf16 %v381_v4, %v380_v3  ;;  %v2255_v12 = vld [vmem:[%s3671_s4 + $0x198] sm:$0xf]  ;;  %v2543_v20 = vld [vmem:[%s3671_s4 + $0x194] sm:$0xf]  ;;  %v2247_v26 = vld [vmem:[%s3671_s4 + $0x190] sm:$0xf]  ;;  %p2693_p0 = scmp.lt.s32.totalorder %s2687_s27, %s3677_s10 }
  0x45   : > { %1047 = vmatpush.bf16.msrb.mxu0 %v2168_v15  ;;  %v2548_v13 = vld [vmem:[%s3671_s4 + $0x1b4] sm:$0xf0]  ;;  %v2279_v15 = vld [vmem:[%s3671_s4 + $0x1d0] sm:$0xf]  ;;  %v2249_v21 = vld [vmem:[%s3671_s4 + $0x1b0] sm:$0xf0] }
  0x46   : > { %1061 = vmatpush.bf16.msrb.mxu1 %v2172_v16  ;;  %1075 = vmatpush.bf16.msrb.mxu2 %v2176_v18  ;;  %v2256_v14 = vor.u32 %v2548_v13, %v2255_v12  ;;  %v2555_v16 = vld [vmem:[%s3671_s4 + $0x1ec] sm:$0xf0]  ;;  %v2223_v18 = vld [vmem:[%s3671_s4 + $0x158] sm:$0xf]  ;;  %v2252_v24 = vor.u32 %v2543_v20, %v2249_v21  ;;  %v2217_v25 = vld [vmem:[%s3671_s4 + $0x170] sm:$0xf0] }
  0x47   : > { %1089 = vmatpush.bf16.msrb.mxu3 %v2180_v22  ;;  %v2280_v17 = vor.u32 %v2555_v16, %v2279_v15  ;;  %v2540_v19 = vld [vmem:[%s3671_s4 + $0x174] sm:$0xf0]  ;;  %v2535_v22 = vld [vmem:[%s3671_s4 + $0x154] sm:$0xf]  ;;  %v2215_v33 = vld [vmem:[%s3671_s4 + $0x150] sm:$0xf] }
  0x48   : > { %v2224_v23 = vor.u32 %v2540_v19, %v2223_v18  ;;  %v2220_v29 = vor.u32 %v2535_v22, %v2217_v25  ;;  %v2191_v30 = vld [vmem:[%s3671_s4 + $0x118] sm:$0xf]  ;;  %v2185_v43 = vld [vmem:[%s3671_s4 + $0x130] sm:$0xf0]  ;;  %v2523_v53 = vld [vmem:[%s3671_s4 + $0xec] sm:$0xf0] }
  0x49   : > { %1048 = vmatpush.bf16.msrb.mxu0 %v2136_v27  ;;  %v2547_v27 = vld [vmem:[%s3671_s4 + $0x1ac] sm:$0xf0]  ;;  %v2159_v36 = vld [vmem:[%s3671_s4 + $0xd8] sm:$0xf]  ;;  %v2519_v44 = vld [vmem:[%s3671_s4 + $0xd4] sm:$0xf] }
  0x4a   : > { %1062 = vmatpush.bf16.msrb.mxu1 %v2140_v28  ;;  %1076 = vmatpush.bf16.msrb.mxu2 %v2144_v31  ;;  %v2248_v28 = vor.u32 %v2547_v27, %v2247_v26  ;;  %v2532_v31 = vld [vmem:[%s3671_s4 + $0x134] sm:$0xf0]  ;;  %v2511_v50 = vld [vmem:[%s3671_s4 + $0x94] sm:$0xf]  ;;  %v2119_v59 = vld [vmem:[%s3671_s4 + $0x90] sm:$0xf] }
  0x4b   : > { %1090 = vmatpush.bf16.msrb.mxu3 %v2148_v34  ;;  %v2192_v32 = vor.u32 %v2532_v31, %v2191_v30  ;;  %v2539_v34 = vld [vmem:[%s3671_s4 + $0x16c] sm:$0xf0]  ;;  %v2524_v37 = vld [vmem:[%s3671_s4 + $0xf4] sm:$0xf0]  ;;  %v2121_v54 = vld [vmem:[%s3671_s4 + $0xb0] sm:$0xf0] }
  0x4c   : > { %v2216_v35 = vor.u32 %v2539_v34, %v2215_v33  ;;  %v2160_v38 = vor.u32 %v2524_v37, %v2159_v36  ;;  %v2127_v47 = vld [vmem:[%s3671_s4 + $0x98] sm:$0xf]  ;;  %v2124_v61 = vor.u32 %v2511_v50, %v2121_v54  ;;  %v2503_v63 = vld [vmem:[%s3671_s4 + $0x54] sm:$0xf]  ;;  %v2087_v4 = vld [vmem:[%s3671_s4 + $0x50] sm:$0xf] }
  0x4d   : > { %1049 = vmatpush.bf16.msrb.mxu0 %v2104_v39  ;;  %v2183_v39 = vld [vmem:[%s3671_s4 + $0x110] sm:$0xf]  ;;  %v2516_v48 = vld [vmem:[%s3671_s4 + $0xb4] sm:$0xf0]  ;;  %v2089_v0 = vld [vmem:[%s3671_s4 + $0x70] sm:$0xf0] }
  0x4e   : > { %1063 = vmatpush.bf16.msrb.mxu1 %v2108_v40  ;;  %1077 = vmatpush.bf16.msrb.mxu2 %v2112_v42  ;;  %v2531_v40 = vld [vmem:[%s3671_s4 + $0x12c] sm:$0xf0]  ;;  %v2527_v42 = vld [vmem:[%s3671_s4 + $0x114] sm:$0xf]  ;;  %v2508_v57 = vld [vmem:[%s3671_s4 + $0x74] sm:$0xf0] }
  0x4f   : > { %1091 = vmatpush.bf16.msrb.mxu3 %v2116_v46  ;;  %v2184_v41 = vor.u32 %v2531_v40, %v2183_v39  ;;  %v2188_v45 = vor.u32 %v2527_v42, %v2185_v43  ;;  %v2153_v46 = vld [vmem:[%s3671_s4 + $0xf0] sm:$0xf0]  ;;  %v2063_v1 = vld [vmem:[%s3671_s4 + $0x18] sm:$0xf]  ;;  %v3395_v25 = vld [vmem:[%s3672_s5] sm:$0xff]  ;;  %s2688_s28 = scalar_lea.hbm %s2687_s27, 1 }
  0x50   : > { %v2156_v49 = vor.u32 %v2519_v44, %v2153_v46  ;;  %v2500_v2 = vld [vmem:[%s3671_s4 + $0x34] sm:$0xf0]  ;;  %v2495_v12 = vld [vmem:[%s3671_s4 + $0x14] sm:$0xf]  ;;  %v708_v26 = vperm.slane %v3395_v25, 0  ;;  %v709_v27 = vperm.slane %v3395_v25, 1  ;;  %p2689_p11 = scmp.ne.s32.totalorder %s2687_s27, %s2688_s28  ;;  %p2694_p1 = scmp.lt.s32.totalorder %s2692_s30, %s2688_s28 }
  0x51   : > { %1050 = vmatpush.bf16.msrb.mxu0 %v2072_v51  ;;  %v2128_v51 = vor.u32 %v2516_v48, %v2127_v47  ;;  %v2064_v3 = vor.u32 %v2500_v2, %v2063_v1  ;;  %v2057_v13 = vld [vmem:[%s3671_s4 + $0x30] sm:$0xf0]  ;;  %v415_v33 = vld [vmem:[%s3670_s3] sm:$0xf] }
  0x52   : > { %1064 = vmatpush.bf16.msrb.mxu1 %v2076_v52  ;;  %1078 = vmatpush.bf16.msrb.mxu2 %v2080_v56  ;;  %v2151_v52 = vld [vmem:[%s3671_s4 + $0xd0] sm:$0xf]  ;;  %v2095_v56 = vld [vmem:[%s3671_s4 + $0x58] sm:$0xf]  ;;  %v417_v40 = vperm.slane %v415_v33, 0  ;;  %v418_v42 = vperm.slane %v415_v33, 1  ;;  %p2690_p12 = pnand %p2689_p11, %p2830_p5  ;;  %p2695_p2 = por %p2694_p1, %p2693_p0 }
  0x53   : > { %1092 = vmatpush.bf16.msrb.mxu3 %v2084_v60  ;;  %v2152_v55 = vor.u32 %v2523_v53, %v2151_v52  ;;  %v2096_v58 = vor.u32 %v2508_v57, %v2095_v56  ;;  %v2515_v60 = vld [vmem:[%s3671_s4 + $0xac] sm:$0xf0]  ;;  %v419_v54 = vperm.slane %v415_v33, 2 }
  0x54   : > { %v2120_v62 = vor.u32 %v2515_v60, %v2119_v59  ;;  %p2691_p13 = pneg %p2690_p12 }
  0x55   : > { %1051 = vmatpush.bf16.msrb.mxu0 %v2040_v5  ;;  %v2507_v5 = vld [vmem:[%s3671_s4 + $0x6c] sm:$0xf0] }
  0x56   : > { %1065 = vmatpush.bf16.msrb.mxu1 %v2044_v6  ;;  %1079 = vmatpush.bf16.msrb.mxu2 %v2048_v7  ;;  %v2092_v6 = vor.u32 %v2503_v63, %v2089_v0  ;;  %v2088_v7 = vor.u32 %v2507_v5, %v2087_v4  ;;  %v420_v0 = vperm.slane %v415_v33, 3  ;;  %v2544_v4 = vld [vmem:[%s3671_s4 + $0x19c] sm:$0xf]  ;;  %p2696_p3 = pnand %p2695_p2, %p2691_p13 }
  0x57   : > { %1093 = vmatpush.bf16.msrb.mxu3 %v2052_v9  ;;  %v2499_v9 = vld [vmem:[%s3671_s4 + $0x2c] sm:$0xf0]  ;;  %v2257_v5 = vld [vmem:[%s3671_s4 + $0x1b8] sm:$0xf0] }
  0x58   : > { %1052 = vmatmul.bf16.vlgmr.msrb.gmra.mxu0 %v3251_v11 }
  0x59   : > { %1066 = vmatmul.bf16.vlgmr.msrb.gmra.mxu1 %v3251_v11  ;;  %1080 = vmatmul.bf16.vlgmr.msrb.gmra.mxu2 %v3251_v11 }
  0x5a   : > { %1114 = vmatpush.bf16.msra.mxu1 %v2284_v8  ;;  %1128 = vmatpush.bf16.msra.mxu2 %v2288_v10  ;;  %v2055_v8 = vld [vmem:[%s3671_s4 + $0x10] sm:$0xf] }
  0x5b   : > { %1094 = vmatmul.bf16.vlgmr.msrb.gmra.mxu3 %v3251_v11  ;;  %1100 = vmatpush.bf16.msra.mxu0 %v2280_v17  ;;  %v2056_v10 = vor.u32 %v2499_v9, %v2055_v8  ;;  %v2225_v8 = vld [vmem:[%s3671_s4 + $0x178] sm:$0xf0] }
  0x5e   : > { %1129 = vmatpush.bf16.msra.mxu2 %v2256_v14  ;;  %1115 = vmatpush.bf16.msra.mxu1 %v2252_v24  ;;  %v2060_v14 = vor.u32 %v2495_v12, %v2057_v13  ;;  %v2193_v12 = vld [vmem:[%s3671_s4 + $0x138] sm:$0xf0] }
  0x5f   : > { %1101 = vmatpush.bf16.msra.mxu0 %v2248_v28  ;;  %v2552_v28 = vld [vmem:[%s3671_s4 + $0x1dc] sm:$0xf] }
  0x60   : > { %v2520_v13 = vld [vmem:[%s3671_s4 + $0xdc] sm:$0xf] }
  0x62   : > { %1130 = vmatpush.bf16.msra.mxu2 %v2224_v23  ;;  %1116 = vmatpush.bf16.msra.mxu1 %v2220_v29  ;;  %v2289_v29 = vld [vmem:[%s3671_s4 + $0x1f8] sm:$0xf0] }
  0x63   : > { %1102 = vmatpush.bf16.msra.mxu0 %v2216_v35  ;;  %v2292_v30 = vor.u32 %v2552_v28, %v2289_v29 }
  0x65   : > { %1142 = vmatpush.bf16.msra.mxu3 %v2292_v30 }
  0x66   : > { %1131 = vmatpush.bf16.msra.mxu2 %v2192_v32  ;;  %1117 = vmatpush.bf16.msra.mxu1 %v2188_v45  ;;  %v711_v45 = vperm.slane %v3395_v25, 3 }
  0x67   : > { %1103 = vmatpush.bf16.msra.mxu0 %v2184_v41  ;;  %v710_v41 = vperm.slane %v3395_v25, 2 }
  0x6a   : > { %1132 = vmatpush.bf16.msra.mxu2 %v2160_v38  ;;  %1118 = vmatpush.bf16.msra.mxu1 %v2156_v49 }
  0x6b   : > { %1104 = vmatpush.bf16.msra.mxu0 %v2152_v55 }
  0x6e   : > { %1133 = vmatpush.bf16.msra.mxu2 %v2128_v51  ;;  %1119 = vmatpush.bf16.msra.mxu1 %v2124_v61 }
  0x6f   : > { %1105 = vmatpush.bf16.msra.mxu0 %v2120_v62 }
  0x72   : > { %1134 = vmatpush.bf16.msra.mxu2 %v2096_v58  ;;  %1120 = vmatpush.bf16.msra.mxu1 %v2092_v6  ;;  %v2536_v6 = vld [vmem:[%s3671_s4 + $0x15c] sm:$0xf] }
  0x73   : > { %1106 = vmatpush.bf16.msra.mxu0 %v2088_v7  ;;  %v2260_v7 = vor.u32 %v2544_v4, %v2257_v5  ;;  %v2228_v9 = vor.u32 %v2536_v6, %v2225_v8 }
  0x75   : > { %1143 = vmatpush.bf16.msra.mxu3 %v2260_v7 }
  0x76   : > { %1135 = vmatpush.bf16.msra.mxu2 %v2064_v3  ;;  %1121 = vmatpush.bf16.msra.mxu1 %v2060_v14 }
  0x77   : > { %1107 = vmatpush.bf16.msra.mxu0 %v2056_v10  ;;  %v2528_v10 = vld [vmem:[%s3671_s4 + $0x11c] sm:$0xf] }
  0x78   : > { %v2196_v14 = vor.u32 %v2528_v10, %v2193_v12 }
  0x79   : > { %1136 = vmatmul.bf16.vlgmr.msra.gmra.mxu2 %v3251_v11  ;;  %1122 = vmatmul.bf16.vlgmr.msra.gmra.mxu1 %v3251_v11 }
  0x7a   : > { %1108 = vmatmul.bf16.vlgmr.msra.gmra.mxu0 %v3251_v11  ;;  %1144 = vmatpush.bf16.msra.mxu3 %v2228_v9 }
  0x7e   : > { %1145 = vmatpush.bf16.msra.mxu3 %v2196_v14 }
  0xb5   : > { %v594_v15 = vpop.f32.mrf.mxu0 }
  0xb6   : > { %v608_v16 = vpop.f32.mrf.mxu1  ;;  %v595_v46 = vadd.f32 %v594_v15, %v417_v40  ;;  %v2161_v15 = vld [vmem:[%s3671_s4 + $0xf8] sm:$0xf0] }
  0xb7   : > { %v609_v49 = vadd.f32 %v608_v16, %v418_v42  ;;  %v2164_v16 = vor.u32 %v2520_v13, %v2161_v15 }
  0xb9   : > { %1146 = vmatpush.bf16.msra.mxu3 %v2164_v16 }
  0xbd   : > { %v596_v19 = vpop.f32.mrf.mxu0 }
  0xbe   : > { %v622_v17 = vpop.f32.mrf.mxu2  ;;  %v610_v20 = vpop.f32.mrf.mxu1  ;;  %v597_v47 = vadd.f32 %v596_v19, %v417_v40 }
  0xbf   : > { %v636_v18 = vpop.f32.mrf.mxu3  ;;  %v611_v50 = vadd.f32 %v610_v20, %v418_v42  ;;  %v623_v61 = vadd.f32 %v622_v17, %v419_v54  ;;  %v2512_v17 = vld [vmem:[%s3671_s4 + $0x9c] sm:$0xf] }
  0xc0   : > { %v1156_v56 = vpack.c.bf16 %v597_v47, %v595_v46  ;;  %v637_v1 = vadd.f32 %v636_v18, %v420_v0  ;;  %v2129_v18 = vld [vmem:[%s3671_s4 + $0xb8] sm:$0xf0] }
  0xc1   : > { %v1220_v59 = vpack.c.bf16 %v611_v50, %v609_v49  ;;  %v2132_v19 = vor.u32 %v2512_v17, %v2129_v18 }
  0xc3   : > { %1147 = vmatpush.bf16.msra.mxu3 %v2132_v19 }
  0xc6   : > { %v624_v21 = vpop.f32.mrf.mxu2 }
  0xc7   : > { %v638_v22 = vpop.f32.mrf.mxu3  ;;  %v625_v62 = vadd.f32 %v624_v21, %v419_v54 }
  0xc8   : > { %v639_v2 = vadd.f32 %v638_v22, %v420_v0 }
  0xc9   : > { %v1282_v63 = vpack.c.bf16 %v625_v62, %v623_v61 }
  0xca   : > { %v1344_v3 = vpack.c.bf16 %v639_v2, %v637_v1 }
  0xd5   : > { %v1053_v23 = vpop.f32.mrf.mxu0 }
  0xd6   : > { %v1067_v24 = vpop.f32.mrf.mxu1  ;;  %v1054_v31 = vadd.f32 %v1053_v23, %v708_v26  ;;  %v712_v23 = vperm.slane %v3395_v25, 4 }
  0xd7   : > { %v1068_v36 = vadd.f32 %v1067_v24, %v709_v27  ;;  %v714_v24 = vperm.slane %v3395_v25, 6 }
  0xdc   : > { %v1081_v32 = vpop.f32.mrf.mxu2 }
  0xdd   : > { %v1055_v34 = vpop.f32.mrf.mxu0  ;;  %v1082_v48 = vadd.f32 %v1081_v32, %v710_v41 }
  0xde   : > { %v1069_v35 = vpop.f32.mrf.mxu1  ;;  %v1056_v37 = vadd.f32 %v1055_v34, %v708_v26  ;;  %v1095_v39 = vpop.f32.mrf.mxu3  ;;  %v713_v26 = vperm.slane %v3395_v25, 5 }
  0xdf   : > { %v1070_v38 = vadd.f32 %v1069_v35, %v709_v27  ;;  %v1096_v52 = vadd.f32 %v1095_v39, %v711_v45  ;;  %v2504_v35 = vld [vmem:[%s3671_s4 + $0x5c] sm:$0xf] }
  0xe0   : > { %v1157_v43 = vpack.c.bf16 %v1056_v37, %v1054_v31 }
  0xe1   : > { %v1221_v44 = vpack.c.bf16 %v1070_v38, %v1068_v36  ;;  %v2097_v36 = vld [vmem:[%s3671_s4 + $0x78] sm:$0xf0] }
  0xe2   : > { %1165 = vmatpush.bf16.xpose.msrb.mxu1 %v1157_v43  ;;  %v2100_v39 = vor.u32 %v2504_v35, %v2097_v36 }
  0xe3   : > { %1229 = vmatpush.bf16.xpose.msrb.mxu2 %v1221_v44  ;;  %v2496_v44 = vld [vmem:[%s3671_s4 + $0x1c] sm:$0xf] }
  0xe4   : > { %v1083_v51 = vpop.f32.mrf.mxu2  ;;  %1148 = vmatpush.bf16.msra.mxu3 %v2100_v39 }
  0xe5   : > { %v1084_v53 = vadd.f32 %v1083_v51, %v710_v41 }
  0xe6   : > { %v1097_v55 = vpop.f32.mrf.mxu3 }
  0xe7   : > { %v1283_v57 = vpack.c.bf16 %v1084_v53, %v1082_v48  ;;  %v1098_v58 = vadd.f32 %v1097_v55, %v711_v45  ;;  %v2065_v45 = vld [vmem:[%s3671_s4 + $0x38] sm:$0xf0] }
  0xe8   : > { %v2068_v46 = vor.u32 %v2496_v44, %v2065_v45 }
  0xe9   : > { %v1345_v60 = vpack.c.bf16 %v1098_v58, %v1096_v52  ;;  %1291 = vmatpush.bf16.xpose.msrb.mxu0 %v1283_v57  ;;  %1166 = vmatmul.bf16.vlgmr.msrb.gmra.mxu1 %v1156_v56 }
  0xea   : > { %1230 = vmatmul.bf16.vlgmr.msrb.gmra.mxu2 %v1220_v59  ;;  %1149 = vmatpush.bf16.msra.mxu3 %v2068_v46 }
  0xeb   : > { %1353 = vmatpush.bf16.xpose.msra.mxu2 %v1345_v60 }
  0xed   : > { %1150 = vmatmul.bf16.vlgmr.msra.gmra.mxu3 %v3251_v11 }
  0xf0   : > { %1292 = vmatmul.bf16.vlgmr.msrb.gmra.mxu0 %v1282_v63 }
  0xf6   : > { %v1123_v22 = vpop.f32.mrf.mxu1 }
  0xf7   : > { %v1109_v20 = vpop.f32.mrf.mxu0  ;;  %v1124_v30 = vadd.f32 %v1123_v22, %v713_v26 }
  0xf8   : > { %v1110_v27 = vadd.f32 %v1109_v20, %v712_v23 }
  0xfa   : > { %1354 = vmatmul.bf16.vlgmr.msra.gmra.mxu2 %v1344_v3 }
  0xfc   : > { %v1137_v21 = vpop.f32.mrf.mxu2 }
  0xfd   : > { %v1138_v28 = vadd.f32 %v1137_v21, %v714_v24 }
  0xfe   : > { %v1125_v33 = vpop.f32.mrf.mxu1 }
  0xff   : > { %v1111_v29 = vpop.f32.mrf.mxu0  ;;  %v1126_v37 = vadd.f32 %v1125_v33, %v713_v26 }
 0x100   : > { %v1112_v31 = vadd.f32 %v1111_v29, %v712_v23 }
 0x101   : > { %v1261_v41 = vpack.c.bf16 %v1126_v37, %v1124_v30 }
 0x102   : > { %v1198_v38 = vpack.c.bf16 %v1112_v31, %v1110_v27 }
 0x103   : > { %v1266_v47 = vsel %vm1202_vm0, %v1261_v41, 0 }
 0x104   : > { %v1139_v32 = vpop.f32.mrf.mxu2  ;;  %v1204_v42 = vsel %vm1202_vm0, %v1198_v38, 0  ;;  %1275 = vmatpush.bf16.msrb.mxu3 %v1266_v47 }
 0x105   : > { %v1140_v34 = vadd.f32 %v1139_v32, %v714_v24  ;;  %1213 = vmatpush.bf16.msra.mxu1 %v1204_v42 }
 0x107   : > { %v1323_v40 = vpack.c.bf16 %v1140_v34, %v1138_v28 }
 0x109   : > { %v1328_v43 = vsel %vm1202_vm0, %v1323_v40, 0 }
 0x10a   : > { %1337 = vmatpush.bf16.msrb.mxu1 %v1328_v43 }
 0x166   : > { %v1167_v48 = vpop.f32.mrf.mxu1 }
 0x167   : > { %v1172_v49 = vmul.f32 0.17677669, %v1167_v48 }
 0x169   : > { %v1175_v50 = vsel %vm1174_vm1, %v1172_v49, -inf }
 0x16a   : > { %1176 = vmax.xlane.f32.xlu1 %v1175_v50  ;;  %v715_v50 = vperm.slane %v3395_v25, 7  ;;  %v2580_v25 = vld [vmem:[%s3673_s6 + $0xb8] sm:$0xff] }
 0x16b   : > { %1698 = vmatpush.bf16.msrb.mxu2 %v2580_v25 }
 0x16d   : > { %v1231_v51 = vpop.f32.mrf.mxu2  ;;  %v1293_v52 = vpop.f32.mrf.mxu0 }
 0x16e   : > { %v1236_v53 = vmul.f32 0.17677669, %v1231_v51  ;;  %v1169_v54 = vpop.f32.mrf.mxu1  ;;  %v1298_v63 = vmul.f32 0.17677669, %v1293_v52 }
 0x16f   : > { %v1173_v55 = vmul.f32 0.17677669, %v1169_v54 }
 0x170   : > { %v1238_v56 = vsel %vm1174_vm1, %v1236_v53, -inf  ;;  %v1300_v3 = vsel %vm1174_vm1, %v1298_v63, -inf }
 0x171   : > { %1239 = vmax.xlane.f32.xlu0 %v1238_v56  ;;  %v1178_v57 = vsel %vm1174_vm1, %v1173_v55, -inf }
 0x172   : > { %1179 = vmax.xlane.f32.xlu1 %v1178_v57 }
 0x175   : > { %v1233_v58 = vpop.f32.mrf.mxu2  ;;  %v1295_v59 = vpop.f32.mrf.mxu0 }
 0x176   : > { %v1237_v11 = vmul.f32 0.17677669, %v1233_v58  ;;  %v1299_v60 = vmul.f32 0.17677669, %v1295_v59  ;;  %v2564_v58 = vld [vmem:[%s3673_s6 + $0x38] sm:$0xff]  ;;  %v2563_v59 = vld [vmem:[%s3673_s6 + $0x30] sm:$0xff] }
 0x177   : > { %1670 = vmatpush.bf16.msra.mxu0 %v2564_v58 }
 0x178   : > { %v1241_v61 = vsel %vm1174_vm1, %v1237_v11, -inf  ;;  %v1303_v62 = vsel %vm1174_vm1, %v1299_v60, -inf }
 0x179   : > { %1242 = vmax.xlane.f32.xlu0 %v1241_v61  ;;  %v2562_v61 = vld [vmem:[%s3673_s6 + $0x28] sm:$0xff] }
 0x17a   : > { %1304 = vmax.xlane.f32.xlu1 %v1303_v62 }
 0x17b   : > { %1671 = vmatpush.bf16.msra.mxu0 %v2563_v59 }
 0x17d   : > { %v1355_v0 = vpop.f32.mrf.mxu2 }
 0x17e   : > { %v1360_v1 = vmul.f32 0.17677669, %v1355_v0 }
 0x17f   : > { %1672 = vmatpush.bf16.msra.mxu0 %v2562_v61 }
 0x180   : > { %v1362_v2 = vsel %vm1174_vm1, %v1360_v1, -inf }
 0x181   : > { %1363 = vmax.xlane.f32.xlu2 %v1362_v2  ;;  %1301 = vmax.xlane.f32.xlu0 %v1300_v3 }
 0x185   : > { %v1357_v4 = vpop.f32.mrf.mxu2 }
 0x186   : > { %v1361_v5 = vmul.f32 0.17677669, %v1357_v4 }
 0x188   : > { %v1365_v6 = vsel %vm1174_vm1, %v1361_v5, -inf }
 0x189   : > { %1366 = vmax.xlane.f32.xlu2 %v1365_v6 }
 0x1dd   : > { %v1177_v7 = vpop.xlane.xlu1 %1176 }
 0x1de   : > { %v1181_v8 = vsub.f32 %v1172_v49, %v1177_v7  ;;  %v1151_v49 = vpop.f32.mrf.mxu3 }
 0x1df   : > { %v1152_v51 = vadd.f32 %v1151_v49, %v715_v50  ;;  %v2573_v49 = vld [vmem:[%s3673_s6 + $0x80] sm:$0xff] }
 0x1e0   : > { %v1183_v9 = vmul.f32 1.442695, %v1181_v8 }
 0x1e2   : > { %2638 = vpow2.f32 %v1183_v9  ;;  %v2572_v9 = vld [vmem:[%s3673_s6 + $0x78] sm:$0xff] }
 0x1e4   : > { %v1240_v10 = vpop.xlane.xlu0 %1239 }
 0x1e5   : > { %v1244_v12 = vsub.f32 %v1236_v53, %v1240_v10  ;;  %v1180_v13 = vpop.xlane.xlu1 %1179 }
 0x1e6   : > { %v1182_v15 = vsub.f32 %v1173_v55, %v1180_v13  ;;  %v1153_v52 = vpop.f32.mrf.mxu3 }
 0x1e7   : > { %v1246_v14 = vmul.f32 1.442695, %v1244_v12  ;;  %v1154_v53 = vadd.f32 %v1153_v52, %v715_v50  ;;  %v2560_v12 = vld [vmem:[%s3673_s6 + $0x18] sm:$0xff]  ;;  %v2582_v50 = vld [vmem:[%s3673_s6 + $0xc8] sm:$0xff] }
 0x1e8   : > { %v3467_v16 = vpop.eup %2638  ;;  %v1185_v18 = vmul.f32 1.442695, %v1182_v15 }
 0x1e9   : > { %2640 = vpow2.f32 %v1246_v14  ;;  %v1187_v17 = vsel %vm1174_vm1, %v3467_v16, 0.0  ;;  %v1385_v54 = vpack.c.bf16 %v1154_v53, %v1152_v51  ;;  %v2571_v14 = vld [vmem:[%s3673_s6 + $0x70] sm:$0xff]  ;;  %v2581_v51 = vld [vmem:[%s3673_s6 + $0xc0] sm:$0xff] }
 0x1ea   : > { %1188 = vadd.xlane.f32.xlu1 %v1187_v17  ;;  %2642 = vpow2.f32 %v1185_v18  ;;  %v2570_v17 = vld [vmem:[%s3673_s6 + $0x68] sm:$0xff] }
 0x1eb   : > { %v1390_v55 = vsel %vm1202_vm0, %v1385_v54, 0 }
 0x1ec   : > { %v1243_v19 = vpop.xlane.xlu0 %1242  ;;  %1399 = vmatpush.bf16.msra.mxu3 %v1390_v55 }
 0x1ed   : > { %v1245_v20 = vsub.f32 %v1237_v11, %v1243_v19  ;;  %v1305_v24 = vpop.xlane.xlu1 %1304 }
 0x1ee   : > { %v1307_v32 = vsub.f32 %v1299_v60, %v1305_v24 }
 0x1ef   : > { %v3471_v21 = vpop.eup %2640  ;;  %v1248_v22 = vmul.f32 1.442695, %v1245_v20  ;;  %v2569_v20 = vld [vmem:[%s3673_s6 + $0x60] sm:$0xff] }
 0x1f0   : > { %v1250_v23 = vsel %vm1174_vm1, %v3471_v21, 0.0  ;;  %v3475_v28 = vpop.eup %2642  ;;  %v1310_v37 = vmul.f32 1.442695, %v1307_v32  ;;  %v2568_v32 = vld [vmem:[%s3673_s6 + $0x58] sm:$0xff] }
 0x1f1   : > { %2644 = vpow2.f32 %v1248_v22  ;;  %1251 = vadd.xlane.f32.xlu2 %v1250_v23  ;;  %v1190_v36 = vsel %vm1174_vm1, %v3475_v28, 0.0 }
 0x1f4   : > { %v1364_v26 = vpop.xlane.xlu2 %1363  ;;  %v1302_v27 = vpop.xlane.xlu0 %1301 }
 0x1f5   : > { %v1368_v29 = vsub.f32 %v1360_v1, %v1364_v26  ;;  %v1306_v30 = vsub.f32 %v1298_v63, %v1302_v27  ;;  %v2561_v1 = vld [vmem:[%s3673_s6 + $0x20] sm:$0xff] }
 0x1f6   : > { %1673 = vmatpush.bf16.msra.mxu0 %v2561_v1  ;;  %v2593_v1 = vld [vmem:[%s3675_s8 + $0x20] sm:$0xff] }
 0x1f7   : > { %v2645_v31 = vpop.eup %2644  ;;  %v1370_v33 = vmul.f32 1.442695, %v1368_v29  ;;  %v1308_v34 = vmul.f32 1.442695, %v1306_v30  ;;  %v2559_v30 = vld [vmem:[%s3673_s6 + $0x10] sm:$0xff] }
 0x1f8   : > { %v1253_v35 = vsel %vm1174_vm1, %v2645_v31, 0.0 }
 0x1f9   : > { %2646 = vpow2.f32 %v1370_v33  ;;  %1254 = vadd.xlane.f32.xlu0 %v1253_v35  ;;  %1191 = vadd.xlane.f32.xlu2 %v1190_v36  ;;  %v2588_v33 = vld [vmem:[%s3673_s6 + $0xf8] sm:$0xff]  ;;  %v2578_v35 = vld [vmem:[%s3673_s6 + $0xa8] sm:$0xff]  ;;  %v2567_v36 = vld [vmem:[%s3673_s6 + $0x50] sm:$0xff] }
 0x1fa   : > { %2648 = vpow2.f32 %v1308_v34  ;;  %1674 = vmatpush.bf16.msra.mxu0 %v2560_v12  ;;  %v2558_v34 = vld [vmem:[%s3673_s6 + $0x8] sm:$0xff] }
 0x1fb   : > { %2650 = vpow2.f32 %v1310_v37  ;;  %v2587_v37 = vld [vmem:[%s3673_s6 + $0xf0] sm:$0xff] }
 0x1fc   : > { %v1367_v38 = vpop.xlane.xlu2 %1366 }
 0x1fd   : > { %v1369_v39 = vsub.f32 %v1361_v5, %v1367_v38  ;;  %v2557_v38 = vld [vmem:[%s3673_s6] sm:$0xff] }
 0x1fe   : > { %1675 = vmatpush.bf16.msra.mxu0 %v2559_v30 }
 0x1ff   : > { %v3480_v40 = vpop.eup %2646  ;;  %v1372_v41 = vmul.f32 1.442695, %v1369_v39  ;;  %v2577_v39 = vld [vmem:[%s3673_s6 + $0xa0] sm:$0xff] }
 0x200   : > { %v3482_v42 = vpop.eup %2648  ;;  %v1374_v43 = vsel %vm1174_vm1, %v3480_v40, 0.0 }
 0x201   : > { %2652 = vpow2.f32 %v1372_v41  ;;  %1375 = vadd.xlane.f32.xlu0 %v1374_v43  ;;  %v1312_v44 = vsel %vm1174_vm1, %v3482_v42, 0.0  ;;  %v3488_v45 = vpop.eup %2650  ;;  %v2586_v41 = vld [vmem:[%s3673_s6 + $0xe8] sm:$0xff]  ;;  %v2565_v43 = vld [vmem:[%s3673_s6 + $0x40] sm:$0xff] }
 0x202   : > { %1313 = vadd.xlane.f32.xlu2 %v1312_v44  ;;  %v1315_v48 = vsel %vm1174_vm1, %v3488_v45, 0.0  ;;  %1676 = vmatpush.bf16.msra.mxu0 %v2558_v34  ;;  %v2585_v44 = vld [vmem:[%s3673_s6 + $0xe0] sm:$0xff] }
 0x206   : > { %1677 = vmatpush.bf16.msra.mxu0 %v2557_v38 }
 0x207   : > { %v3490_v46 = vpop.eup %2652 }
 0x208   : > { %v1377_v47 = vsel %vm1174_vm1, %v3490_v46, 0.0 }
 0x209   : > { %1378 = vadd.xlane.f32.xlu1 %v1377_v47  ;;  %1316 = vadd.xlane.f32.xlu0 %v1315_v48  ;;  %v2574_v47 = vld [vmem:[%s3673_s6 + $0x88] sm:$0xff]  ;;  %v2583_v48 = vld [vmem:[%s3673_s6 + $0xd0] sm:$0xff] }
 0x25d   : > { %v1189_v57 = vpop.xlane.xlu1 %1188 }
 0x264   : > { %v1252_v56 = vpop.xlane.xlu2 %1251 }
 0x265   : > { %2654 = vrcp.f32 %v1252_v56 }
 0x266   : > { %2656 = vrcp.f32 %v1189_v57 }
 0x26b   : > { %v2655_v62 = vpop.eup %2654 }
 0x26c   : > { %v1255_v11 = vpop.xlane.xlu0 %1254  ;;  %v1192_v60 = vpop.xlane.xlu2 %1191  ;;  %v1258_v3 = vmul.f32 %v2655_v62, %v3471_v21  ;;  %v2596_v62 = vld [vmem:[%s3675_s8 + $0x38] sm:$0xff] }
 0x26d   : > { %2658 = vrcp.f32 %v1255_v11  ;;  %v2657_v63 = vpop.eup %2656  ;;  %1807 = vmatpush.bf16.msrb.mxu0 %v2596_v62 }
 0x26e   : > { %2660 = vrcp.f32 %v1192_v60  ;;  %v1195_v6 = vmul.f32 %v2657_v63, %v3467_v16  ;;  %v2595_v63 = vld [vmem:[%s3675_s8 + $0x30] sm:$0xff] }
 0x271   : > { %1808 = vmatpush.bf16.msrb.mxu0 %v2595_v63 }
 0x273   : > { %v2659_v0 = vpop.eup %2658 }
 0x274   : > { %v2661_v2 = vpop.eup %2660  ;;  %v1259_v4 = vmul.f32 %v2659_v0, %v2645_v31  ;;  %v1376_v5 = vpop.xlane.xlu0 %1375  ;;  %v2579_v31 = vld [vmem:[%s3673_s6 + $0xb0] sm:$0xff]  ;;  %v2594_v0 = vld [vmem:[%s3675_s8 + $0x28] sm:$0xff] }
 0x275   : > { %v1196_v7 = vmul.f32 %v2661_v2, %v3475_v28  ;;  %v1314_v13 = vpop.xlane.xlu2 %1313  ;;  %1699 = vmatpush.bf16.msrb.mxu2 %v2579_v31  ;;  %1809 = vmatpush.bf16.msrb.mxu0 %v2594_v0  ;;  %v2592_v2 = vld [vmem:[%s3675_s8 + $0x18] sm:$0xff] }
 0x276   : > { %v1260_v8 = vpack.c.bf16 %v1259_v4, %v1258_v3  ;;  %2662 = vrcp.f32 %v1314_v13  ;;  %v2591_v3 = vld [vmem:[%s3675_s8 + $0x10] sm:$0xff]  ;;  %v2590_v4 = vld [vmem:[%s3675_s8 + $0x8] sm:$0xff] }
 0x277   : > { %v1197_v10 = vpack.c.bf16 %v1196_v7, %v1195_v6  ;;  %2664 = vrcp.f32 %v1376_v5  ;;  %v2589_v6 = vld [vmem:[%s3675_s8] sm:$0xff] }
 0x278   : > { %2294 = vmatmul.msk.bf16.vlgmr.msrb.gmra.mxu3 %vm1174_vm1, %v1260_v8 }
 0x279   : > { %2293 = vmatmul.msk.bf16.vlgmr.msra.gmra.mxu1 %vm1174_vm1, %v1197_v10  ;;  %1712 = vmatpush.bf16.msrb.mxu3 %v2588_v33  ;;  %v2637_v10 = vld [vmem:[%s3674_s7] ss:$0 sm:$0xff] }
 0x27a   : > { %1684 = vmatpush.bf16.msra.mxu1 %v2572_v9  ;;  %1700 = vmatpush.bf16.msrb.mxu2 %v2578_v35  ;;  %v2736_v9 = vmov 16.0  }
 0x27b   : > { %1810 = vmatpush.bf16.msrb.mxu0 %v2593_v1 }
 0x27c   : > { %v1317_v15 = vpop.xlane.xlu0 %1316  ;;  %v1379_v16 = vpop.xlane.xlu1 %1378 }
 0x27d   : > { %2666 = vrcp.f32 %v1317_v15  ;;  %v2663_v18 = vpop.eup %2662  ;;  %1713 = vmatpush.bf16.msrb.mxu3 %v2587_v37 }
 0x27e   : > { %2668 = vrcp.f32 %v1379_v16  ;;  %1685 = vmatpush.bf16.msra.mxu1 %v2571_v14  ;;  %v2665_v19 = vpop.eup %2664  ;;  %v1320_v23 = vmul.f32 %v2663_v18, %v3482_v42  ;;  %1701 = vmatpush.bf16.msrb.mxu2 %v2577_v39  ;;  %v2576_v42 = vld [vmem:[%s3673_s6 + $0x98] sm:$0xff] }
 0x27f   : > { %v1382_v26 = vmul.f32 %v2665_v19, %v3480_v40  ;;  %v2566_v40 = vld [vmem:[%s3673_s6 + $0x48] sm:$0xff]  ;;  %1811 = vmatpush.bf16.msrb.mxu0 %v2592_v2  ;;  %2670 = vrcp.f32 %v2736_v9 }
 0x281   : > { %1714 = vmatpush.bf16.msrb.mxu3 %v2586_v41  ;;  %v1758_v41 = vld [vmem:[%s3676_s9] sm:$0x1] }
 0x282   : > { %1686 = vmatpush.bf16.msra.mxu1 %v2570_v17  ;;  %1702 = vmatpush.bf16.msrb.mxu2 %v2576_v42 }
 0x283   : > { %v2667_v21 = vpop.eup %2666  ;;  %1812 = vmatpush.bf16.msrb.mxu0 %v2591_v3 }
 0x284   : > { %v2669_v22 = vpop.eup %2668  ;;  %v1321_v24 = vmul.f32 %v2667_v21, %v3488_v45  ;;  %v2575_v45 = vld [vmem:[%s3673_s6 + $0x90] sm:$0xff] }
 0x285   : > { %v1383_v27 = vmul.f32 %v2669_v22, %v3490_v46  ;;  %1715 = vmatpush.bf16.msrb.mxu3 %v2585_v44  ;;  %v2584_v46 = vld [vmem:[%s3673_s6 + $0xd8] sm:$0xff]  ;;  %v2671_v15 = vpop.eup %2670 }
 0x286   : > { %v1322_v28 = vpack.c.bf16 %v1321_v24, %v1320_v23  ;;  %1687 = vmatpush.bf16.msra.mxu1 %v2569_v20  ;;  %1703 = vmatpush.bf16.msrb.mxu2 %v2575_v45  ;;  %v1734_v21 = vmul.f32 16.0, %v2671_v15  ;;  %vm1738_vm2 = vweird.f32 %v2671_v15 }
 0x287   : > { %v1384_v29 = vpack.c.bf16 %v1383_v27, %v1382_v26  ;;  %1813 = vmatpush.bf16.msrb.mxu0 %v2590_v4 }
 0x289   : > { %2295 = vmatmul.msk.bf16.vlgmr.msrb.gmra.mxu1 %vm1174_vm1, %v1322_v28  ;;  %2296 = vmatmul.msk.bf16.vlgmr.msra.gmra.mxu3 %vm1174_vm1, %v1384_v29  ;;  %v1735_v28 = vsub.f32 1.0, %v1734_v21 }
 0x28a   : > { %1688 = vmatpush.bf16.msra.mxu1 %v2568_v32  ;;  %1716 = vmatpush.bf16.msrb.mxu3 %v2584_v46 }
 0x28b   : > { %1704 = vmatpush.bf16.msrb.mxu2 %v2574_v47  ;;  %1814 = vmatpush.bf16.msrb.mxu0 %v2589_v6  ;;  %v1736_v31 = vmul.f32 %v2671_v15, %v1735_v28 }
 0x28d   : > { %v1737_v34 = vadd.f32 %v2671_v15, %v1736_v31 }
 0x28e   : > { %1689 = vmatpush.bf16.msra.mxu1 %v2567_v36  ;;  %1717 = vmatpush.bf16.msrb.mxu3 %v2583_v48 }
 0x28f   : > { %1705 = vmatpush.bf16.msrb.mxu2 %v2573_v49  ;;  %v1739_v37 = vsel %vm1738_vm2, %v2671_v15, %v1737_v34 }
 0x292   : > { %1690 = vmatpush.bf16.msra.mxu1 %v2566_v40  ;;  %1718 = vmatpush.bf16.msrb.mxu3 %v2582_v50 }
 0x296   : > { %1691 = vmatpush.bf16.msra.mxu1 %v2565_v43  ;;  %1719 = vmatpush.bf16.msrb.mxu3 %v2581_v51 }
 0x2f6   : > { %v1215_v52 = vpop.f32.mrf.mxu1 }
 0x2fb   : > { %v1277_v53 = vpop.f32.mrf.mxu3 }
 0x2fe   : > { %v1217_v54 = vpop.f32.mrf.mxu1 }
 0x2ff   : > { %v1470_v55 = vpack.c.bf16 %v1217_v54, %v1215_v52 }
 0x301   : > { %1678 = vmatmul.bf16.vlgmr.msra.gmra.mxu0 %v1470_v55 }
 0x303   : > { %v1279_v56 = vpop.f32.mrf.mxu3 }
 0x304   : > { %v1471_v57 = vpack.c.bf16 %v1279_v56, %v1277_v53 }
 0x306   : > { %v1339_v58 = vpop.f32.mrf.mxu1  ;;  %1692 = vmatmul.bf16.vlgmr.msra.gmra.mxu1 %v1471_v57 }
 0x30c   : > { %v1401_v59 = vpop.f32.mrf.mxu3 }
 0x30e   : > { %v1341_v25 = vpop.f32.mrf.mxu1 }
 0x30f   : > { %v1472_v11 = vpack.c.bf16 %v1341_v25, %v1339_v58 }
 0x311   : > { %1706 = vmatmul.bf16.vlgmr.msrb.gmra.mxu2 %v1472_v11 }
 0x314   : > { %v1403_v60 = vpop.f32.mrf.mxu3 }
 0x315   : > { %v1473_v61 = vpack.c.bf16 %v1403_v60, %v1401_v59 }
 0x317   : > { %1720 = vmatmul.bf16.vlgmr.msrb.gmra.mxu3 %v1473_v61 }
 0x37e   : > { %v1679_v5 = vpop.f32.mrf.mxu0 }
 0x37f   : > { %v1680_v16 = vadd.f32 %v2637_v10, %v1679_v5 }
 0x383   : > { %v1693_v7 = vpop.f32.mrf.mxu1 }
 0x384   : > { %v1694_v19 = vadd.f32 %v1693_v7, %v1680_v16 }
 0x386   : > { %v1681_v12 = vpop.f32.mrf.mxu0 }
 0x387   : > { %v1682_v17 = vadd.f32 %v2637_v10, %v1681_v12 }
 0x38b   : > { %v1695_v14 = vpop.f32.mrf.mxu1 }
 0x38c   : > { %v1696_v20 = vadd.f32 %v1695_v14, %v1682_v17 }
 0x394   : > { %v1707_v8 = vpop.f32.mrf.mxu2 }
 0x395   : > { %v1708_v22 = vadd.f32 %v1707_v8, %v1694_v19 }
 0x39a   : > { %v1721_v13 = vpop.f32.mrf.mxu3 }
 0x39b   : > { %v1722_v26 = vadd.f32 %v1721_v13, %v1708_v22 }
 0x39c   : > { %v1709_v18 = vpop.f32.mrf.mxu2 }
 0x39d   : > { %v1710_v23 = vadd.f32 %v1709_v18, %v1696_v20 }
 0x3a2   : > { %v1723_v24 = vpop.f32.mrf.mxu3 }
 0x3a3   : > { %v1724_v27 = vadd.f32 %v1723_v24, %v1710_v23 }
 0x3a5   : > { %v1726_v29 = vadd.f32 %v1724_v27, %v1722_v26 }
 0x3a7   : > { %v1727_v30 = vrot.slane %v1726_v29, 4 }
 0x3a9   : > { %v1728_v32 = vadd.f32 %v1727_v30, %v1726_v29 }
 0x3ab   : > { %v1729_v33 = vrot.slane %v1728_v32, 2 }
 0x3ad   : > { %v1730_v35 = vadd.f32 %v1729_v33, %v1728_v32 }
 0x3af   : > { %v1731_v36 = vrot.slane %v1730_v35, 1 }
 0x3b1   : > { %v1732_v38 = vadd.f32 %v1731_v36, %v1730_v35 }
 0x3b3   : > { %v1740_v39 = vmul.f32 %v1739_v37, %v1732_v38 }
 0x3b5   : > { %v1757_v40 = vpack.c.bf16 %v1740_v39, %v1740_v39 }
 0x3b7   : > { %1815 = vmatmul.bf16.vlgmr.msrb.gmra.mxu0 %v1757_v40 }
 0x434   : > { %v1816_v42 = vpop.f32.mrf.mxu0 }
 0x435   : > { %v1817_v43 = vadd.f32 %v1816_v42, %v1758_v41 }
 0x437   : > { %1820 = vst [vmem:[%s366_s12] sm:$0x1] %v1817_v43 }
 0x438   : > { %2699 = shalt.err (!%p2696_p3)
}
 0x439   : > { %2597 = dma.vmem_to_hbm [thread:$0]  (%p2830_p5), %s1833_s18, 16, %s1835_s20, %s1822_s25  }
 0x43c   : > { %v1818_v44 = vpop.f32.mrf.mxu0 }
 0x43d PF: > { %p2603_p4 = scmp.ge.s32.totalorder %s2734_s16, 2  ;;  %s1846_s29 = sand.u32 1, %s2722_s13  }
 0x43e   : > { %s1847_s26 = scalar_lea.sflag [#allocation3], %s1846_s29 }
 0x43f   : > { %p2600_p7 = pnand %p2603_p4, %p2834_p6 }
 0x441   : > { %p2601_p8 = pneg %p2600_p7 }
 0x443   : > { %2717 = dma.done.wait (%p2601_p8), %s1847_s26, 16  }
 0x444   : > { %2719 = vsyncadd (%p2601_p8), %s1847_s26, 4294967280  ;;  %s3683_s21 = sld [smem:[#allocation5_spill]]  ;;  %p20_p9 = scmp.ge.s32.totalorder %s2817_s19, 4  }
 0x445   : > { %s3684_s13 = smov %s2726_s14  ;;  %s3685_s14 = smov %s2730_s15 }
 0x446   : > { %s3687_s16 = smov %s2817_s19  ;;  %22 = sbr.rel (!%p20_p9) target bundleno = 5 (0x5), region = 98 }
 0x44a   : > { %s3686_s15 = smov %s3683_s21 }
 0x44b   :  { %1852 = vsyncpa [#allocation3], 1 }
 0x44c   :  { %1854 = vsyncpa [#allocation3 + $0x1], 1 }

</bundles_post_ra>
